<compile_context>
chip_gen: v5e
topology: v5e:2x2
jax: 0.10.0
libtpu: 0.0.40
codegen_flags: <defaults>
</compile_context>

<pallas_src>
from functools import partial

import jax
import jax.numpy as jnp
from jax.experimental import pallas as pl
from jax.experimental.pallas import tpu as pltpu


# ------------------------------------------------------------------ kernel ---

def _conv_taps(x3, w_ref, k_off, K, T_out):
    """Valid 1-D conv as K accumulated MXU matmuls (no im2col, no lane concat).

    x3    : (B, T_in, C_in)            bf16
    w_ref : (n_taps, C_in, C_out) bf16 VMEM ref; tap k of this conv = w_ref[k_off + k]
    returns (B, T_out, C_out) f32 (bias NOT added).
    """
    acc = None
    for k in range(K):                                   # K is static -> unrolled
        xk = x3[:, k:k + T_out, :]                       # (B, T_out, C_in)
        y = jnp.einsum("btc,co->bto", xk, w_ref[k_off + k],
                       preferred_element_type=jnp.float32)
        acc = y if acc is None else acc + y
    return acc


def _branch(x3, w1_ref, w2_ref, k_off, b1, b2, wo, bo, *, K, T, H, H2):
    """One conv -> ReLU -> conv -> ReLU -> (Linear folded into time-mean) branch."""
    T1 = T - K + 1
    T2 = T1 - K + 1

    # conv1 + bias + ReLU (f32 math), single bf16 cast BEFORE any time slicing.
    h1 = _conv_taps(x3, w1_ref, k_off, K, T1) + b1[None]          # (B, T1, H)  f32
    h1 = jnp.maximum(h1, 0.0).astype(jnp.bfloat16)

    # conv2 + bias + ReLU.
    h2 = _conv_taps(h1, w2_ref, k_off, K, T2) + b2[None]          # (B, T2, H2) f32
    h2 = jnp.maximum(h2, 0.0)

    # Output Linear folded into the time mean (both are linear => order swaps):
    # mean_t first, then an H2 contraction on the VPU/XLU (no lane-1 matmul).
    h2m = jnp.sum(h2, axis=1) * jnp.float32(1.0 / T2)             # (B, H2)
    return jnp.sum(h2m * wo, axis=-1, keepdims=True) + bo         # (B, 1)


def disc_kernel(x_ref, w1_ref, w2_ref, misc_ref, out_ref, *, T, H, H2, Ks, Kl):
    x3 = x_ref[...]                                               # (B, T, P) bf16

    bs1 = misc_ref[0:1, 0:H]
    bl1 = misc_ref[1:2, 0:H]
    bs2 = misc_ref[2:3, 0:H2]
    bl2 = misc_ref[3:4, 0:H2]
    wos = misc_ref[4:5, 0:H2]
    wol = misc_ref[5:6, 0:H2]
    bos = misc_ref[6:7, 0:1]
    bol = misc_ref[7:8, 0:1]

    short = _branch(x3, w1_ref, w2_ref, 0, bs1, bs2, wos, bos,
                    K=Ks, T=T, H=H, H2=H2)
    long_ = _branch(x3, w1_ref, w2_ref, Ks, bl1, bl2, wol, bol,
                    K=Kl, T=T, H=H, H2=H2)

    out_ref[...] = jnp.concatenate([short, long_], axis=-1)       # (B, 2)


# ------------------------------------------------- one-time parameter pack ---

def pack_params(params, *, short_size, long_size):
    """Pack the 12 parameter arrays into 3 kernel operands.  Call ONCE when the
    weights are loaded — this work is static across forward calls."""
    H = params["ws1"].shape[2]
    H2 = params["ws2"].shape[2]
    W = max(H, H2)           # misc row width: no silent truncation if H2 > H

    # Per-tap conv weights stacked along a leading "tap" axis: plane selection
    # w_ref[k] in the kernel is alignment-free for any (P, H, H2, K) config.
    w1_blob = jnp.concatenate([params["ws1"], params["wl1"]],
                              axis=0).astype(jnp.bfloat16)        # (Ks+Kl, P, H)
    w2_blob = jnp.concatenate([params["ws2"], params["wl2"]],
                              axis=0).astype(jnp.bfloat16)        # (Ks+Kl, H, H2)

    def row(v):
        v = v.reshape(-1).astype(jnp.float32)
        return jnp.pad(v, (0, W - v.shape[0]))[None, :]

    misc = jnp.concatenate(
        [row(params["bs1"]), row(params["bl1"]),
         row(params["bs2"]), row(params["bl2"]),
         row(params["wos"]), row(params["wol"]),
         row(params["bos"]), row(params["bol"])], axis=0)         # (8, W) f32

    return {"w1": w1_blob, "w2": w2_blob, "misc": misc}


# ----------------------------------------------------------------- wrapper ---

def rnn_discriminator(x, packed, *, short_size, long_size):
    B, T, P = x.shape
    n_taps, P_w, H = packed["w1"].shape
    H2 = packed["w2"].shape[2]
    Ks, Kl = short_size, long_size
    assert P_w == P and n_taps == Ks + Kl
    # Guard: valid convs must leave a positive time extent (T2 = T - 2K + 2 > 0).
    assert T - 2 * (Ks - 1) > 0 and T - 2 * (Kl - 1) > 0, "sequence too short"

    T1s, T2s = T - Ks + 1, T - 2 * Ks + 2
    T1l, T2l = T - Kl + 1, T - 2 * Kl + 2
    flops = 2 * B * (Ks * T1s * P * H + Ks * T2s * H * H2
                     + Kl * T1l * P * H + Kl * T2l * H * H2)
    bytes_accessed = (B * T * P * 2 + packed["w1"].size * 2
                      + packed["w2"].size * 2 + packed["misc"].size * 4 + B * 2 * 4)

    kernel = partial(disc_kernel, T=T, H=H, H2=H2, Ks=Ks, Kl=Kl)
    vmem = pl.BlockSpec(memory_space=pltpu.MemorySpace.VMEM)

    out = pl.pallas_call(
        kernel,
        out_shape=jax.ShapeDtypeStruct((B, 2), jnp.float32),
        in_specs=[vmem] * 4,
        out_specs=vmem,
        cost_estimate=pl.CostEstimate(flops=flops, transcendentals=0,
                                      bytes_accessed=bytes_accessed),
    )(x.astype(jnp.bfloat16), packed["w1"], packed["w2"], packed["misc"])

    return out[:, 0], out[:, 1]  # (B,), (B,) -- matching torch's return


# --------------------------------------------------- deterministic params ---

def init_params(key, pose_dim, hidden_dim, short_size, long_size):
    h2 = hidden_dim // 2
    ks = jax.random.split(key, 12)

    def u(k, shape, fan_in):
        bound = 1.0 / jnp.sqrt(jnp.float32(fan_in))
        return jax.random.uniform(k, shape, jnp.float32, -bound, bound)

    return {
        # conv weights stored as (K, Cin, Cout); biases as (1, Cout)
        "ws1": u(ks[0], (short_size, pose_dim, hidden_dim), pose_dim * short_size),
        "bs1": u(ks[1], (1, hidden_dim), pose_dim * short_size),
        "ws2": u(ks[2], (short_size, hidden_dim, h2), hidden_dim * short_size),
        "bs2": u(ks[3], (1, h2), hidden_dim * short_size),
        "wos": u(ks[4], (h2, 1), h2),
        "bos": u(ks[5], (1, 1), h2),
        "wl1": u(ks[6], (long_size, pose_dim, hidden_dim), pose_dim * long_size),
        "bl1": u(ks[7], (1, hidden_dim), pose_dim * long_size),
        "wl2": u(ks[8], (long_size, hidden_dim, h2), hidden_dim * long_size),
        "bl2": u(ks[9], (1, h2), hidden_dim * long_size),
        "wol": u(ks[10], (h2, 1), h2),
        "bol": u(ks[11], (1, 1), h2),
    }


# --------------------------------------------------------- plain-JAX ref ---

def reference(x, params, *, short_size, long_size):
    def conv1d(inp_bct, w_kio, b):
        w_oik = jnp.transpose(w_kio, (2, 1, 0))  # (Cout, Cin, K), torch layout
        out = jax.lax.conv_general_dilated(
            inp_bct, w_oik, window_strides=(1,), padding="VALID",
            dimension_numbers=("NCH", "OIH", "NCH"))
        return out + b.reshape(1, -1, 1)

    def branch(w1, b1, w2, b2, wo, bo):
        xt = jnp.transpose(x, (0, 2, 1))               # (B, P, T)
        h = jax.nn.relu(conv1d(xt, w1, b1))
        h = jax.nn.relu(conv1d(h, w2, b2))
        ht = jnp.transpose(h, (0, 2, 1))               # (B, T2, H2)
        o = ht @ wo + bo                               # (B, T2, 1)
        return jnp.mean(o, axis=(1, 2))                # (B,)

    s = branch(params["ws1"], params["bs1"], params["ws2"], params["bs2"],
               params["wos"], params["bos"])
    l = branch(params["wl1"], params["bl1"], params["wl2"], params["bl2"],
               params["wol"], params["bol"])
    return s, l


# -------------------------------------------------------------------- main ---

if __name__ == "__main__":
    B, T = 2, 24
    pose_dim, hidden_dim = 16, 32
    short_size, long_size = 2, 10

    key = jax.random.PRNGKey(0)
    kx, kp = jax.random.split(key)
    x = jax.random.normal(kx, (B, T, pose_dim), jnp.float32)
    params = init_params(kp, pose_dim, hidden_dim, short_size, long_size)

    # One-time weight packing (hoisted out of the per-call path).
    packed = pack_params(params, short_size=short_size, long_size=long_size)
    packed = jax.block_until_ready(packed)

    short, long_ = rnn_discriminator(x, packed,
                                     short_size=short_size, long_size=long_size)
    jax.block_until_ready((short, long_))

    s_ref, l_ref = reference(x, params, short_size=short_size, long_size=long_size)
    # bf16 MXU operands (f32 accumulation) => slightly relaxed tolerance.
    assert jnp.allclose(short, s_ref, atol=2e-2, rtol=2e-2), (short, s_ref)
    assert jnp.allclose(long_, l_ref, atol=2e-2, rtol=2e-2), (long_, l_ref)

    print("KERNEL_OK")
</pallas_src>

<mosaic_0001>
module attributes {stable_mosaic.version = 11 : i64} {
  func.func @disc_kernel(%arg0: memref<2x24x16xbf16, #tpu.memory_space<vmem>>, %arg1: memref<12x16x32xbf16, #tpu.memory_space<vmem>>, %arg2: memref<12x32x16xbf16, #tpu.memory_space<vmem>>, %arg3: memref<8x32xf32, #tpu.memory_space<vmem>>, %arg4: memref<2x2xf32, #tpu.memory_space<vmem>>) attributes {dimension_semantics = [], scalar_prefetch = 0 : i64, scratch_operands = 0 : i64, tpu.core_type = #tpu.core_type<tc>} {
    %c0 = arith.constant 0 : index
    %c0_0 = arith.constant 0 : index
    %c0_1 = arith.constant 0 : index
    %0 = vector.load %arg0[%c0, %c0_0, %c0_1] : memref<2x24x16xbf16, #tpu.memory_space<vmem>>, vector<2x24x16xbf16>
    %c0_2 = arith.constant 0 : index
    %c0_3 = arith.constant 0 : index
    %1 = vector.load %arg3[%c0_2, %c0_3] : memref<8x32xf32, #tpu.memory_space<vmem>>, vector<1x32xf32>
    %c1 = arith.constant 1 : index
    %c0_4 = arith.constant 0 : index
    %2 = vector.load %arg3[%c1, %c0_4] : memref<8x32xf32, #tpu.memory_space<vmem>>, vector<1x32xf32>
    %c2 = arith.constant 2 : index
    %c0_5 = arith.constant 0 : index
    %3 = vector.load %arg3[%c2, %c0_5] : memref<8x32xf32, #tpu.memory_space<vmem>>, vector<1x16xf32>
    %c3 = arith.constant 3 : index
    %c0_6 = arith.constant 0 : index
    %4 = vector.load %arg3[%c3, %c0_6] : memref<8x32xf32, #tpu.memory_space<vmem>>, vector<1x16xf32>
    %c4 = arith.constant 4 : index
    %c0_7 = arith.constant 0 : index
    %5 = vector.load %arg3[%c4, %c0_7] : memref<8x32xf32, #tpu.memory_space<vmem>>, vector<1x16xf32>
    %c5 = arith.constant 5 : index
    %c0_8 = arith.constant 0 : index
    %6 = vector.load %arg3[%c5, %c0_8] : memref<8x32xf32, #tpu.memory_space<vmem>>, vector<1x16xf32>
    %c6 = arith.constant 6 : index
    %c0_9 = arith.constant 0 : index
    %7 = vector.load %arg3[%c6, %c0_9] : memref<8x32xf32, #tpu.memory_space<vmem>>, vector<1x1xf32>
    %c7 = arith.constant 7 : index
    %c0_10 = arith.constant 0 : index
    %8 = vector.load %arg3[%c7, %c0_10] : memref<8x32xf32, #tpu.memory_space<vmem>>, vector<1x1xf32>
    %9 = vector.extract_strided_slice %0 {offsets = [0, 0, 0], sizes = [2, 23, 16], strides = [1, 1, 1]} : vector<2x24x16xbf16> to vector<2x23x16xbf16>
    %c0_11 = arith.constant 0 : index
    %c0_12 = arith.constant 0 : index
    %c0_13 = arith.constant 0 : index
    %10 = vector.load %arg1[%c0_11, %c0_12, %c0_13] : memref<12x16x32xbf16, #tpu.memory_space<vmem>>, vector<1x16x32xbf16>
    %11 = vector.shape_cast %10 : vector<1x16x32xbf16> to vector<16x32xbf16>
    "tpu.trace_start"() <{level = 10 : i32, message = "btc,co->bto"}> : () -> ()
    %cst = arith.constant dense<0.000000e+00> : vector<2x23x32xf32>
    %12 = tpu.matmul %9, %11, %cst {dimension_numbers = #tpu.dot_dimension_numbers<[2], [0], [0, 1], [1], [0, 0, 0, 1, 1, 1], [], []>} : vector<2x23x16xbf16>, vector<16x32xbf16>, vector<2x23x32xf32> -> vector<2x23x32xf32>
    "tpu.trace_stop"() : () -> ()
    %13 = vector.extract_strided_slice %0 {offsets = [0, 1, 0], sizes = [2, 23, 16], strides = [1, 1, 1]} : vector<2x24x16xbf16> to vector<2x23x16xbf16>
    %c1_14 = arith.constant 1 : index
    %c0_15 = arith.constant 0 : index
    %c0_16 = arith.constant 0 : index
    %14 = vector.load %arg1[%c1_14, %c0_15, %c0_16] : memref<12x16x32xbf16, #tpu.memory_space<vmem>>, vector<1x16x32xbf16>
    %15 = vector.shape_cast %14 : vector<1x16x32xbf16> to vector<16x32xbf16>
    "tpu.trace_start"() <{level = 10 : i32, message = "btc,co->bto"}> : () -> ()
    %cst_17 = arith.constant dense<0.000000e+00> : vector<2x23x32xf32>
    %16 = tpu.matmul %13, %15, %cst_17 {dimension_numbers = #tpu.dot_dimension_numbers<[2], [0], [0, 1], [1], [0, 0, 0, 1, 1, 1], [], []>} : vector<2x23x16xbf16>, vector<16x32xbf16>, vector<2x23x32xf32> -> vector<2x23x32xf32>
    "tpu.trace_stop"() : () -> ()
    %17 = arith.addf %12, %16 : vector<2x23x32xf32>
    %18 = vector.shape_cast %1 : vector<1x32xf32> to vector<1x1x32xf32>
    %19 = vector.broadcast %18 : vector<1x1x32xf32> to vector<2x23x32xf32>
    %20 = arith.addf %17, %19 : vector<2x23x32xf32>
    %cst_18 = arith.constant 0.000000e+00 : f32
    %21 = vector.broadcast %cst_18 : f32 to vector<2x23x32xf32>
    %22 = arith.maximumf %20, %21 : vector<2x23x32xf32>
    %23 = arith.truncf %22 : vector<2x23x32xf32> to vector<2x23x32xbf16>
    %24 = vector.extract_strided_slice %23 {offsets = [0, 0, 0], sizes = [2, 22, 32], strides = [1, 1, 1]} : vector<2x23x32xbf16> to vector<2x22x32xbf16>
    %c0_19 = arith.constant 0 : index
    %c0_20 = arith.constant 0 : index
    %c0_21 = arith.constant 0 : index
    %25 = vector.load %arg2[%c0_19, %c0_20, %c0_21] : memref<12x32x16xbf16, #tpu.memory_space<vmem>>, vector<1x32x16xbf16>
    %26 = vector.shape_cast %25 : vector<1x32x16xbf16> to vector<32x16xbf16>
    "tpu.trace_start"() <{level = 10 : i32, message = "btc,co->bto"}> : () -> ()
    %cst_22 = arith.constant dense<0.000000e+00> : vector<2x22x16xf32>
    %27 = tpu.matmul %24, %26, %cst_22 {dimension_numbers = #tpu.dot_dimension_numbers<[2], [0], [0, 1], [1], [0, 0, 0, 1, 1, 1], [], []>} : vector<2x22x32xbf16>, vector<32x16xbf16>, vector<2x22x16xf32> -> vector<2x22x16xf32>
    "tpu.trace_stop"() : () -> ()
    %28 = vector.extract_strided_slice %23 {offsets = [0, 1, 0], sizes = [2, 22, 32], strides = [1, 1, 1]} : vector<2x23x32xbf16> to vector<2x22x32xbf16>
    %c1_23 = arith.constant 1 : index
    %c0_24 = arith.constant 0 : index
    %c0_25 = arith.constant 0 : index
    %29 = vector.load %arg2[%c1_23, %c0_24, %c0_25] : memref<12x32x16xbf16, #tpu.memory_space<vmem>>, vector<1x32x16xbf16>
    %30 = vector.shape_cast %29 : vector<1x32x16xbf16> to vector<32x16xbf16>
    "tpu.trace_start"() <{level = 10 : i32, message = "btc,co->bto"}> : () -> ()
    %cst_26 = arith.constant dense<0.000000e+00> : vector<2x22x16xf32>
    %31 = tpu.matmul %28, %30, %cst_26 {dimension_numbers = #tpu.dot_dimension_numbers<[2], [0], [0, 1], [1], [0, 0, 0, 1, 1, 1], [], []>} : vector<2x22x32xbf16>, vector<32x16xbf16>, vector<2x22x16xf32> -> vector<2x22x16xf32>
    "tpu.trace_stop"() : () -> ()
    %32 = arith.addf %27, %31 : vector<2x22x16xf32>
    %33 = vector.shape_cast %3 : vector<1x16xf32> to vector<1x1x16xf32>
    %34 = vector.broadcast %33 : vector<1x1x16xf32> to vector<2x22x16xf32>
    %35 = arith.addf %32, %34 : vector<2x22x16xf32>
    %cst_27 = arith.constant 0.000000e+00 : f32
    %36 = vector.broadcast %cst_27 : f32 to vector<2x22x16xf32>
    %37 = arith.maximumf %35, %36 : vector<2x22x16xf32>
    %cst_28 = arith.constant dense<0.000000e+00> : vector<2x16xf32>
    %38 = vector.multi_reduction <add>, %37, %cst_28 [1] : vector<2x22x16xf32> to vector<2x16xf32>
    %cst_29 = arith.constant 0.0454545468 : f32
    %39 = vector.broadcast %cst_29 : f32 to vector<2x16xf32>
    %40 = arith.mulf %38, %39 : vector<2x16xf32>
    %41 = vector.broadcast %5 : vector<1x16xf32> to vector<2x16xf32>
    %42 = arith.mulf %40, %41 : vector<2x16xf32>
    %cst_30 = arith.constant dense<0.000000e+00> : vector<2xf32>
    %43 = vector.multi_reduction <add>, %42, %cst_30 [1] : vector<2x16xf32> to vector<2xf32>
    %44 = vector.shape_cast %43 : vector<2xf32> to vector<2x1xf32>
    %45 = vector.broadcast %7 : vector<1x1xf32> to vector<2x1xf32>
    %46 = arith.addf %44, %45 : vector<2x1xf32>
    %47 = vector.extract_strided_slice %0 {offsets = [0, 0, 0], sizes = [2, 15, 16], strides = [1, 1, 1]} : vector<2x24x16xbf16> to vector<2x15x16xbf16>
    %c2_31 = arith.constant 2 : index
    %c0_32 = arith.constant 0 : index
    %c0_33 = arith.constant 0 : index
    %48 = vector.load %arg1[%c2_31, %c0_32, %c0_33] : memref<12x16x32xbf16, #tpu.memory_space<vmem>>, vector<1x16x32xbf16>
    %49 = vector.shape_cast %48 : vector<1x16x32xbf16> to vector<16x32xbf16>
    "tpu.trace_start"() <{level = 10 : i32, message = "btc,co->bto"}> : () -> ()
    %cst_34 = arith.constant dense<0.000000e+00> : vector<2x15x32xf32>
    %50 = tpu.matmul %47, %49, %cst_34 {dimension_numbers = #tpu.dot_dimension_numbers<[2], [0], [0, 1], [1], [0, 0, 0, 1, 1, 1], [], []>} : vector<2x15x16xbf16>, vector<16x32xbf16>, vector<2x15x32xf32> -> vector<2x15x32xf32>
    "tpu.trace_stop"() : () -> ()
    %51 = vector.extract_strided_slice %0 {offsets = [0, 1, 0], sizes = [2, 15, 16], strides = [1, 1, 1]} : vector<2x24x16xbf16> to vector<2x15x16xbf16>
    %c3_35 = arith.constant 3 : index
    %c0_36 = arith.constant 0 : index
    %c0_37 = arith.constant 0 : index
    %52 = vector.load %arg1[%c3_35, %c0_36, %c0_37] : memref<12x16x32xbf16, #tpu.memory_space<vmem>>, vector<1x16x32xbf16>
    %53 = vector.shape_cast %52 : vector<1x16x32xbf16> to vector<16x32xbf16>
    "tpu.trace_start"() <{level = 10 : i32, message = "btc,co->bto"}> : () -> ()
    %cst_38 = arith.constant dense<0.000000e+00> : vector<2x15x32xf32>
    %54 = tpu.matmul %51, %53, %cst_38 {dimension_numbers = #tpu.dot_dimension_numbers<[2], [0], [0, 1], [1], [0, 0, 0, 1, 1, 1], [], []>} : vector<2x15x16xbf16>, vector<16x32xbf16>, vector<2x15x32xf32> -> vector<2x15x32xf32>
    "tpu.trace_stop"() : () -> ()
    %55 = arith.addf %50, %54 : vector<2x15x32xf32>
    %56 = vector.extract_strided_slice %0 {offsets = [0, 2, 0], sizes = [2, 15, 16], strides = [1, 1, 1]} : vector<2x24x16xbf16> to vector<2x15x16xbf16>
    %c4_39 = arith.constant 4 : index
    %c0_40 = arith.constant 0 : index
    %c0_41 = arith.constant 0 : index
    %57 = vector.load %arg1[%c4_39, %c0_40, %c0_41] : memref<12x16x32xbf16, #tpu.memory_space<vmem>>, vector<1x16x32xbf16>
    %58 = vector.shape_cast %57 : vector<1x16x32xbf16> to vector<16x32xbf16>
    "tpu.trace_start"() <{level = 10 : i32, message = "btc,co->bto"}> : () -> ()
    %cst_42 = arith.constant dense<0.000000e+00> : vector<2x15x32xf32>
    %59 = tpu.matmul %56, %58, %cst_42 {dimension_numbers = #tpu.dot_dimension_numbers<[2], [0], [0, 1], [1], [0, 0, 0, 1, 1, 1], [], []>} : vector<2x15x16xbf16>, vector<16x32xbf16>, vector<2x15x32xf32> -> vector<2x15x32xf32>
    "tpu.trace_stop"() : () -> ()
    %60 = arith.addf %55, %59 : vector<2x15x32xf32>
    %61 = vector.extract_strided_slice %0 {offsets = [0, 3, 0], sizes = [2, 15, 16], strides = [1, 1, 1]} : vector<2x24x16xbf16> to vector<2x15x16xbf16>
    %c5_43 = arith.constant 5 : index
    %c0_44 = arith.constant 0 : index
    %c0_45 = arith.constant 0 : index
    %62 = vector.load %arg1[%c5_43, %c0_44, %c0_45] : memref<12x16x32xbf16, #tpu.memory_space<vmem>>, vector<1x16x32xbf16>
    %63 = vector.shape_cast %62 : vector<1x16x32xbf16> to vector<16x32xbf16>
    "tpu.trace_start"() <{level = 10 : i32, message = "btc,co->bto"}> : () -> ()
    %cst_46 = arith.constant dense<0.000000e+00> : vector<2x15x32xf32>
    %64 = tpu.matmul %61, %63, %cst_46 {dimension_numbers = #tpu.dot_dimension_numbers<[2], [0], [0, 1], [1], [0, 0, 0, 1, 1, 1], [], []>} : vector<2x15x16xbf16>, vector<16x32xbf16>, vector<2x15x32xf32> -> vector<2x15x32xf32>
    "tpu.trace_stop"() : () -> ()
    %65 = arith.addf %60, %64 : vector<2x15x32xf32>
    %66 = vector.extract_strided_slice %0 {offsets = [0, 4, 0], sizes = [2, 15, 16], strides = [1, 1, 1]} : vector<2x24x16xbf16> to vector<2x15x16xbf16>
    %c6_47 = arith.constant 6 : index
    %c0_48 = arith.constant 0 : index
    %c0_49 = arith.constant 0 : index
    %67 = vector.load %arg1[%c6_47, %c0_48, %c0_49] : memref<12x16x32xbf16, #tpu.memory_space<vmem>>, vector<1x16x32xbf16>
    %68 = vector.shape_cast %67 : vector<1x16x32xbf16> to vector<16x32xbf16>
    "tpu.trace_start"() <{level = 10 : i32, message = "btc,co->bto"}> : () -> ()
    %cst_50 = arith.constant dense<0.000000e+00> : vector<2x15x32xf32>
    %69 = tpu.matmul %66, %68, %cst_50 {dimension_numbers = #tpu.dot_dimension_numbers<[2], [0], [0, 1], [1], [0, 0, 0, 1, 1, 1], [], []>} : vector<2x15x16xbf16>, vector<16x32xbf16>, vector<2x15x32xf32> -> vector<2x15x32xf32>
    "tpu.trace_stop"() : () -> ()
    %70 = arith.addf %65, %69 : vector<2x15x32xf32>
    %71 = vector.extract_strided_slice %0 {offsets = [0, 5, 0], sizes = [2, 15, 16], strides = [1, 1, 1]} : vector<2x24x16xbf16> to vector<2x15x16xbf16>
    %c7_51 = arith.constant 7 : index
    %c0_52 = arith.constant 0 : index
    %c0_53 = arith.constant 0 : index
    %72 = vector.load %arg1[%c7_51, %c0_52, %c0_53] : memref<12x16x32xbf16, #tpu.memory_space<vmem>>, vector<1x16x32xbf16>
    %73 = vector.shape_cast %72 : vector<1x16x32xbf16> to vector<16x32xbf16>
    "tpu.trace_start"() <{level = 10 : i32, message = "btc,co->bto"}> : () -> ()
    %cst_54 = arith.constant dense<0.000000e+00> : vector<2x15x32xf32>
    %74 = tpu.matmul %71, %73, %cst_54 {dimension_numbers = #tpu.dot_dimension_numbers<[2], [0], [0, 1], [1], [0, 0, 0, 1, 1, 1], [], []>} : vector<2x15x16xbf16>, vector<16x32xbf16>, vector<2x15x32xf32> -> vector<2x15x32xf32>
    "tpu.trace_stop"() : () -> ()
    %75 = arith.addf %70, %74 : vector<2x15x32xf32>
    %76 = vector.extract_strided_slice %0 {offsets = [0, 6, 0], sizes = [2, 15, 16], strides = [1, 1, 1]} : vector<2x24x16xbf16> to vector<2x15x16xbf16>
    %c8 = arith.constant 8 : index
    %c0_55 = arith.constant 0 : index
    %c0_56 = arith.constant 0 : index
    %77 = vector.load %arg1[%c8, %c0_55, %c0_56] : memref<12x16x32xbf16, #tpu.memory_space<vmem>>, vector<1x16x32xbf16>
    %78 = vector.shape_cast %77 : vector<1x16x32xbf16> to vector<16x32xbf16>
    "tpu.trace_start"() <{level = 10 : i32, message = "btc,co->bto"}> : () -> ()
    %cst_57 = arith.constant dense<0.000000e+00> : vector<2x15x32xf32>
    %79 = tpu.matmul %76, %78, %cst_57 {dimension_numbers = #tpu.dot_dimension_numbers<[2], [0], [0, 1], [1], [0, 0, 0, 1, 1, 1], [], []>} : vector<2x15x16xbf16>, vector<16x32xbf16>, vector<2x15x32xf32> -> vector<2x15x32xf32>
    "tpu.trace_stop"() : () -> ()
    %80 = arith.addf %75, %79 : vector<2x15x32xf32>
    %81 = vector.extract_strided_slice %0 {offsets = [0, 7, 0], sizes = [2, 15, 16], strides = [1, 1, 1]} : vector<2x24x16xbf16> to vector<2x15x16xbf16>
    %c9 = arith.constant 9 : index
    %c0_58 = arith.constant 0 : index
    %c0_59 = arith.constant 0 : index
    %82 = vector.load %arg1[%c9, %c0_58, %c0_59] : memref<12x16x32xbf16, #tpu.memory_space<vmem>>, vector<1x16x32xbf16>
    %83 = vector.shape_cast %82 : vector<1x16x32xbf16> to vector<16x32xbf16>
    "tpu.trace_start"() <{level = 10 : i32, message = "btc,co->bto"}> : () -> ()
    %cst_60 = arith.constant dense<0.000000e+00> : vector<2x15x32xf32>
    %84 = tpu.matmul %81, %83, %cst_60 {dimension_numbers = #tpu.dot_dimension_numbers<[2], [0], [0, 1], [1], [0, 0, 0, 1, 1, 1], [], []>} : vector<2x15x16xbf16>, vector<16x32xbf16>, vector<2x15x32xf32> -> vector<2x15x32xf32>
    "tpu.trace_stop"() : () -> ()
    %85 = arith.addf %80, %84 : vector<2x15x32xf32>
    %86 = vector.extract_strided_slice %0 {offsets = [0, 8, 0], sizes = [2, 15, 16], strides = [1, 1, 1]} : vector<2x24x16xbf16> to vector<2x15x16xbf16>
    %c10 = arith.constant 10 : index
    %c0_61 = arith.constant 0 : index
    %c0_62 = arith.constant 0 : index
    %87 = vector.load %arg1[%c10, %c0_61, %c0_62] : memref<12x16x32xbf16, #tpu.memory_space<vmem>>, vector<1x16x32xbf16>
    %88 = vector.shape_cast %87 : vector<1x16x32xbf16> to vector<16x32xbf16>
    "tpu.trace_start"() <{level = 10 : i32, message = "btc,co->bto"}> : () -> ()
    %cst_63 = arith.constant dense<0.000000e+00> : vector<2x15x32xf32>
    %89 = tpu.matmul %86, %88, %cst_63 {dimension_numbers = #tpu.dot_dimension_numbers<[2], [0], [0, 1], [1], [0, 0, 0, 1, 1, 1], [], []>} : vector<2x15x16xbf16>, vector<16x32xbf16>, vector<2x15x32xf32> -> vector<2x15x32xf32>
    "tpu.trace_stop"() : () -> ()
    %90 = arith.addf %85, %89 : vector<2x15x32xf32>
    %91 = vector.extract_strided_slice %0 {offsets = [0, 9, 0], sizes = [2, 15, 16], strides = [1, 1, 1]} : vector<2x24x16xbf16> to vector<2x15x16xbf16>
    %c11 = arith.constant 11 : index
    %c0_64 = arith.constant 0 : index
    %c0_65 = arith.constant 0 : index
    %92 = vector.load %arg1[%c11, %c0_64, %c0_65] : memref<12x16x32xbf16, #tpu.memory_space<vmem>>, vector<1x16x32xbf16>
    %93 = vector.shape_cast %92 : vector<1x16x32xbf16> to vector<16x32xbf16>
    "tpu.trace_start"() <{level = 10 : i32, message = "btc,co->bto"}> : () -> ()
    %cst_66 = arith.constant dense<0.000000e+00> : vector<2x15x32xf32>
    %94 = tpu.matmul %91, %93, %cst_66 {dimension_numbers = #tpu.dot_dimension_numbers<[2], [0], [0, 1], [1], [0, 0, 0, 1, 1, 1], [], []>} : vector<2x15x16xbf16>, vector<16x32xbf16>, vector<2x15x32xf32> -> vector<2x15x32xf32>
    "tpu.trace_stop"() : () -> ()
    %95 = arith.addf %90, %94 : vector<2x15x32xf32>
    %96 = vector.shape_cast %2 : vector<1x32xf32> to vector<1x1x32xf32>
    %97 = vector.broadcast %96 : vector<1x1x32xf32> to vector<2x15x32xf32>
    %98 = arith.addf %95, %97 : vector<2x15x32xf32>
    %cst_67 = arith.constant 0.000000e+00 : f32
    %99 = vector.broadcast %cst_67 : f32 to vector<2x15x32xf32>
    %100 = arith.maximumf %98, %99 : vector<2x15x32xf32>
    %101 = arith.truncf %100 : vector<2x15x32xf32> to vector<2x15x32xbf16>
    %102 = vector.extract_strided_slice %101 {offsets = [0, 0, 0], sizes = [2, 6, 32], strides = [1, 1, 1]} : vector<2x15x32xbf16> to vector<2x6x32xbf16>
    %c2_68 = arith.constant 2 : index
    %c0_69 = arith.constant 0 : index
    %c0_70 = arith.constant 0 : index
    %103 = vector.load %arg2[%c2_68, %c0_69, %c0_70] : memref<12x32x16xbf16, #tpu.memory_space<vmem>>, vector<1x32x16xbf16>
    %104 = vector.shape_cast %103 : vector<1x32x16xbf16> to vector<32x16xbf16>
    "tpu.trace_start"() <{level = 10 : i32, message = "btc,co->bto"}> : () -> ()
    %cst_71 = arith.constant dense<0.000000e+00> : vector<2x6x16xf32>
    %105 = tpu.matmul %102, %104, %cst_71 {dimension_numbers = #tpu.dot_dimension_numbers<[2], [0], [0, 1], [1], [0, 0, 0, 1, 1, 1], [], []>} : vector<2x6x32xbf16>, vector<32x16xbf16>, vector<2x6x16xf32> -> vector<2x6x16xf32>
    "tpu.trace_stop"() : () -> ()
    %106 = vector.extract_strided_slice %101 {offsets = [0, 1, 0], sizes = [2, 6, 32], strides = [1, 1, 1]} : vector<2x15x32xbf16> to vector<2x6x32xbf16>
    %c3_72 = arith.constant 3 : index
    %c0_73 = arith.constant 0 : index
    %c0_74 = arith.constant 0 : index
    %107 = vector.load %arg2[%c3_72, %c0_73, %c0_74] : memref<12x32x16xbf16, #tpu.memory_space<vmem>>, vector<1x32x16xbf16>
    %108 = vector.shape_cast %107 : vector<1x32x16xbf16> to vector<32x16xbf16>
    "tpu.trace_start"() <{level = 10 : i32, message = "btc,co->bto"}> : () -> ()
    %cst_75 = arith.constant dense<0.000000e+00> : vector<2x6x16xf32>
    %109 = tpu.matmul %106, %108, %cst_75 {dimension_numbers = #tpu.dot_dimension_numbers<[2], [0], [0, 1], [1], [0, 0, 0, 1, 1, 1], [], []>} : vector<2x6x32xbf16>, vector<32x16xbf16>, vector<2x6x16xf32> -> vector<2x6x16xf32>
    "tpu.trace_stop"() : () -> ()
    %110 = arith.addf %105, %109 : vector<2x6x16xf32>
    %111 = vector.extract_strided_slice %101 {offsets = [0, 2, 0], sizes = [2, 6, 32], strides = [1, 1, 1]} : vector<2x15x32xbf16> to vector<2x6x32xbf16>
    %c4_76 = arith.constant 4 : index
    %c0_77 = arith.constant 0 : index
    %c0_78 = arith.constant 0 : index
    %112 = vector.load %arg2[%c4_76, %c0_77, %c0_78] : memref<12x32x16xbf16, #tpu.memory_space<vmem>>, vector<1x32x16xbf16>
    %113 = vector.shape_cast %112 : vector<1x32x16xbf16> to vector<32x16xbf16>
    "tpu.trace_start"() <{level = 10 : i32, message = "btc,co->bto"}> : () -> ()
    %cst_79 = arith.constant dense<0.000000e+00> : vector<2x6x16xf32>
    %114 = tpu.matmul %111, %113, %cst_79 {dimension_numbers = #tpu.dot_dimension_numbers<[2], [0], [0, 1], [1], [0, 0, 0, 1, 1, 1], [], []>} : vector<2x6x32xbf16>, vector<32x16xbf16>, vector<2x6x16xf32> -> vector<2x6x16xf32>
    "tpu.trace_stop"() : () -> ()
    %115 = arith.addf %110, %114 : vector<2x6x16xf32>
    %116 = vector.extract_strided_slice %101 {offsets = [0, 3, 0], sizes = [2, 6, 32], strides = [1, 1, 1]} : vector<2x15x32xbf16> to vector<2x6x32xbf16>
    %c5_80 = arith.constant 5 : index
    %c0_81 = arith.constant 0 : index
    %c0_82 = arith.constant 0 : index
    %117 = vector.load %arg2[%c5_80, %c0_81, %c0_82] : memref<12x32x16xbf16, #tpu.memory_space<vmem>>, vector<1x32x16xbf16>
    %118 = vector.shape_cast %117 : vector<1x32x16xbf16> to vector<32x16xbf16>
    "tpu.trace_start"() <{level = 10 : i32, message = "btc,co->bto"}> : () -> ()
    %cst_83 = arith.constant dense<0.000000e+00> : vector<2x6x16xf32>
    %119 = tpu.matmul %116, %118, %cst_83 {dimension_numbers = #tpu.dot_dimension_numbers<[2], [0], [0, 1], [1], [0, 0, 0, 1, 1, 1], [], []>} : vector<2x6x32xbf16>, vector<32x16xbf16>, vector<2x6x16xf32> -> vector<2x6x16xf32>
    "tpu.trace_stop"() : () -> ()
    %120 = arith.addf %115, %119 : vector<2x6x16xf32>
    %121 = vector.extract_strided_slice %101 {offsets = [0, 4, 0], sizes = [2, 6, 32], strides = [1, 1, 1]} : vector<2x15x32xbf16> to vector<2x6x32xbf16>
    %c6_84 = arith.constant 6 : index
    %c0_85 = arith.constant 0 : index
    %c0_86 = arith.constant 0 : index
    %122 = vector.load %arg2[%c6_84, %c0_85, %c0_86] : memref<12x32x16xbf16, #tpu.memory_space<vmem>>, vector<1x32x16xbf16>
    %123 = vector.shape_cast %122 : vector<1x32x16xbf16> to vector<32x16xbf16>
    "tpu.trace_start"() <{level = 10 : i32, message = "btc,co->bto"}> : () -> ()
    %cst_87 = arith.constant dense<0.000000e+00> : vector<2x6x16xf32>
    %124 = tpu.matmul %121, %123, %cst_87 {dimension_numbers = #tpu.dot_dimension_numbers<[2], [0], [0, 1], [1], [0, 0, 0, 1, 1, 1], [], []>} : vector<2x6x32xbf16>, vector<32x16xbf16>, vector<2x6x16xf32> -> vector<2x6x16xf32>
    "tpu.trace_stop"() : () -> ()
    %125 = arith.addf %120, %124 : vector<2x6x16xf32>
    %126 = vector.extract_strided_slice %101 {offsets = [0, 5, 0], sizes = [2, 6, 32], strides = [1, 1, 1]} : vector<2x15x32xbf16> to vector<2x6x32xbf16>
    %c7_88 = arith.constant 7 : index
    %c0_89 = arith.constant 0 : index
    %c0_90 = arith.constant 0 : index
    %127 = vector.load %arg2[%c7_88, %c0_89, %c0_90] : memref<12x32x16xbf16, #tpu.memory_space<vmem>>, vector<1x32x16xbf16>
    %128 = vector.shape_cast %127 : vector<1x32x16xbf16> to vector<32x16xbf16>
    "tpu.trace_start"() <{level = 10 : i32, message = "btc,co->bto"}> : () -> ()
    %cst_91 = arith.constant dense<0.000000e+00> : vector<2x6x16xf32>
    %129 = tpu.matmul %126, %128, %cst_91 {dimension_numbers = #tpu.dot_dimension_numbers<[2], [0], [0, 1], [1], [0, 0, 0, 1, 1, 1], [], []>} : vector<2x6x32xbf16>, vector<32x16xbf16>, vector<2x6x16xf32> -> vector<2x6x16xf32>
    "tpu.trace_stop"() : () -> ()
    %130 = arith.addf %125, %129 : vector<2x6x16xf32>
    %131 = vector.extract_strided_slice %101 {offsets = [0, 6, 0], sizes = [2, 6, 32], strides = [1, 1, 1]} : vector<2x15x32xbf16> to vector<2x6x32xbf16>
    %c8_92 = arith.constant 8 : index
    %c0_93 = arith.constant 0 : index
    %c0_94 = arith.constant 0 : index
    %132 = vector.load %arg2[%c8_92, %c0_93, %c0_94] : memref<12x32x16xbf16, #tpu.memory_space<vmem>>, vector<1x32x16xbf16>
    %133 = vector.shape_cast %132 : vector<1x32x16xbf16> to vector<32x16xbf16>
    "tpu.trace_start"() <{level = 10 : i32, message = "btc,co->bto"}> : () -> ()
    %cst_95 = arith.constant dense<0.000000e+00> : vector<2x6x16xf32>
    %134 = tpu.matmul %131, %133, %cst_95 {dimension_numbers = #tpu.dot_dimension_numbers<[2], [0], [0, 1], [1], [0, 0, 0, 1, 1, 1], [], []>} : vector<2x6x32xbf16>, vector<32x16xbf16>, vector<2x6x16xf32> -> vector<2x6x16xf32>
    "tpu.trace_stop"() : () -> ()
    %135 = arith.addf %130, %134 : vector<2x6x16xf32>
    %136 = vector.extract_strided_slice %101 {offsets = [0, 7, 0], sizes = [2, 6, 32], strides = [1, 1, 1]} : vector<2x15x32xbf16> to vector<2x6x32xbf16>
    %c9_96 = arith.constant 9 : index
    %c0_97 = arith.constant 0 : index
    %c0_98 = arith.constant 0 : index
    %137 = vector.load %arg2[%c9_96, %c0_97, %c0_98] : memref<12x32x16xbf16, #tpu.memory_space<vmem>>, vector<1x32x16xbf16>
    %138 = vector.shape_cast %137 : vector<1x32x16xbf16> to vector<32x16xbf16>
    "tpu.trace_start"() <{level = 10 : i32, message = "btc,co->bto"}> : () -> ()
    %cst_99 = arith.constant dense<0.000000e+00> : vector<2x6x16xf32>
    %139 = tpu.matmul %136, %138, %cst_99 {dimension_numbers = #tpu.dot_dimension_numbers<[2], [0], [0, 1], [1], [0, 0, 0, 1, 1, 1], [], []>} : vector<2x6x32xbf16>, vector<32x16xbf16>, vector<2x6x16xf32> -> vector<2x6x16xf32>
    "tpu.trace_stop"() : () -> ()
    %140 = arith.addf %135, %139 : vector<2x6x16xf32>
    %141 = vector.extract_strided_slice %101 {offsets = [0, 8, 0], sizes = [2, 6, 32], strides = [1, 1, 1]} : vector<2x15x32xbf16> to vector<2x6x32xbf16>
    %c10_100 = arith.constant 10 : index
    %c0_101 = arith.constant 0 : index
    %c0_102 = arith.constant 0 : index
    %142 = vector.load %arg2[%c10_100, %c0_101, %c0_102] : memref<12x32x16xbf16, #tpu.memory_space<vmem>>, vector<1x32x16xbf16>
    %143 = vector.shape_cast %142 : vector<1x32x16xbf16> to vector<32x16xbf16>
    "tpu.trace_start"() <{level = 10 : i32, message = "btc,co->bto"}> : () -> ()
    %cst_103 = arith.constant dense<0.000000e+00> : vector<2x6x16xf32>
    %144 = tpu.matmul %141, %143, %cst_103 {dimension_numbers = #tpu.dot_dimension_numbers<[2], [0], [0, 1], [1], [0, 0, 0, 1, 1, 1], [], []>} : vector<2x6x32xbf16>, vector<32x16xbf16>, vector<2x6x16xf32> -> vector<2x6x16xf32>
    "tpu.trace_stop"() : () -> ()
    %145 = arith.addf %140, %144 : vector<2x6x16xf32>
    %146 = vector.extract_strided_slice %101 {offsets = [0, 9, 0], sizes = [2, 6, 32], strides = [1, 1, 1]} : vector<2x15x32xbf16> to vector<2x6x32xbf16>
    %c11_104 = arith.constant 11 : index
    %c0_105 = arith.constant 0 : index
    %c0_106 = arith.constant 0 : index
    %147 = vector.load %arg2[%c11_104, %c0_105, %c0_106] : memref<12x32x16xbf16, #tpu.memory_space<vmem>>, vector<1x32x16xbf16>
    %148 = vector.shape_cast %147 : vector<1x32x16xbf16> to vector<32x16xbf16>
    "tpu.trace_start"() <{level = 10 : i32, message = "btc,co->bto"}> : () -> ()
    %cst_107 = arith.constant dense<0.000000e+00> : vector<2x6x16xf32>
    %149 = tpu.matmul %146, %148, %cst_107 {dimension_numbers = #tpu.dot_dimension_numbers<[2], [0], [0, 1], [1], [0, 0, 0, 1, 1, 1], [], []>} : vector<2x6x32xbf16>, vector<32x16xbf16>, vector<2x6x16xf32> -> vector<2x6x16xf32>
    "tpu.trace_stop"() : () -> ()
    %150 = arith.addf %145, %149 : vector<2x6x16xf32>
    %151 = vector.shape_cast %4 : vector<1x16xf32> to vector<1x1x16xf32>
    %152 = vector.broadcast %151 : vector<1x1x16xf32> to vector<2x6x16xf32>
    %153 = arith.addf %150, %152 : vector<2x6x16xf32>
    %cst_108 = arith.constant 0.000000e+00 : f32
    %154 = vector.broadcast %cst_108 : f32 to vector<2x6x16xf32>
    %155 = arith.maximumf %153, %154 : vector<2x6x16xf32>
    %cst_109 = arith.constant dense<0.000000e+00> : vector<2x16xf32>
    %156 = vector.multi_reduction <add>, %155, %cst_109 [1] : vector<2x6x16xf32> to vector<2x16xf32>
    %cst_110 = arith.constant 0.166666672 : f32
    %157 = vector.broadcast %cst_110 : f32 to vector<2x16xf32>
    %158 = arith.mulf %156, %157 : vector<2x16xf32>
    %159 = vector.broadcast %6 : vector<1x16xf32> to vector<2x16xf32>
    %160 = arith.mulf %158, %159 : vector<2x16xf32>
    %cst_111 = arith.constant dense<0.000000e+00> : vector<2xf32>
    %161 = vector.multi_reduction <add>, %160, %cst_111 [1] : vector<2x16xf32> to vector<2xf32>
    %162 = vector.shape_cast %161 : vector<2xf32> to vector<2x1xf32>
    %163 = vector.broadcast %8 : vector<1x1xf32> to vector<2x1xf32>
    %164 = arith.addf %162, %163 : vector<2x1xf32>
    %165 = tpu.concatenate %46, %164 in 1 : vector<2x1xf32>, vector<2x1xf32> -> vector<2x2xf32>
    %c0_112 = arith.constant 0 : index
    %c0_113 = arith.constant 0 : index
    %166 = vector.load %arg4[%c0_112, %c0_113] : memref<2x2xf32, #tpu.memory_space<vmem>>, vector<2x2xf32>
    tpu.vector_store %arg4[%c0_112, %c0_113], %165 {strides = array<i32>} : memref<2x2xf32, #tpu.memory_space<vmem>>, vector<2x2xf32>,
    return
  }
}

</mosaic_0001>

<bundles_post_ra>
// kernel: tpu_custom_call.1
= control target key start
LH: loop header
LB: loop body
LE: loop exit
PB: predicated region body
PF: predicated region fallthrough
CT: control target
= control target key end

     0   :  { %vm50_vm0 = vcmask 1040384   ;;  %vm55_vm1 = vcmask 1041409   ;;  %vm59_vm2 = vcmask 1042434   ;;  %vm63_vm3 = vcmask 1043459   ;;  %s6468_s0 = inlined_call_operand.vmem [shape: bf16[2,24,16], index: 0, kind: input, shape index: {}]   ;;  %s6469_s1 = inlined_call_operand.vmem [shape: bf16[12,16,32], index: 1, kind: input, shape index: {}]   ;;  %s6470_s2 = inlined_call_operand.vmem [shape: bf16[12,32,16], index: 2, kind: input, shape index: {}]   ;;  %s6471_s3 = inlined_call_operand.vmem [shape: f32[8,32], index: 3, kind: input, shape index: {}]   ;;  %s6472_s4 = inlined_call_operand.hbm [shape: f32[2,2], index: 4, kind: output, shape index: {}]  }
   0x1   :  { %v4913_v0 = vld [vmem:[%s6469_s1 + $0x8] sm:$0xff]  ;;  %v5017_v1 = vld [vmem:[%s6468_s0] sm:$0xf]  ;;  %v5022_v2 = vld [vmem:[%s6468_s0 + $0x4] sm:$0xf] }
   0x2   :  { %6514 = vst [vmem:[#allocation5_spill] sm:$0xff] %v5017_v1  ;;  %v5027_v3 = vld [vmem:[%s6468_s0 + $0x8] sm:$0xf]  ;;  %v44_v4 = vrot.slane %v5017_v1, 3  ;;  %v45_v5 = vrot.slane %v5022_v2, 3  ;;  %277 = vmatpush.bf16.msra.mxu0 %v4913_v0  ;;  %v4912_v7 = vld [vmem:[%s6469_s1] sm:$0xff] }
   0x3   :  { %6515 = vst [vmem:[#allocation6_spill] sm:$0xff] %v5022_v2  ;;  %v46_v6 = vrot.slane %v5027_v3, 3  ;;  %394 = vmatpush.bf16.msra.mxu1 %v4912_v7 }
   0x4   :  { %6516 = vst [vmem:[#allocation7_spill] sm:$0xff] %v5027_v3  ;;  %v5037_v8 = vsel %vm50_vm0, %v5017_v1, %v44_v4  ;;  %v56_v9 = vsel %vm55_vm1, %v5017_v1, %v44_v4  ;;  %v60_v10 = vsel %vm59_vm2, %v5017_v1, %v44_v4  ;;  %v64_v11 = vsel %vm63_vm3, %v5017_v1, %v44_v4 }
   0x5   :  { %v5045_v12 = vrot.slane %v56_v9, 1  ;;  %v5047_v13 = vrot.slane %v60_v10, 2  ;;  %v5049_v14 = vrot.slane %v64_v11, 3  ;;  %v5053_v15 = vsel %vm50_vm0, %v5022_v2, %v45_v5 }
   0x6   :  { %v71_v16 = vsel %vm55_vm1, %v5022_v2, %v45_v5  ;;  %v74_v17 = vsel %vm59_vm2, %v5022_v2, %v45_v5  ;;  %v77_v18 = vsel %vm63_vm3, %v5022_v2, %v45_v5  ;;  %v132_v22 = vunpack.i.h.s16 %v5037_v8 }
   0x7   :  { %v5061_v19 = vrot.slane %v71_v16, 1  ;;  %v5063_v20 = vrot.slane %v74_v17, 2  ;;  %v5065_v21 = vrot.slane %v77_v18, 3  ;;  %v134_v23 = vunpack.i.h.s16 %v5045_v12 }
   0x8   :  { %v136_v24 = vunpack.i.h.s16 %v5047_v13  ;;  %v138_v25 = vunpack.i.h.s16 %v5049_v14  ;;  %v140_v26 = vunpack.i.h.s16 %v5053_v15 }
   0x9   :  { %6517 = vst [vmem:[#allocation8_spill] sm:$0xff] %v5063_v20 }
   0xa   :  { %9 = vsyncpa [#allocation3], 0  ;;  %v142_v27 = vunpack.i.h.s16 %v5061_v19  ;;  %v144_v28 = vunpack.i.h.s16 %v5063_v20  ;;  %v5075_v29 = vpack.i.b16 %v5045_v12, %v132_v22  ;;  %v6473_v30 = vunpack.i.h.s16 %v5065_v21  ;;  %v5098_v36 = vld [vmem:[%s6468_s0 + $0xc] sm:$0xf]  ;;  %v5148_v54 = vld [vmem:[%s6468_s0 + $0x10] sm:$0xf] }
   0xb   :  { %v5079_v31 = vpack.i.b16 %v5047_v13, %v134_v23  ;;  %v5082_v32 = vpack.i.b16 %v5049_v14, %v136_v24  ;;  %v5085_v33 = vpack.i.b16 %v5053_v15, %v138_v25  ;;  %v5089_v34 = vsel %vm50_vm0, %v5027_v3, %v46_v6  ;;  %6519 = vst [vmem:[#allocation10_spill] sm:$0xff] %v5098_v36  ;;  %s4984_s29 = smov 1   ;;  %s4985_s5 = smov [#allocation2]  }
   0xc   :  { %6518 = vst [vmem:[#allocation9_spill] sm:$0xff] %v5089_v34  ;;  %v5092_v35 = vpack.i.b16 %v5061_v19, %v140_v26  ;;  %v5101_v37 = vpack.i.b16 %v5063_v20, %v142_v27  ;;  %v84_v38 = vsel %vm55_vm1, %v5027_v3, %v46_v6  ;;  %v5107_v39 = vpack.i.b16 %v5065_v21, %v144_v28  ;;  %s4527_s6 = sshll.u32 %s4985_s5, 4  ;;  %s4528_s6 = int_to_ptr.vmem [resolvable:$true] %s4527_s6 }
   0xd   :  { %202 = vst [vmem:[#allocation1] ss:$9 sm:$0xff] %v5075_v29  ;;  %v87_v40 = vsel %vm59_vm2, %v5027_v3, %v46_v6  ;;  %v5115_v41 = vpack.i.b16 %v5089_v34, %v6473_v30  ;;  %v47_v42 = vrot.slane %v5098_v36, 3  ;;  %v90_v43 = vsel %vm63_vm3, %v5027_v3, %v46_v6  ;;  %v5184_v6 = vld [vmem:[%s6468_s0 + $0x14] sm:$0xf] }
   0xe   :  { %205 = vst [vmem:[#allocation1 + $0x1] ss:$9 sm:$0xff] %v5079_v31  ;;  %v5122_v44 = vrot.slane %v84_v38, 1  ;;  %v5125_v45 = vrot.slane %v87_v40, 2  ;;  %v5128_v46 = vrot.slane %v90_v43, 3  ;;  %v148_v48 = vunpack.i.h.s16 %v5089_v34 }
   0xf   :  { %208 = vst [vmem:[#allocation1 + $0x2] ss:$9 sm:$0xff] %v5082_v32  ;;  %v5133_v47 = vsel %vm50_vm0, %v5098_v36, %v47_v42  ;;  %vm263_vm4 = vcmask 130048   ;;  %v97_v55 = vsel %vm55_vm1, %v5098_v36, %v47_v42  ;;  %v100_v57 = vsel %vm59_vm2, %v5098_v36, %v47_v42 }
  0x10   :  { %6520 = vst [vmem:[#allocation11_spill] sm:$0xff] %v5115_v41  ;;  %v150_v49 = vunpack.i.h.s16 %v5122_v44  ;;  %v152_v50 = vunpack.i.h.s16 %v5125_v45  ;;  %v154_v51 = vunpack.i.h.s16 %v5128_v46  ;;  %v5140_v52 = vunpack.i.h.s16 %v5133_v47 }
  0x11   :  { %211 = vst [vmem:[#allocation1 + $0x3] ss:$9 sm:$0xff] %v5085_v33  ;;  %v5143_v53 = vpack.i.b16 %v5122_v44, %v148_v48  ;;  %v103_v60 = vsel %vm63_vm3, %v5098_v36, %v47_v42  ;;  %v48_v62 = vrot.slane %v5148_v54, 3  ;;  %v5167_v63 = vrot.slane %v97_v55, 1 }
  0x12   :  { %214 = vst [vmem:[#allocation1 + $0x4] ss:$9 sm:$0xff] %v5092_v35  ;;  %v5153_v56 = vpack.i.b16 %v5125_v45, %v150_v49  ;;  %v5158_v58 = vpack.i.b16 %v5128_v46, %v152_v50  ;;  %v189_v61 = vpack.i.b16 %v5140_v52, %v154_v51  ;;  %v5170_v0 = vrot.slane %v100_v57, 2 }
  0x13   :  { %6521 = vst [vmem:[#allocation12_spill] sm:$0xff] %v5122_v44  ;;  %v5173_v4 = vrot.slane %v103_v60, 3  ;;  %v5178_v5 = vsel %vm50_vm0, %v5148_v54, %v48_v62  ;;  %v49_v7 = vrot.slane %v5184_v6, 3  ;;  %v110_v9 = vsel %vm55_vm1, %v5148_v54, %v48_v62 }
  0x14   :  { %217 = vst [vmem:[#allocation1 + $0x5] ss:$9 sm:$0xff] %v5101_v37  ;;  %v113_v10 = vsel %vm59_vm2, %v5148_v54, %v48_v62  ;;  %v116_v11 = vsel %vm63_vm3, %v5148_v54, %v48_v62  ;;  %v5196_v16 = vrot.slane %v110_v9, 1  ;;  %v157_v42 = vunpack.i.h.s16 %v5167_v63 }
  0x15   :  { %6522 = vst [vmem:[#allocation13_spill] sm:$0xff] %v5125_v45  ;;  %v5198_v17 = vrot.slane %v113_v10, 2  ;;  %v123_v18 = vsel %vm55_vm1, %v5184_v6, %v49_v7  ;;  %v5202_v22 = vrot.slane %v116_v11, 3  ;;  %v126_v23 = vsel %vm59_vm2, %v5184_v6, %v49_v7 }
  0x16   :  { %220 = vst [vmem:[#allocation1 + $0x6] ss:$9 sm:$0xff] %v5107_v39  ;;  %v129_v24 = vsel %vm63_vm3, %v5184_v6, %v49_v7  ;;  %v5210_v26 = vsel %vm50_vm0, %v5184_v6, %v49_v7  ;;  %v5212_v27 = vrot.slane %v123_v18, 1  ;;  %v5215_v28 = vrot.slane %v126_v23, 2 }
  0x17   :  { %6523 = vst [vmem:[#allocation14_spill] sm:$0xff] %v5128_v46  ;;  %v5219_v38 = vrot.slane %v129_v24, 3  ;;  %v159_v43 = vunpack.i.h.s16 %v5170_v0  ;;  %v163_v48 = vunpack.i.h.s16 %v5178_v5  ;;  %v161_v50 = vunpack.i.h.s16 %v5173_v4 }
  0x18   :  { %223 = vst [vmem:[#allocation1 + $0x7] ss:$9 sm:$0xff] %v5115_v41  ;;  %v4558_v55 = vpack.i.b16 %v5133_v47, %v5128_v46  ;;  %v5245_v57 = vpack.i.b16 %v5167_v63, %v5140_v52  ;;  %v5253_v60 = vpack.i.b16 %v5170_v0, %v157_v42  ;;  %v167_v7 = vunpack.i.h.s16 %v5198_v17 }
  0x19   :  { %6524 = vst [vmem:[#allocation15_spill] sm:$0xff] %v5143_v53  ;;  %v5260_v62 = vpack.i.b16 %v5178_v5, %v161_v50  ;;  %v169_v9 = vunpack.i.h.s16 %v5202_v22  ;;  %v171_v10 = vunpack.i.h.s16 %v5210_v26  ;;  %v5271_v11 = vpack.i.b16 %v5196_v16, %v163_v48 }
  0x1a   :  { %6525 = vst [vmem:[#allocation16_spill] sm:$0xff] %v5148_v54  ;;  %v173_v18 = vunpack.i.h.s16 %v5212_v27  ;;  %v175_v24 = vunpack.i.h.s16 %v5215_v28  ;;  %vm815_vm5 = vsmask.f32 256  ;;  %vm816_vm6 = vsmask.f32 1284 }
  0x1b   :  { %6526 = vst [vmem:[#allocation17_spill] sm:$0xff] %v5153_v56  ;;  %v5282_v42 = vpack.i.b16 %v5210_v26, %v169_v9  ;;  %vm817_vm7 = vmor %vm815_vm5, %vm816_vm6  ;;  %vm818_vm8 = vsmask.f32 2312  ;;  %vm820_vm10 = vsmask.f32 3340 }
  0x1c   :  { %6527 = vst [vmem:[#allocation18_spill] sm:$0xff] %v5158_v58  ;;  %vm819_vm9 = vmor %vm817_vm7, %vm818_vm8  ;;  %vm822_vm11 = vsmask.f32 4368  ;;  %vm824_vm14 = vsmask.f32 5396 }
  0x1d   :  { %6528 = vst [vmem:[#allocation19_spill] sm:$0xff] %v5184_v6  ;;  %vm821_vm12 = vmor %vm819_vm9, %vm820_vm10  ;;  %vm826_vm5 = vsmask.f32 6424  ;;  %vm828_vm7 = vsmask.f32 7452  ;;  %vm1068_vm9 = vcmask 261120  }
  0x1e   :  { %6529 = vst [vmem:[#allocation20_spill] sm:$0xff] %v5210_v26  ;;  %vm823_vm13 = vmor %vm821_vm12, %vm822_vm11 }
  0x1f   :  { %v224_v59 = vld [vmem:[#allocation1] sm:$0xff]  ;;  %6530 = vst [vmem:[#allocation21_spill] sm:$0xff] %v5212_v27  ;;  %vm825_vm15 = vmor %vm823_vm13, %vm824_vm14 }
  0x20   :  { %4555 = vmatmul.msk.bf16.vlgmr.msra.gmra.mxu0 %vm263_vm4, %v224_v59  ;;  %226 = vst [vmem:[#allocation1] ss:$9 sm:$0xff] %v5143_v53  ;;  %v5249_v59 = vpack.i.b16 %v163_v48, %v154_v51  ;;  %v165_v51 = vunpack.i.h.s16 %v5196_v16  ;;  %v5290_v48 = vpack.i.b16 %v5215_v28, %v173_v18  ;;  %vm827_vm6 = vmor %vm825_vm15, %vm826_vm5 }
  0x21   :  { %228 = vst [vmem:[#allocation1 + $0x1] ss:$9 sm:$0xff] %v5153_v56  ;;  %vm5411_vm8 = vmor %vm827_vm6, %vm828_vm7 }
  0x22   :  { %230 = vst [vmem:[#allocation1 + $0x2] ss:$9 sm:$0xff] %v5158_v58  ;;  %v5275_v23 = vpack.i.b16 %v5198_v17, %v165_v51 }
  0x23   :  { %232 = vst [vmem:[#allocation1 + $0x3] ss:$9 sm:$0xff] %v189_v61  ;;  %v5257_v61 = vpack.i.b16 %v5173_v4, %v159_v43  ;;  %v5285_v43 = vpack.i.b16 %v5212_v27, %v171_v10 }
  0x24   :  { %234 = vst [vmem:[#allocation1 + $0x4] ss:$9 sm:$0xff] %v5167_v63 }
  0x25   :  { %236 = vst [vmem:[#allocation1 + $0x5] ss:$9 sm:$0xff] %v5170_v0 }
  0x26   :  { %238 = vst [vmem:[#allocation1 + $0x6] ss:$9 sm:$0xff] %v5173_v4 }
  0x27   :  { %240 = vst [vmem:[#allocation1 + $0x7] ss:$9 sm:$0xff] %v5178_v5 }
  0x28   :  { %6531 = vst [vmem:[#allocation22_spill] sm:$0xff] %v5215_v28 }
  0x29   :  { %6532 = vst [vmem:[#allocation23_spill] sm:$0xff] %v5219_v38 }
  0x2a   :  { %6533 = vst [vmem:[#allocation24_spill] sm:$0xff] %v5245_v57 }
  0x2b   :  { %6534 = vst [vmem:[#allocation25_spill] sm:$0xff] %v5249_v59 }
  0x2c   :  { %6535 = vst [vmem:[#allocation26_spill] sm:$0xff] %v5253_v60 }
  0x2d   :  { %6536 = vst [vmem:[#allocation27_spill] sm:$0xff] %v5257_v61 }
  0x2e   :  { %v241_v25 = vld [vmem:[#allocation1] sm:$0xff]  ;;  %6537 = vst [vmem:[#allocation28_spill] sm:$0xff] %v5260_v62 }
  0x2f   :  { %243 = vst [vmem:[#allocation1] ss:$9 sm:$0xff] %v5196_v16 }
  0x30   :  { %245 = vst [vmem:[#allocation1 + $0x1] ss:$9 sm:$0xff] %v5198_v17  ;;  %4556 = vmatmul.msk.bf16.gmra.mxu0 %vm263_vm4, %v241_v25  ;;  %v5279_v25 = vpack.i.b16 %v5202_v22, %v167_v7 }
  0x31   :  { %247 = vst [vmem:[#allocation1 + $0x2] ss:$9 sm:$0xff] %v5202_v22 }
  0x32   :  { %249 = vst [vmem:[#allocation1 + $0x3] ss:$9 sm:$0xff] %v5210_v26 }
  0x33   :  { %251 = vst [vmem:[#allocation1 + $0x4] ss:$9 sm:$0xff] %v5212_v27 }
  0x34   :  { %253 = vst [vmem:[#allocation1 + $0x5] ss:$9 sm:$0xff] %v5215_v28 }
  0x35   :  { %255 = vst [vmem:[#allocation1 + $0x6] ss:$9 sm:$0xff] %v5219_v38 }
  0x36   :  { %6538 = vst [vmem:[#allocation29_spill] sm:$0xff] %v5271_v11 }
  0x37   :  { %6539 = vst [vmem:[#allocation30_spill] sm:$0xff] %v5275_v23 }
  0x38   :  { %6540 = vst [vmem:[#allocation31_spill] sm:$0xff] %v5279_v25 }
  0x39   :  { %6541 = vst [vmem:[#allocation32_spill] sm:$0xff] %v5282_v42 }
  0x3a   :  { %6542 = vst [vmem:[#allocation33_spill] sm:$0xff] %v5285_v43 }
  0x3b   :  { %6543 = vst [vmem:[#allocation34_spill] sm:$0xff] %v5290_v48 }
  0x3c   :  { %v256_v40 = vld [vmem:[#allocation1] sm:$0xff] }
  0x3d   :  { %320 = vst [vmem:[#allocation1] ss:$9 sm:$0xff] %v5037_v8 }
  0x3e   :  { %323 = vst [vmem:[#allocation1 + $0x1] ss:$9 sm:$0xff] %v5045_v12 }
  0x3f   :  { %326 = vst [vmem:[#allocation1 + $0x2] ss:$9 sm:$0xff] %v5047_v13 }
  0x40   :  { %329 = vst [vmem:[#allocation1 + $0x3] ss:$9 sm:$0xff] %v5049_v14  ;;  %4557 = vmatmul.msk.bf16.gmra.mxu0 %vm263_vm4, %v256_v40 }
  0x41   :  { %332 = vst [vmem:[#allocation1 + $0x4] ss:$9 sm:$0xff] %v5053_v15 }
  0x42   :  { %335 = vst [vmem:[#allocation1 + $0x5] ss:$9 sm:$0xff] %v5061_v19 }
  0x43   :  { %338 = vst [vmem:[#allocation1 + $0x6] ss:$9 sm:$0xff] %v5063_v20 }
  0x44   :  { %341 = vst [vmem:[#allocation1 + $0x7] ss:$9 sm:$0xff] %v5065_v21 }
  0x4b   :  { %v342_v49 = vld [vmem:[#allocation1] sm:$0xff] }
  0x4c   :  { %4574 = vmatmul.msk.bf16.vlgmr.msra.gmra.mxu1 %vm263_vm4, %v342_v49  ;;  %344 = vst [vmem:[#allocation1] ss:$9 sm:$0xff] %v5089_v34  ;;  %v5294_v49 = vpack.i.b16 %v5219_v38, %v175_v24 }
  0x4d   :  { %346 = vst [vmem:[#allocation1 + $0x1] ss:$9 sm:$0xff] %v5122_v44 }
  0x4e   :  { %348 = vst [vmem:[#allocation1 + $0x2] ss:$9 sm:$0xff] %v5125_v45 }
  0x4f   :  { %350 = vst [vmem:[#allocation1 + $0x3] ss:$9 sm:$0xff] %v4558_v55  ;;  %v5305_v55 = vld [vmem:[%s6471_s3] ss:$0 sm:$0xff] }
  0x50   :  { %352 = vst [vmem:[#allocation1 + $0x4] ss:$9 sm:$0xff] %v5245_v57  ;;  %v5308_v9 = vrot.slane %v5305_v55, 1  ;;  %v5311_v18 = vrot.slane %v5305_v55, 2  ;;  %v5314_v24 = vrot.slane %v5305_v55, 3  ;;  %v5323_v30 = vrot.slane %v5305_v55, 6 }
  0x51   :  { %354 = vst [vmem:[#allocation1 + $0x5] ss:$9 sm:$0xff] %v5253_v60  ;;  %v5326_v38 = vrot.slane %v5305_v55, 7 }
  0x52   :  { %356 = vst [vmem:[#allocation1 + $0x6] ss:$9 sm:$0xff] %v5257_v61 }
  0x53   :  { %358 = vst [vmem:[#allocation1 + $0x7] ss:$9 sm:$0xff] %v5260_v62 }
  0x54   :  { %6544 = vst [vmem:[#allocation35_spill] sm:$0xff] %v5294_v49 }
  0x5a   :  { %v359_v40 = vld [vmem:[#allocation1] sm:$0xff] }
  0x5b   :  { %361 = vst [vmem:[#allocation1] ss:$9 sm:$0xff] %v5271_v11 }
  0x5c   :  { %4575 = vmatmul.msk.bf16.gmra.mxu1 %vm263_vm4, %v359_v40  ;;  %363 = vst [vmem:[#allocation1 + $0x1] ss:$9 sm:$0xff] %v5275_v23  ;;  %v5317_v40 = vrot.slane %v5305_v55, 4 }
  0x5d   :  { %365 = vst [vmem:[#allocation1 + $0x2] ss:$9 sm:$0xff] %v5279_v25 }
  0x5e   :  { %367 = vst [vmem:[#allocation1 + $0x3] ss:$9 sm:$0xff] %v5282_v42 }
  0x5f   :  { %369 = vst [vmem:[#allocation1 + $0x4] ss:$9 sm:$0xff] %v5285_v43 }
  0x60   :  { %371 = vst [vmem:[#allocation1 + $0x5] ss:$9 sm:$0xff] %v5290_v48 }
  0x61   :  { %373 = vst [vmem:[#allocation1 + $0x6] ss:$9 sm:$0xff] %v5294_v49 }
  0x68   :  { %v374_v50 = vld [vmem:[#allocation1] sm:$0xff] }
  0x6c   :  { %4576 = vmatmul.msk.bf16.gmra.mxu1 %vm263_vm4, %v374_v50  ;;  %v5320_v50 = vrot.slane %v5305_v55, 5 }
  0x9d   :  { %v279_v51 = vpop.f32.mrf.mxu0 }
  0xa5   :  { %v281_v6 = vpop.f32.mrf.mxu0 }
  0xc9   :  { %v396_v7 = vpop.f32.mrf.mxu1 }
  0xca   :  { %v397_v10 = vadd.f32 %v396_v7, %v279_v51 }
  0xcc   :  { %v417_v28 = vrot.slane %v397_v10, 1  ;;  %v418_v51 = vrot.slane %v397_v10, 2  ;;  %v419_v7 = vrot.slane %v397_v10, 3  ;;  %v420_v27 = vrot.slane %v397_v10, 4 }
  0xcd   :  { %v421_v26 = vrot.slane %v397_v10, 5  ;;  %v422_v59 = vrot.slane %v397_v10, 6  ;;  %v423_v58 = vrot.slane %v397_v10, 7  ;;  %v513_v56 = vadd.f32 %v5305_v55, %v397_v10 }
  0xce   :  { %v514_v53 = vadd.f32 %v5308_v9, %v417_v28  ;;  %v515_v41 = vadd.f32 %v5311_v18, %v418_v51  ;;  %v516_v49 = vadd.f32 %v5314_v24, %v419_v7  ;;  %v517_v48 = vadd.f32 %v5317_v40, %v420_v27 }
  0xcf   :  { %v518_v43 = vadd.f32 %v5320_v50, %v421_v26  ;;  %v519_v42 = vadd.f32 %v5323_v30, %v422_v59  ;;  %v559_v45 = vmax.f32 %v513_v56, 0.0  ;;  %v520_v44 = vadd.f32 %v5326_v38, %v423_v58 }
  0xd0   :  { %v560_v34 = vmax.f32 %v514_v53, 0.0  ;;  %v561_v46 = vmax.f32 %v515_v41, 0.0  ;;  %v562_v54 = vmax.f32 %v516_v49, 0.0  ;;  %v563_v10 = vmax.f32 %v517_v48, 0.0 }
  0xd1   :  { %651 = vst [vmem:[#allocation1] ss:$9 sm:$0xff] %v559_v45  ;;  %v398_v28 = vpop.f32.mrf.mxu1  ;;  %v564_v3 = vmax.f32 %v518_v43, 0.0  ;;  %v565_v7 = vmax.f32 %v519_v42, 0.0  ;;  %v566_v27 = vmax.f32 %v520_v44, 0.0 }
  0xd2   :  { %653 = vst [vmem:[#allocation1 + $0x1] ss:$9 sm:$0xff] %v560_v34  ;;  %v399_v51 = vadd.f32 %v398_v28, %v281_v6 }
  0xd3   :  { %655 = vst [vmem:[#allocation1 + $0x2] ss:$9 sm:$0xff] %v561_v46 }
  0xd4   :  { %657 = vst [vmem:[#allocation1 + $0x3] ss:$9 sm:$0xff] %v562_v54  ;;  %v424_v26 = vrot.slane %v399_v51, 1  ;;  %v425_v56 = vrot.slane %v399_v51, 2  ;;  %v426_v58 = vrot.slane %v399_v51, 3  ;;  %v427_v41 = vrot.slane %v399_v51, 4 }
  0xd5   :  { %659 = vst [vmem:[#allocation1 + $0x4] ss:$9 sm:$0xff] %v563_v10  ;;  %v428_v53 = vrot.slane %v399_v51, 5  ;;  %v429_v45 = vrot.slane %v399_v51, 6  ;;  %v521_v43 = vadd.f32 %v5305_v55, %v399_v51  ;;  %v430_v6 = vrot.slane %v399_v51, 7 }
  0xd6   :  { %661 = vst [vmem:[#allocation1 + $0x5] ss:$9 sm:$0xff] %v564_v3  ;;  %v522_v59 = vadd.f32 %v5308_v9, %v424_v26  ;;  %v523_v34 = vadd.f32 %v5311_v18, %v425_v56  ;;  %v524_v44 = vadd.f32 %v5314_v24, %v426_v58  ;;  %v525_v46 = vadd.f32 %v5317_v40, %v427_v41 }
  0xd7   :  { %663 = vst [vmem:[#allocation1 + $0x6] ss:$9 sm:$0xff] %v565_v7  ;;  %v526_v3 = vadd.f32 %v5320_v50, %v428_v53  ;;  %v527_v48 = vadd.f32 %v5323_v30, %v429_v45  ;;  %v567_v49 = vmax.f32 %v521_v43, 0.0  ;;  %v284_v7 = vpop.f32.mrf.mxu0 }
  0xd8   :  { %665 = vst [vmem:[#allocation1 + $0x7] ss:$9 sm:$0xff] %v566_v27  ;;  %v568_v54 = vmax.f32 %v522_v59, 0.0  ;;  %v569_v10 = vmax.f32 %v523_v34, 0.0  ;;  %v528_v27 = vadd.f32 %v5326_v38, %v430_v6  ;;  %v570_v26 = vmax.f32 %v524_v44, 0.0 }
  0xd9   :  { %v401_v42 = vpop.f32.mrf.mxu1  ;;  %v571_v56 = vmax.f32 %v525_v46, 0.0  ;;  %v572_v58 = vmax.f32 %v526_v3, 0.0  ;;  %v573_v41 = vmax.f32 %v527_v48, 0.0 }
  0xda   :  { %v402_v51 = vadd.f32 %v401_v42, %v284_v7  ;;  %v574_v53 = vmax.f32 %v528_v27, 0.0 }
  0xdc   :  { %v431_v59 = vrot.slane %v402_v51, 1  ;;  %v432_v45 = vrot.slane %v402_v51, 2  ;;  %v433_v43 = vrot.slane %v402_v51, 3  ;;  %v434_v34 = vrot.slane %v402_v51, 4 }
  0xdd   :  { %v435_v36 = vrot.slane %v402_v51, 5  ;;  %v436_v44 = vrot.slane %v402_v51, 6  ;;  %v529_v46 = vadd.f32 %v5305_v55, %v402_v51 }
  0xde   :  { %v530_v6 = vadd.f32 %v5308_v9, %v431_v59  ;;  %v531_v3 = vadd.f32 %v5311_v18, %v432_v45  ;;  %v533_v42 = vadd.f32 %v5317_v40, %v434_v34  ;;  %v437_v34 = vrot.slane %v402_v51, 7 }
  0xdf   :  { %v5343_v28 = vld [vmem:[#allocation1] sm:$0xff]  ;;  %v534_v48 = vadd.f32 %v5320_v50, %v435_v36  ;;  %v535_v7 = vadd.f32 %v5323_v30, %v436_v44  ;;  %v575_v27 = vmax.f32 %v529_v46, 0.0 }
  0xe0   :  { %667 = vst [vmem:[#allocation1] ss:$9 sm:$0xff] %v567_v49  ;;  %v576_v49 = vmax.f32 %v530_v6, 0.0 }
  0xe1   :  { %668 = vst [vmem:[#allocation1 + $0x1] ss:$9 sm:$0xff] %v568_v54  ;;  %v532_v54 = vadd.f32 %v5314_v24, %v433_v43  ;;  %v580_v45 = vmax.f32 %v534_v48, 0.0  ;;  %v581_v43 = vmax.f32 %v535_v7, 0.0 }
  0xe2   :  { %669 = vst [vmem:[#allocation1 + $0x2] ss:$9 sm:$0xff] %v569_v10  ;;  %v403_v10 = vpop.f32.mrf.mxu1 }
  0xe3   :  { %670 = vst [vmem:[#allocation1 + $0x3] ss:$9 sm:$0xff] %v570_v26  ;;  %v577_v26 = vmax.f32 %v531_v3, 0.0  ;;  %v536_v3 = vadd.f32 %v5305_v55, %v437_v34 }
  0xe4   :  { %671 = vst [vmem:[#allocation1 + $0x4] ss:$9 sm:$0xff] %v571_v56 }
  0xe5   :  { %672 = vst [vmem:[#allocation1 + $0x5] ss:$9 sm:$0xff] %v572_v58  ;;  %v286_v58 = vpop.f32.mrf.mxu0  ;;  %v582_v7 = vmax.f32 %v536_v3, 0.0 }
  0xe6   :  { %673 = vst [vmem:[#allocation1 + $0x6] ss:$9 sm:$0xff] %v573_v41  ;;  %v578_v41 = vmax.f32 %v532_v54, 0.0  ;;  %v404_v59 = vadd.f32 %v403_v10, %v286_v58 }
  0xe7   :  { %674 = vst [vmem:[#allocation1 + $0x7] ss:$9 sm:$0xff] %v574_v53  ;;  %v579_v53 = vmax.f32 %v533_v42, 0.0 }
  0xe8   :  { %v438_v36 = vrot.slane %v404_v59, 1  ;;  %v439_v6 = vrot.slane %v404_v59, 2  ;;  %v440_v44 = vrot.slane %v404_v59, 3  ;;  %v441_v46 = vrot.slane %v404_v59, 4 }
  0xe9   :  { %v442_v1 = vrot.slane %v404_v59, 5  ;;  %v443_v42 = vrot.slane %v404_v59, 6  ;;  %v537_v48 = vadd.f32 %v5308_v9, %v404_v59 }
  0xea   :  { %v538_v54 = vadd.f32 %v5311_v18, %v438_v36  ;;  %v540_v10 = vadd.f32 %v5317_v40, %v440_v44  ;;  %v541_v51 = vadd.f32 %v5320_v50, %v441_v46  ;;  %v406_v58 = vpop.f32.mrf.mxu1 }
  0xec   :  { %v586_v36 = vmax.f32 %v540_v10, 0.0  ;;  %v587_v2 = vmax.f32 %v541_v51, 0.0 }
  0xed   :  { %v289_v34 = vpop.f32.mrf.mxu0 }
  0xee   :  { %v5353_v56 = vld [vmem:[#allocation1] sm:$0xff] }
  0xef   :  { %676 = vst [vmem:[#allocation1] ss:$9 sm:$0xff] %v575_v27  ;;  %v542_v27 = vadd.f32 %v5323_v30, %v442_v1  ;;  %v444_v1 = vrot.slane %v404_v59, 7 }
  0xf0   :  { %677 = vst [vmem:[#allocation1 + $0x1] ss:$9 sm:$0xff] %v576_v49  ;;  %v539_v49 = vadd.f32 %v5314_v24, %v439_v6  ;;  %v407_v6 = vadd.f32 %v406_v58, %v289_v34 }
  0xf1   :  { %678 = vst [vmem:[#allocation1 + $0x2] ss:$9 sm:$0xff] %v577_v26  ;;  %v584_v26 = vmax.f32 %v538_v54, 0.0  ;;  %v588_v44 = vmax.f32 %v542_v27, 0.0 }
  0xf2   :  { %679 = vst [vmem:[#allocation1 + $0x3] ss:$9 sm:$0xff] %v578_v41  ;;  %v445_v3 = vrot.slane %v407_v6, 1  ;;  %v446_v54 = vrot.slane %v407_v6, 2  ;;  %v450_v51 = vrot.slane %v407_v6, 6  ;;  %v545_v27 = vadd.f32 %v5308_v9, %v407_v6 }
  0xf3   :  { %680 = vst [vmem:[#allocation1 + $0x4] ss:$9 sm:$0xff] %v579_v53  ;;  %v543_v53 = vadd.f32 %v5326_v38, %v443_v42  ;;  %v447_v42 = vrot.slane %v407_v6, 3 }
  0xf4   :  { %681 = vst [vmem:[#allocation1 + $0x5] ss:$9 sm:$0xff] %v580_v45  ;;  %v583_v45 = vmax.f32 %v537_v48, 0.0  ;;  %v448_v48 = vrot.slane %v407_v6, 4  ;;  %v546_v10 = vadd.f32 %v5311_v18, %v445_v3 }
  0xf5   :  { %682 = vst [vmem:[#allocation1 + $0x6] ss:$9 sm:$0xff] %v581_v43  ;;  %v585_v43 = vmax.f32 %v539_v49, 0.0  ;;  %v589_v46 = vmax.f32 %v543_v53, 0.0  ;;  %v544_v49 = vadd.f32 %v5305_v55, %v444_v1  ;;  %v548_v58 = vadd.f32 %v5317_v40, %v447_v42  ;;  %v291_v1 = vpop.f32.mrf.mxu0 }
  0xf7   :  { %v590_v59 = vmax.f32 %v544_v49, 0.0  ;;  %v594_v3 = vmax.f32 %v548_v58, 0.0  ;;  %v451_v49 = vrot.slane %v407_v6, 7 }
  0xfc   :  { %v5362_v41 = vld [vmem:[#allocation1] sm:$0xff] }
  0xfd   :  { %684 = vst [vmem:[#allocation1] ss:$9 sm:$0xff] %v582_v7  ;;  %v449_v7 = vrot.slane %v407_v6, 5 }
  0xfe   :  { %685 = vst [vmem:[#allocation1 + $0x1] ss:$9 sm:$0xff] %v583_v45  ;;  %v592_v45 = vmax.f32 %v546_v10, 0.0 }
  0xff   :  { %686 = vst [vmem:[#allocation1 + $0x2] ss:$9 sm:$0xff] %v584_v26  ;;  %v547_v26 = vadd.f32 %v5314_v24, %v446_v54  ;;  %v550_v53 = vadd.f32 %v5323_v30, %v449_v7 }
 0x100   :  { %687 = vst [vmem:[#allocation1 + $0x3] ss:$9 sm:$0xff] %v585_v43  ;;  %v408_v43 = vpop.f32.mrf.mxu1 }
 0x101   :  { %688 = vst [vmem:[#allocation1 + $0x4] ss:$9 sm:$0xff] %v586_v36  ;;  %v551_v36 = vadd.f32 %v5326_v38, %v450_v51  ;;  %v409_v54 = vadd.f32 %v408_v43, %v291_v1  ;;  %v596_v42 = vmax.f32 %v550_v53, 0.0  ;;  %v716_v51 = vpack.c.bf16 %v5343_v28, %v5343_v28 }
 0x102   :  { %689 = vst [vmem:[#allocation1 + $0x5] ss:$9 sm:$0xff] %v587_v2  ;;  %v549_v2 = vadd.f32 %v5320_v50, %v448_v48  ;;  %v717_v28 = vpack.c.bf16 %v5353_v56, %v5353_v56 }
 0x103   :  { %690 = vst [vmem:[#allocation1 + $0x6] ss:$9 sm:$0xff] %v588_v44  ;;  %v591_v44 = vmax.f32 %v545_v27, 0.0  ;;  %v597_v48 = vmax.f32 %v551_v36, 0.0  ;;  %v452_v7 = vrot.slane %v409_v54, 1  ;;  %v453_v38 = vrot.slane %v409_v54, 2 }
 0x104   :  { %691 = vst [vmem:[#allocation1 + $0x7] ss:$9 sm:$0xff] %v589_v46  ;;  %v593_v46 = vmax.f32 %v547_v26, 0.0  ;;  %v595_v25 = vmax.f32 %v549_v2, 0.0  ;;  %v454_v10 = vrot.slane %v409_v54, 3  ;;  %v455_v27 = vrot.slane %v409_v54, 4 }
 0x105   :  { %v552_v26 = vadd.f32 %v5305_v55, %v451_v49  ;;  %v456_v58 = vrot.slane %v409_v54, 5  ;;  %v554_v2 = vadd.f32 %v5311_v18, %v452_v7  ;;  %v555_v6 = vadd.f32 %v5314_v24, %v453_v38 }
 0x106   :  { %v737_v53 = vrot.slane %v716_v51, 3 }
 0x107   :  { %v598_v43 = vmax.f32 %v552_v26, 0.0  ;;  %v558_v55 = vadd.f32 %v5323_v30, %v456_v58  ;;  %v600_v18 = vmax.f32 %v554_v2, 0.0 }
 0x108   :  { %v746_v24 = vsel %vm55_vm1, %v716_v51, %v737_v53  ;;  %v749_v56 = vsel %vm59_vm2, %v716_v51, %v737_v53  ;;  %v752_v30 = vsel %vm63_vm3, %v716_v51, %v737_v53  ;;  %v5397_v49 = vsel %vm50_vm0, %v716_v51, %v737_v53 }
 0x109   :  { %v604_v1 = vmax.f32 %v558_v55, 0.0  ;;  %v5399_v7 = vrot.slane %v752_v30, 3 }
 0x10b   :  { %v5372_v34 = vld [vmem:[#allocation1] sm:$0xff] }
 0x10c   :  { %693 = vst [vmem:[#allocation1] ss:$9 sm:$0xff] %v590_v59  ;;  %v556_v59 = vadd.f32 %v5317_v40, %v454_v10 }
 0x10d   :  { %694 = vst [vmem:[#allocation1 + $0x1] ss:$9 sm:$0xff] %v591_v44 }
 0x10e   :  { %695 = vst [vmem:[#allocation1 + $0x2] ss:$9 sm:$0xff] %v592_v45  ;;  %v557_v45 = vadd.f32 %v5320_v50, %v455_v27  ;;  %v738_v50 = vrot.slane %v717_v28, 3 }
 0x10f   :  { %696 = vst [vmem:[#allocation1 + $0x3] ss:$9 sm:$0xff] %v593_v46  ;;  %v601_v46 = vmax.f32 %v555_v6, 0.0  ;;  %v830_v6 = vshrl.u32 %v5397_v49, 16 }
 0x110   :  { %697 = vst [vmem:[#allocation1 + $0x4] ss:$9 sm:$0xff] %v594_v3  ;;  %v603_v40 = vmax.f32 %v557_v45, 0.0  ;;  %v5388_v3 = vrot.slane %v746_v24, 1  ;;  %v761_v38 = vsel %vm59_vm2, %v717_v28, %v738_v50  ;;  %v764_v10 = vsel %vm63_vm3, %v717_v28, %v738_v50 }
 0x111   :  { %698 = vst [vmem:[#allocation1 + $0x5] ss:$9 sm:$0xff] %v595_v25  ;;  %v553_v25 = vadd.f32 %v5308_v9, %v409_v54  ;;  %v602_v9 = vmax.f32 %v556_v59, 0.0  ;;  %v718_v54 = vpack.c.bf16 %v5362_v41, %v5362_v41  ;;  %v5406_v58 = vsel %vm50_vm0, %v717_v28, %v738_v50 }
 0x112   :  { %699 = vst [vmem:[#allocation1 + $0x6] ss:$9 sm:$0xff] %v596_v42  ;;  %v5393_v42 = vrot.slane %v749_v56, 2  ;;  %v835_v27 = vshll.u32 %v5388_v3, 16  ;;  %v838_v41 = vshrl.u32 %v5388_v3, 16  ;;  %v5416_v59 = vrot.slane %v761_v38, 2 }
 0x113   :  { %700 = vst [vmem:[#allocation1 + $0x7] ss:$9 sm:$0xff] %v597_v48  ;;  %v599_v44 = vmax.f32 %v553_v25, 0.0  ;;  %v758_v48 = vsel %vm55_vm1, %v717_v28, %v738_v50  ;;  %v739_v26 = vrot.slane %v718_v54, 3  ;;  %v5418_v53 = vrot.slane %v764_v10, 3 }
 0x114   :  { %v5408_v2 = vrot.slane %v758_v48, 1  ;;  %v843_v51 = vshll.u32 %v5393_v42, 16  ;;  %v719_v45 = vpack.c.bf16 %v5372_v34, %v5372_v34  ;;  %v851_v28 = vshll.u32 %v5399_v7, 16 }
 0x115   :  { %v858_v55 = vshll.u32 %v5406_v58, 16  ;;  %v854_v34 = vshrl.u32 %v5399_v7, 16  ;;  %v877_v48 = vshrl.u32 %v5416_v59, 16  ;;  %v882_v38 = vshll.u32 %v5418_v53, 16 }
 0x116   :  { %v866_v24 = vshll.u32 %v5408_v2, 16  ;;  %v869_v50 = vshrl.u32 %v5408_v2, 16  ;;  %v740_v56 = vrot.slane %v719_v45, 3 }
 0x11a   :  { %v701_v36 = vld [vmem:[#allocation1] sm:$0xff] }
 0x11b   :  { %702 = vst [vmem:[#allocation1] ss:$9 sm:$0xff] %v598_v43  ;;  %v846_v43 = vshrl.u32 %v5393_v42, 16  ;;  %v5441_v10 = vpack.c.bf16 %v701_v36, %v701_v36 }
 0x11c   :  { %703 = vst [vmem:[#allocation1 + $0x1] ss:$9 sm:$0xff] %v599_v44  ;;  %v837_v44 = vsel %vm5411_vm8, %v830_v6, %v835_v27 }
 0x11d   :  { %704 = vst [vmem:[#allocation1 + $0x2] ss:$9 sm:$0xff] %v600_v18  ;;  %v5426_v18 = vsel %vm50_vm0, %v718_v54, %v739_v26  ;;  %v853_v30 = vsel %vm5411_vm8, %v846_v43, %v851_v28  ;;  %v773_v43 = vsel %vm59_vm2, %v718_v54, %v739_v26  ;;  %v885_v28 = vshrl.u32 %v5418_v53, 16 }
 0x11e   :  { %705 = vst [vmem:[#allocation1 + $0x3] ss:$9 sm:$0xff] %v601_v46  ;;  %v889_v27 = vshll.u32 %v5426_v18, 16 }
 0x11f   :  { %706 = vst [vmem:[#allocation1 + $0x4] ss:$9 sm:$0xff] %v602_v9  ;;  %v845_v9 = vsel %vm5411_vm8, %v838_v41, %v843_v51  ;;  %v860_v41 = vsel %vm5411_vm8, %v854_v34, %v858_v55  ;;  %v770_v51 = vsel %vm55_vm1, %v718_v54, %v739_v26  ;;  %v884_v55 = vsel %vm5411_vm8, %v877_v48, %v882_v38  ;;  %v4916_v38 = vld [vmem:[%s6470_s2 + $0x10] sm:$0xff] }
 0x120   :  { %707 = vst [vmem:[#allocation1 + $0x5] ss:$9 sm:$0xff] %v603_v40  ;;  %v861_v40 = vshrl.u32 %v5406_v58, 16  ;;  %v741_v34 = vrot.slane %v5441_v10, 3  ;;  %v788_v48 = vsel %vm63_vm3, %v719_v45, %v740_v56 }
 0x121   :  { %708 = vst [vmem:[#allocation1 + $0x6] ss:$9 sm:$0xff] %v604_v1  ;;  %v874_v1 = vshll.u32 %v5416_v59, 16 }
 0x122   :  { %v868_v6 = vsel %vm5411_vm8, %v861_v40, %v866_v24  ;;  %v5458_v24 = vrot.slane %v770_v51, 1  ;;  %v891_v40 = vsel %vm5411_vm8, %v885_v28, %v889_v27  ;;  %v794_v27 = vsel %vm55_vm1, %v5441_v10, %v741_v34 }
 0x123   :  { %v876_v36 = vsel %vm5411_vm8, %v869_v50, %v874_v1  ;;  %v4917_v50 = vld [vmem:[%s6470_s2 + $0x18] sm:$0xff]  ;;  %v5465_v1 = vrot.slane %v773_v43, 2 }
 0x124   :  { %1081 = vmatpush.bf16.msra.mxu2 %v4917_v50  ;;  %v900_v43 = vshrl.u32 %v5458_v24, 16  ;;  %v5491_v50 = vsel %vm50_vm0, %v5441_v10, %v741_v34 }
 0x125   :  { %v905_v28 = vshll.u32 %v5465_v1, 16 }
 0x128   :  { %v709_v46 = vld [vmem:[#allocation1] sm:$0xff]  ;;  %1082 = vmatpush.bf16.msra.mxu2 %v4916_v38 }
 0x129   :  { %1003 = vst [vmem:[#allocation1] ss:$9 sm:$0xff] %v837_v44  ;;  %v776_v44 = vsel %vm63_vm3, %v718_v54, %v739_v26  ;;  %v785_v54 = vsel %vm59_vm2, %v719_v45, %v740_v56  ;;  %v721_v23 = vpack.c.bf16 %v709_v46, %v709_v46 }
 0x12a   :  { %1006 = vst [vmem:[#allocation1 + $0x1] ss:$9 sm:$0xff] %v845_v9  ;;  %v782_v9 = vsel %vm55_vm1, %v719_v45, %v740_v56  ;;  %v778_v26 = vrot.slane %v776_v44, 3  ;;  %v5477_v51 = vrot.slane %v785_v54, 2  ;;  %v908_v44 = vshrl.u32 %v5465_v1, 16 }
 0x12b   :  { %1009 = vst [vmem:[#allocation1 + $0x2] ss:$9 sm:$0xff] %v853_v30  ;;  %v5468_v30 = vrot.slane %v782_v9, 1  ;;  %v5493_v54 = vrot.slane %v794_v27, 1  ;;  %v742_v61 = vrot.slane %v721_v23, 3 }
 0x12c   :  { %1012 = vst [vmem:[#allocation1 + $0x3] ss:$9 sm:$0xff] %v860_v41  ;;  %v897_v41 = vshll.u32 %v5458_v24, 16  ;;  %v913_v9 = vshll.u32 %v778_v26, 16  ;;  %v929_v26 = vshll.u32 %v5477_v51, 16  ;;  %v932_v62 = vshrl.u32 %v5477_v51, 16 }
 0x12d   :  { %1015 = vst [vmem:[#allocation1 + $0x4] ss:$9 sm:$0xff] %v868_v6  ;;  %v892_v6 = vshrl.u32 %v5426_v18, 16  ;;  %v924_v11 = vshrl.u32 %v5468_v30, 16 }
 0x12e   :  { %1018 = vst [vmem:[#allocation1 + $0x5] ss:$9 sm:$0xff] %v876_v36  ;;  %v5482_v36 = vrot.slane %v788_v48, 3  ;;  %v915_v46 = vsel %vm5411_vm8, %v908_v44, %v913_v9  ;;  %v800_v44 = vsel %vm63_vm3, %v5441_v10, %v741_v34  ;;  %v947_v9 = vshrl.u32 %v5491_v50, 16 }
 0x12f   :  { %1021 = vst [vmem:[#allocation1 + $0x6] ss:$9 sm:$0xff] %v884_v55  ;;  %v5486_v55 = vsel %vm50_vm0, %v719_v45, %v740_v56  ;;  %v899_v48 = vsel %vm5411_vm8, %v892_v6, %v897_v41  ;;  %v907_v56 = vsel %vm5411_vm8, %v900_v43, %v905_v28  ;;  %v944_v41 = vshll.u32 %v5491_v50, 16 }
 0x130   :  { %1024 = vst [vmem:[#allocation1 + $0x7] ss:$9 sm:$0xff] %v891_v40  ;;  %v921_v40 = vshll.u32 %v5468_v30, 16  ;;  %v916_v38 = vshrl.u32 %v5486_v55, 16  ;;  %v937_v27 = vshll.u32 %v5482_v36, 16  ;;  %v952_v6 = vshll.u32 %v5493_v54, 16 }
 0x131   :  { %v797_v28 = vsel %vm59_vm2, %v5441_v10, %v741_v34  ;;  %v809_v10 = vsel %vm59_vm2, %v721_v23, %v742_v61  ;;  %v812_v34 = vsel %vm63_vm3, %v721_v23, %v742_v61 }
 0x132   :  { %v923_v43 = vsel %vm5411_vm8, %v916_v38, %v921_v40  ;;  %v5523_v38 = vrot.slane %v797_v28, 2  ;;  %v811_v28 = vrot.slane %v809_v10, 2 }
 0x134   :  { %v991_v60 = vshll.u32 %v811_v28, 16  ;;  %v994_v10 = vshrl.u32 %v811_v28, 16 }
 0x137   :  { %v1025_v45 = vld [vmem:[#allocation1] sm:$0xff] }
 0x138   :  { %1027 = vst [vmem:[#allocation1] ss:$9 sm:$0xff] %v899_v48  ;;  %4611 = vmatmul.msk.bf16.vlgmr.msra.gmra.mxu2 %vm1068_vm9, %v1025_v45  ;;  %v931_v48 = vsel %vm5411_vm8, %v924_v11, %v929_v26  ;;  %v940_v45 = vshrl.u32 %v5482_v36, 16  ;;  %v954_v11 = vsel %vm5411_vm8, %v947_v9, %v952_v6  ;;  %v806_v26 = vsel %vm55_vm1, %v721_v23, %v742_v61 }
 0x139   :  { %1029 = vst [vmem:[#allocation1 + $0x1] ss:$9 sm:$0xff] %v907_v56  ;;  %v939_v56 = vsel %vm5411_vm8, %v932_v62, %v937_v27  ;;  %v805_v62 = vsel %vm50_vm0, %v721_v23, %v742_v61  ;;  %v808_v27 = vrot.slane %v806_v26, 1  ;;  %v4915_v61 = vld [vmem:[%s6470_s2 + $0x8] sm:$0xff] }
 0x13a   :  { %1031 = vst [vmem:[#allocation1 + $0x2] ss:$9 sm:$0xff] %v915_v46  ;;  %v946_v40 = vsel %vm5411_vm8, %v940_v45, %v944_v41  ;;  %v802_v46 = vrot.slane %v800_v44, 3  ;;  %v955_v41 = vshrl.u32 %v5493_v54, 16  ;;  %v814_v45 = vrot.slane %v812_v34, 3  ;;  %1155 = vmatpush.bf16.msra.mxu3 %v4915_v61 }
 0x13b   :  { %1033 = vst [vmem:[#allocation1 + $0x3] ss:$9 sm:$0xff] %v923_v43  ;;  %v960_v43 = vshll.u32 %v5523_v38, 16  ;;  %v975_v9 = vshll.u32 %v805_v62, 16  ;;  %v978_v26 = vshrl.u32 %v805_v62, 16 }
 0x13c   :  { %1035 = vst [vmem:[#allocation1 + $0x4] ss:$9 sm:$0xff] %v931_v48  ;;  %v963_v48 = vshrl.u32 %v5523_v38, 16  ;;  %v968_v6 = vshll.u32 %v802_v46, 16  ;;  %v999_v20 = vshll.u32 %v814_v45, 16 }
 0x13d   :  { %1037 = vst [vmem:[#allocation1 + $0x5] ss:$9 sm:$0xff] %v939_v56  ;;  %v983_v56 = vshll.u32 %v808_v27, 16  ;;  %v962_v44 = vsel %vm5411_vm8, %v955_v41, %v960_v43 }
 0x13e   :  { %1039 = vst [vmem:[#allocation1 + $0x6] ss:$9 sm:$0xff] %v946_v40  ;;  %v971_v40 = vshrl.u32 %v802_v46, 16  ;;  %v970_v23 = vsel %vm5411_vm8, %v963_v48, %v968_v6  ;;  %v4914_v48 = vld [vmem:[%s6470_s2] sm:$0xff]  ;;  %v1001_v6 = vsel %vm5411_vm8, %v994_v10, %v999_v20 }
 0x13f   :  { %1041 = vst [vmem:[#allocation1 + $0x7] ss:$9 sm:$0xff] %v954_v11  ;;  %v986_v11 = vshrl.u32 %v808_v27, 16  ;;  %v985_v41 = vsel %vm5411_vm8, %v978_v26, %v983_v56  ;;  %1156 = vmatpush.bf16.msra.mxu3 %v4914_v48 }
 0x140   :  { %v977_v34 = vsel %vm5411_vm8, %v971_v40, %v975_v9 }
 0x141   :  { %v993_v43 = vsel %vm5411_vm8, %v986_v11, %v991_v60 }
 0x146   :  { %v1042_v57 = vld [vmem:[#allocation1] sm:$0xff] }
 0x147   :  { %1044 = vst [vmem:[#allocation1] ss:$9 sm:$0xff] %v962_v44 }
 0x148   :  { %1046 = vst [vmem:[#allocation1 + $0x1] ss:$9 sm:$0xff] %v970_v23  ;;  %4612 = vmatmul.msk.bf16.gmra.mxu2 %vm1068_vm9, %v1042_v57 }
 0x149   :  { %1048 = vst [vmem:[#allocation1 + $0x2] ss:$9 sm:$0xff] %v977_v34 }
 0x14a   :  { %1050 = vst [vmem:[#allocation1 + $0x3] ss:$9 sm:$0xff] %v985_v41 }
 0x14b   :  { %1052 = vst [vmem:[#allocation1 + $0x4] ss:$9 sm:$0xff] %v993_v43 }
 0x14c   :  { %1054 = vst [vmem:[#allocation1 + $0x5] ss:$9 sm:$0xff] %v1001_v6 }
 0x153   :  { %v1055_v57 = vld [vmem:[#allocation1] sm:$0xff] }
 0x154   :  { %1099 = vst [vmem:[#allocation1] ss:$9 sm:$0xff] %v5397_v49  ;;  %v5578_v49 = vld [vmem:[%s6471_s3 + $0x2] ss:$0 sm:$0xff] }
 0x155   :  { %1101 = vst [vmem:[#allocation1 + $0x1] ss:$9 sm:$0xff] %v5388_v3 }
 0x156   :  { %1103 = vst [vmem:[#allocation1 + $0x2] ss:$9 sm:$0xff] %v5393_v42 }
 0x157   :  { %1105 = vst [vmem:[#allocation1 + $0x3] ss:$9 sm:$0xff] %v5399_v7 }
 0x158   :  { %1107 = vst [vmem:[#allocation1 + $0x4] ss:$9 sm:$0xff] %v5406_v58  ;;  %4613 = vmatmul.msk.bf16.gmra.mxu2 %vm1068_vm9, %v1055_v57 }
 0x159   :  { %1109 = vst [vmem:[#allocation1 + $0x5] ss:$9 sm:$0xff] %v5408_v2 }
 0x15a   :  { %1111 = vst [vmem:[#allocation1 + $0x6] ss:$9 sm:$0xff] %v5416_v59  ;;  %v5581_v59 = vrot.slane %v5578_v49, 2 }
 0x15b   :  { %1113 = vst [vmem:[#allocation1 + $0x7] ss:$9 sm:$0xff] %v5418_v53  ;;  %v5584_v53 = vrot.slane %v5578_v49, 4 }
 0x162   :  { %v1114_v20 = vld [vmem:[#allocation1] sm:$0xff] }
 0x163   :  { %1115 = vst [vmem:[#allocation1] ss:$9 sm:$0xff] %v5426_v18  ;;  %4622 = vmatmul.msk.bf16.vlgmr.msra.gmra.mxu3 %vm1068_vm9, %v1114_v20  ;;  %v5587_v18 = vrot.slane %v5578_v49, 6 }
 0x164   :  { %1116 = vst [vmem:[#allocation1 + $0x1] ss:$9 sm:$0xff] %v5458_v24 }
 0x165   :  { %1117 = vst [vmem:[#allocation1 + $0x2] ss:$9 sm:$0xff] %v5465_v1 }
 0x166   :  { %1118 = vst [vmem:[#allocation1 + $0x3] ss:$9 sm:$0xff] %v5486_v55 }
 0x167   :  { %1119 = vst [vmem:[#allocation1 + $0x4] ss:$9 sm:$0xff] %v5468_v30 }
 0x168   :  { %1120 = vst [vmem:[#allocation1 + $0x5] ss:$9 sm:$0xff] %v5477_v51 }
 0x169   :  { %1121 = vst [vmem:[#allocation1 + $0x6] ss:$9 sm:$0xff] %v5482_v36 }
 0x16a   :  { %1122 = vst [vmem:[#allocation1 + $0x7] ss:$9 sm:$0xff] %v5491_v50 }
 0x171   :  { %v1123_v60 = vld [vmem:[#allocation1] sm:$0xff] }
 0x172   :  { %1124 = vst [vmem:[#allocation1] ss:$9 sm:$0xff] %v5493_v54 }
 0x173   :  { %1125 = vst [vmem:[#allocation1 + $0x1] ss:$9 sm:$0xff] %v5523_v38  ;;  %4623 = vmatmul.msk.bf16.gmra.mxu3 %vm1068_vm9, %v1123_v60 }
 0x174   :  { %1126 = vst [vmem:[#allocation1 + $0x2] ss:$9 sm:$0xff] %v802_v46 }
 0x175   :  { %1127 = vst [vmem:[#allocation1 + $0x3] ss:$9 sm:$0xff] %v805_v62 }
 0x176   :  { %1128 = vst [vmem:[#allocation1 + $0x4] ss:$9 sm:$0xff] %v808_v27 }
 0x177   :  { %1129 = vst [vmem:[#allocation1 + $0x5] ss:$9 sm:$0xff] %v811_v28 }
 0x17e   :  { %v1130_v3 = vld [vmem:[#allocation1] sm:$0xff] }
 0x183   :  { %4624 = vmatmul.msk.bf16.gmra.mxu3 %vm1068_vm9, %v1130_v3 }
 0x1bb   :  { %v1084_v42 = vpop.f32.mrf.mxu2 }
 0x1c3   :  { %v1086_v7 = vpop.f32.mrf.mxu2 }
 0x1cb   :  { %v1089_v45 = vpop.f32.mrf.mxu2 }
 0x1d3   :  { %v1091_v3 = vpop.f32.mrf.mxu2 }
 0x1e6   :  { %v1158_v58 = vpop.f32.mrf.mxu3 }
 0x1e7   :  { %v1159_v2 = vadd.f32 %v1158_v58, %v1084_v42 }
 0x1e9   :  { %v1179_v24 = vrot.slane %v1159_v2, 2  ;;  %v1180_v1 = vrot.slane %v1159_v2, 4  ;;  %v1181_v30 = vrot.slane %v1159_v2, 6  ;;  %v1219_v51 = vadd.f32 %v5578_v49, %v1159_v2 }
 0x1eb   :  { %v1220_v36 = vadd.f32 %v5581_v59, %v1179_v24  ;;  %v1221_v55 = vadd.f32 %v5584_v53, %v1180_v1  ;;  %v1222_v50 = vadd.f32 %v5587_v18, %v1181_v30  ;;  %v1241_v54 = vmax.f32 %v1219_v51, 0.0 }
 0x1ed   :  { %v1242_v38 = vmax.f32 %v1220_v36, 0.0  ;;  %v1243_v46 = vmax.f32 %v1221_v55, 0.0  ;;  %v1244_v62 = vmax.f32 %v1222_v50, 0.0  ;;  %1285 = vst [vmem:[#allocation1] ss:$4 sm:$0xff] %v1241_v54 }
 0x1ee   :  { %v1160_v27 = vpop.f32.mrf.mxu3 }
 0x1ef   :  { %1287 = vst [vmem:[#allocation1 + $0x1] ss:$4 sm:$0xff] %v1242_v38  ;;  %v1161_v28 = vadd.f32 %v1160_v27, %v1086_v7 }
 0x1f0   :  { %1289 = vst [vmem:[#allocation1 + $0x2] ss:$4 sm:$0xff] %v1243_v46 }
 0x1f1   :  { %1291 = vst [vmem:[#allocation1 + $0x3] ss:$4 sm:$0xff] %v1244_v62  ;;  %v1182_v9 = vrot.slane %v1161_v28, 2  ;;  %v1183_v56 = vrot.slane %v1161_v28, 4  ;;  %v1184_v44 = vrot.slane %v1161_v28, 6  ;;  %v1223_v40 = vadd.f32 %v5578_v49, %v1161_v28 }
 0x1f3   :  { %v1224_v11 = vadd.f32 %v5581_v59, %v1182_v9  ;;  %v1225_v61 = vadd.f32 %v5584_v53, %v1183_v56  ;;  %v1226_v23 = vadd.f32 %v5587_v18, %v1184_v44  ;;  %v1245_v26 = vmax.f32 %v1223_v40, 0.0  ;;  %v1094_v56 = vpop.f32.mrf.mxu2 }
 0x1f5   :  { %v1246_v10 = vmax.f32 %v1224_v11, 0.0  ;;  %v1247_v34 = vmax.f32 %v1225_v61, 0.0  ;;  %v1248_v41 = vmax.f32 %v1226_v23, 0.0  ;;  %1293 = vst [vmem:[#allocation1 + $0x20] ss:$4 sm:$0xff] %v1245_v26 }
 0x1f6   :  { %v1163_v43 = vpop.f32.mrf.mxu3 }
 0x1f7   :  { %1295 = vst [vmem:[#allocation1 + $0x21] ss:$4 sm:$0xff] %v1246_v10  ;;  %v1164_v48 = vadd.f32 %v1163_v43, %v1089_v45 }
 0x1f8   :  { %1297 = vst [vmem:[#allocation1 + $0x22] ss:$4 sm:$0xff] %v1247_v34  ;;  %v5601_v24 = vld.sshfl [vmem:[#allocation1] sm:$0xff pattern:$0x73625140] }
 0x1f9   :  { %1299 = vst [vmem:[#allocation1 + $0x23] ss:$4 sm:$0xff] %v1248_v41  ;;  %v1185_v6 = vrot.slane %v1164_v48, 2  ;;  %v1186_v57 = vrot.slane %v1164_v48, 4  ;;  %v1187_v20 = vrot.slane %v1164_v48, 6  ;;  %v1227_v60 = vadd.f32 %v5578_v49, %v1164_v48 }
 0x1fa   :  { %6547 = vst [vmem:[#allocation36_spill] sm:$0xff] %v5601_v24 }
 0x1fb   :  { %v1228_v42 = vadd.f32 %v5581_v59, %v1185_v6  ;;  %v1229_v7 = vadd.f32 %v5584_v53, %v1186_v57  ;;  %v1230_v58 = vadd.f32 %v5578_v49, %v1187_v20  ;;  %v1249_v2 = vmax.f32 %v1227_v60, 0.0 }
 0x1fd   :  { %v1250_v1 = vmax.f32 %v1228_v42, 0.0  ;;  %v1251_v30 = vmax.f32 %v1229_v7, 0.0  ;;  %v1252_v51 = vmax.f32 %v1230_v58, 0.0  ;;  %1302 = vst [vmem:[#allocation1] ss:$4 sm:$0xff] %v1249_v2  ;;  %v1096_v7 = vpop.f32.mrf.mxu2 }
 0x1fe   :  { %v1165_v36 = vpop.f32.mrf.mxu3 }
 0x1ff   :  { %1303 = vst [vmem:[#allocation1 + $0x1] ss:$4 sm:$0xff] %v1250_v1  ;;  %v1166_v55 = vadd.f32 %v1165_v36, %v1091_v3 }
 0x200   :  { %v5603_v50 = vld.sshfl [vmem:[#allocation1 + $0x20] sm:$0xff pattern:$0x73625140]  ;;  %1304 = vst [vmem:[#allocation1 + $0x2] ss:$4 sm:$0xff] %v1251_v30 }
 0x201   :  { %6548 = vst [vmem:[#allocation37_spill] sm:$0xff] %v5603_v50  ;;  %v1188_v54 = vrot.slane %v1166_v55, 2  ;;  %v1189_v38 = vrot.slane %v1166_v55, 4  ;;  %v1190_v46 = vrot.slane %v1166_v55, 6  ;;  %v1231_v62 = vadd.f32 %v5581_v59, %v1166_v55 }
 0x202   :  { %1306 = vst [vmem:[#allocation1 + $0x20] ss:$4 sm:$0xff] %v1252_v51 }
 0x203   :  { %v1232_v27 = vadd.f32 %v5584_v53, %v1188_v54  ;;  %v1233_v28 = vadd.f32 %v5587_v18, %v1189_v38  ;;  %v1234_v45 = vadd.f32 %v5578_v49, %v1190_v46  ;;  %v1253_v9 = vmax.f32 %v1231_v62, 0.0 }
 0x204   :  { %v6553_v38 = vunpack.i.h.s16 %v5065_v21 }
 0x205   :  { %v1254_v44 = vmax.f32 %v1232_v27, 0.0  ;;  %v1255_v40 = vmax.f32 %v1233_v28, 0.0  ;;  %v1256_v11 = vmax.f32 %v1234_v45, 0.0  ;;  %1307 = vst [vmem:[#allocation1 + $0x21] ss:$4 sm:$0xff] %v1253_v9  ;;  %v6563_v9 = vld [vmem:[#allocation5_spill] sm:$0xff] }
 0x206   :  { %v1168_v61 = vpop.f32.mrf.mxu3 }
 0x207   :  { %v5609_v23 = vld.sshfl [vmem:[#allocation1] sm:$0xff pattern:$0x73625140]  ;;  %1308 = vst [vmem:[#allocation1 + $0x22] ss:$4 sm:$0xff] %v1254_v44  ;;  %v1169_v26 = vadd.f32 %v1168_v61, %v1094_v56  ;;  %v6564_v56 = vld [vmem:[#allocation10_spill] sm:$0xff] }
 0x208   :  { %6549 = vst [vmem:[#allocation38_spill] sm:$0xff] %v5609_v23 }
 0x209   :  { %1309 = vst [vmem:[#allocation1 + $0x23] ss:$4 sm:$0xff] %v1255_v40  ;;  %v1191_v10 = vrot.slane %v1169_v26, 2  ;;  %v1192_v34 = vrot.slane %v1169_v26, 4  ;;  %v1193_v41 = vrot.slane %v1169_v26, 6  ;;  %v1235_v43 = vadd.f32 %v5581_v59, %v1169_v26 }
 0x20a   :  { %1311 = vst [vmem:[#allocation1] ss:$4 sm:$0xff] %v1256_v11 }
 0x20b   :  { %v1236_v48 = vadd.f32 %v5584_v53, %v1191_v10  ;;  %v1237_v6 = vadd.f32 %v5587_v18, %v1192_v34  ;;  %v1238_v57 = vadd.f32 %v5578_v49, %v1193_v41  ;;  %v1257_v20 = vmax.f32 %v1235_v43, 0.0  ;;  %v6565_v10 = vld [vmem:[#allocation7_spill] sm:$0xff]  ;;  %v4918_v43 = vld [vmem:[%s6469_s1 + $0x10] sm:$0xff] }
 0x20c   :  { %v4919_v34 = vld [vmem:[%s6469_s1 + $0x18] sm:$0xff]  ;;  %1469 = vmatpush.bf16.msrb.mxu1 %v4918_v43 }
 0x20d   :  { %v1258_v60 = vmax.f32 %v1236_v48, 0.0  ;;  %v1259_v3 = vmax.f32 %v1237_v6, 0.0  ;;  %v1260_v42 = vmax.f32 %v1238_v57, 0.0  ;;  %1312 = vst [vmem:[#allocation1 + $0x1] ss:$4 sm:$0xff] %v1257_v20  ;;  %v6566_v48 = vld [vmem:[#allocation19_spill] sm:$0xff]  ;;  %1414 = vmatpush.bf16.msrb.mxu0 %v4919_v34 }
 0x20e   :  { %v1170_v58 = vpop.f32.mrf.mxu3  ;;  %v6567_v57 = vld [vmem:[#allocation16_spill] sm:$0xff] }
 0x20f   :  { %1313 = vst [vmem:[#allocation1 + $0x2] ss:$4 sm:$0xff] %v1258_v60  ;;  %v1171_v1 = vadd.f32 %v1170_v58, %v1096_v7 }
 0x210   :  { %v5615_v2 = vld.sshfl [vmem:[#allocation1 + $0x20] sm:$0xff pattern:$0x73625140]  ;;  %1314 = vst [vmem:[#allocation1 + $0x3] ss:$4 sm:$0xff] %v1259_v3 }
 0x211   :  { %6550 = vst [vmem:[#allocation39_spill] sm:$0xff] %v5615_v2  ;;  %v1194_v30 = vrot.slane %v1171_v1, 2  ;;  %v1239_v51 = vadd.f32 %v5581_v59, %v1171_v1  ;;  %v1371_v59 = vpack.i.b16 %v5140_v52, %v6553_v38  ;;  %v6559_v52 = vld [vmem:[#allocation29_spill] sm:$0xff] }
 0x212   :  { %1315 = vst [vmem:[#allocation1 + $0x20] ss:$4 sm:$0xff] %v1260_v42 }
 0x213   :  { %v1240_v18 = vadd.f32 %v5584_v53, %v1194_v30  ;;  %v1261_v36 = vmax.f32 %v1239_v51, 0.0 }
 0x215   :  { %v1262_v49 = vmax.f32 %v1240_v18, 0.0  ;;  %1316 = vst [vmem:[#allocation1 + $0x21] ss:$4 sm:$0xff] %v1261_v36 }
 0x217   :  { %v5619_v55 = vld.sshfl [vmem:[#allocation1] sm:$0xff pattern:$0x73625140]  ;;  %1317 = vst [vmem:[#allocation1 + $0x22] ss:$4 sm:$0xff] %v1262_v49 }
 0x218   :  { %6551 = vst [vmem:[#allocation40_spill] sm:$0xff] %v5619_v55 }
 0x219   :  { %1380 = vst [vmem:[#allocation1 + $0x4] ss:$9 sm:$0xff] %v5092_v35 }
 0x21e   :  { %v5622_v54 = vld.sshfl [vmem:[#allocation1 + $0x20] sm:$0xff pattern:$0x73625140] }
 0x21f   :  { %6552 = vst [vmem:[#allocation41_spill] sm:$0xff] %v5622_v54 }
 0x220   :  { %1372 = vst [vmem:[#allocation1] ss:$9 sm:$0xff] %v5075_v29 }
 0x221   :  { %1374 = vst [vmem:[#allocation1 + $0x1] ss:$9 sm:$0xff] %v5079_v31  ;;  %v4635_v31 = vpack.i.b16 %v5133_v47, %v5065_v21  ;;  %v6557_v47 = vld [vmem:[#allocation27_spill] sm:$0xff] }
 0x222   :  { %1376 = vst [vmem:[#allocation1 + $0x2] ss:$9 sm:$0xff] %v5082_v32  ;;  %v6554_v32 = vld [vmem:[#allocation8_spill] sm:$0xff] }
 0x223   :  { %1378 = vst [vmem:[#allocation1 + $0x3] ss:$9 sm:$0xff] %v5085_v33  ;;  %v4920_v33 = vld [vmem:[%s6469_s1 + $0x20] sm:$0xff] }
 0x224   :  { %1382 = vst [vmem:[#allocation1 + $0x5] ss:$9 sm:$0xff] %v5101_v37  ;;  %1686 = vmatpush.bf16.msrb.mxu2 %v4920_v33 }
 0x225   :  { %1384 = vst [vmem:[#allocation1 + $0x6] ss:$9 sm:$0xff] %v5107_v39 }
 0x226   :  { %1387 = vst [vmem:[#allocation1 + $0x7] ss:$9 sm:$0xff] %v1371_v59 }
 0x22d   :  { %v1388_v53 = vld [vmem:[#allocation1] sm:$0xff] }
 0x22e   :  { %1389 = vst [vmem:[#allocation1] ss:$9 sm:$0xff] %v5167_v63  ;;  %v6560_v63 = vld [vmem:[#allocation30_spill] sm:$0xff]  ;;  %4633 = vmatmul.msk.bf16.vlgmr.msrb.gmra.mxu0 %vm263_vm4, %v1388_v53 }
 0x22f   :  { %1390 = vst [vmem:[#allocation1 + $0x1] ss:$9 sm:$0xff] %v5170_v0  ;;  %v6561_v0 = vld [vmem:[#allocation31_spill] sm:$0xff] }
 0x230   :  { %1391 = vst [vmem:[#allocation1 + $0x2] ss:$9 sm:$0xff] %v5173_v4  ;;  %v6562_v4 = vld [vmem:[#allocation6_spill] sm:$0xff] }
 0x231   :  { %1392 = vst [vmem:[#allocation1 + $0x3] ss:$9 sm:$0xff] %v5178_v5 }
 0x232   :  { %1393 = vst [vmem:[#allocation1 + $0x4] ss:$9 sm:$0xff] %v5196_v16 }
 0x233   :  { %1394 = vst [vmem:[#allocation1 + $0x5] ss:$9 sm:$0xff] %v5198_v17 }
 0x234   :  { %1395 = vst [vmem:[#allocation1 + $0x6] ss:$9 sm:$0xff] %v5202_v22 }
 0x23b   :  { %v1396_v29 = vld [vmem:[#allocation1] sm:$0xff] }
 0x23c   :  { %1427 = vst [vmem:[#allocation1] ss:$9 sm:$0xff] %v5037_v8 }
 0x23d   :  { %1429 = vst [vmem:[#allocation1 + $0x1] ss:$9 sm:$0xff] %v5045_v12  ;;  %v6555_v12 = vld [vmem:[#allocation24_spill] sm:$0xff] }
 0x23e   :  { %1431 = vst [vmem:[#allocation1 + $0x2] ss:$9 sm:$0xff] %v5047_v13  ;;  %v6556_v13 = vld [vmem:[#allocation26_spill] sm:$0xff]  ;;  %4634 = vmatmul.msk.bf16.gmra.mxu0 %vm263_vm4, %v1396_v29 }
 0x23f   :  { %1433 = vst [vmem:[#allocation1 + $0x3] ss:$9 sm:$0xff] %v5049_v14  ;;  %v6558_v14 = vld [vmem:[#allocation28_spill] sm:$0xff] }
 0x240   :  { %1435 = vst [vmem:[#allocation1 + $0x4] ss:$9 sm:$0xff] %v5053_v15 }
 0x241   :  { %1437 = vst [vmem:[#allocation1 + $0x5] ss:$9 sm:$0xff] %v5061_v19 }
 0x242   :  { %1439 = vst [vmem:[#allocation1 + $0x6] ss:$9 sm:$0xff] %v6554_v32 }
 0x243   :  { %1442 = vst [vmem:[#allocation1 + $0x7] ss:$9 sm:$0xff] %v4635_v31 }
 0x24a   :  { %v1443_v8 = vld [vmem:[#allocation1] sm:$0xff] }
 0x24b   :  { %1444 = vst [vmem:[#allocation1] ss:$9 sm:$0xff] %v6555_v12  ;;  %4640 = vmatmul.msk.bf16.vlgmr.msrb.gmra.mxu1 %vm263_vm4, %v1443_v8 }
 0x24c   :  { %1445 = vst [vmem:[#allocation1 + $0x1] ss:$9 sm:$0xff] %v6556_v13 }
 0x24d   :  { %1446 = vst [vmem:[#allocation1 + $0x2] ss:$9 sm:$0xff] %v6557_v47  ;;  %v4921_v47 = vld [vmem:[%s6469_s1 + $0x28] sm:$0xff] }
 0x24e   :  { %1447 = vst [vmem:[#allocation1 + $0x3] ss:$9 sm:$0xff] %v6558_v14  ;;  %1933 = vmatpush.bf16.msrb.mxu3 %v4921_v47  ;;  %v4922_v47 = vld [vmem:[%s6469_s1 + $0x30] sm:$0xff] }
 0x24f   :  { %1448 = vst [vmem:[#allocation1 + $0x4] ss:$9 sm:$0xff] %v6559_v52  ;;  %2180 = vmatpush.bf16.msra.mxu0 %v4922_v47 }
 0x250   :  { %1449 = vst [vmem:[#allocation1 + $0x5] ss:$9 sm:$0xff] %v6560_v63 }
 0x251   :  { %1450 = vst [vmem:[#allocation1 + $0x6] ss:$9 sm:$0xff] %v6561_v0 }
 0x252   :  { %1541 = vst [vmem:[#allocation1 + $0x20] sm:$0xff] %v6562_v4 }
 0x258   :  { %v1451_v46 = vld [vmem:[#allocation1] sm:$0xff] }
 0x259   :  { %v1552_v62 = vld [vmem:[#allocation1 + $0x20] ss:$4 sm:$0xff]  ;;  %v1555_v27 = vld [vmem:[#allocation1 + $0x21] ss:$4 sm:$0xff]  ;;  %v1558_v28 = vld [vmem:[#allocation1 + $0x22] ss:$4 sm:$0xff] }
 0x25a   :  { %v1561_v45 = vld [vmem:[#allocation1 + $0x23] ss:$4 sm:$0xff]  ;;  %1540 = vst [vmem:[#allocation1] sm:$0xff] %v6563_v9 }
 0x25b   :  { %1566 = vst [vmem:[#allocation1 + $0x20] sm:$0xff] %v6564_v56  ;;  %4641 = vmatmul.msk.bf16.gmra.mxu1 %vm263_vm4, %v1451_v46 }
 0x261   :  { %v1543_v44 = vld [vmem:[#allocation1 + $0x1] ss:$4 sm:$0xff]  ;;  %v1546_v40 = vld [vmem:[#allocation1 + $0x2] ss:$4 sm:$0xff]  ;;  %v1549_v11 = vld [vmem:[#allocation1 + $0x3] ss:$4 sm:$0xff] }
 0x262   :  { %v1567_v61 = vld [vmem:[#allocation1 + $0x21] ss:$4 sm:$0xff]  ;;  %v1569_v26 = vld [vmem:[#allocation1 + $0x22] ss:$4 sm:$0xff]  ;;  %1563 = vst [vmem:[#allocation1] sm:$0xff] %v6565_v10 }
 0x263   :  { %v1571_v41 = vld [vmem:[#allocation1 + $0x23] ss:$4 sm:$0xff]  ;;  %v1601_v1 = vunpack.i.h.s16 %v1567_v61  ;;  %v1603_v30 = vunpack.i.h.s16 %v1569_v26 }
 0x264   :  { %1574 = vst [vmem:[#allocation1 + $0x20] sm:$0xff] %v6566_v48  ;;  %v1605_v51 = vunpack.i.h.s16 %v1571_v41 }
 0x265   :  { %v4645_v49 = vpack.i.b16 %v1569_v26, %v1601_v1  ;;  %v4646_v53 = vpack.i.b16 %v1571_v41, %v1603_v30 }
 0x269   :  { %v1564_v6 = vld [vmem:[#allocation1] ss:$4 sm:$0xff] }
 0x26a   :  { %1573 = vst [vmem:[#allocation1] sm:$0xff] %v6567_v57  ;;  %v4644_v58 = vpack.i.b16 %v1567_v61, %v1564_v6 }
 0x26b   :  { %v1583_v7 = vld [vmem:[#allocation1 + $0x20] ss:$4 sm:$0xff] }
 0x271   :  { %v1575_v20 = vld [vmem:[#allocation1] ss:$4 sm:$0xff]  ;;  %v1577_v60 = vld [vmem:[#allocation1 + $0x1] ss:$4 sm:$0xff]  ;;  %v1579_v3 = vld [vmem:[#allocation1 + $0x2] ss:$4 sm:$0xff] }
 0x272   :  { %v1581_v42 = vld [vmem:[#allocation1 + $0x3] ss:$4 sm:$0xff]  ;;  %v1607_v18 = vunpack.i.h.s16 %v1575_v20  ;;  %v1609_v36 = vunpack.i.h.s16 %v1577_v60  ;;  %v1611_v59 = vunpack.i.h.s16 %v1579_v3  ;;  %v4647_v33 = vpack.i.b16 %v1575_v20, %v1605_v51 }
 0x273   :  { %1631 = vst [vmem:[#allocation1] ss:$9 sm:$0xff] %v1543_v44  ;;  %v1613_v31 = vunpack.i.h.s16 %v1581_v42 }
 0x274   :  { %1634 = vst [vmem:[#allocation1 + $0x1] ss:$9 sm:$0xff] %v1546_v40  ;;  %v4648_v29 = vpack.i.b16 %v1577_v60, %v1607_v18  ;;  %v4649_v8 = vpack.i.b16 %v1579_v3, %v1609_v36  ;;  %v4650_v12 = vpack.i.b16 %v1581_v42, %v1611_v59 }
 0x275   :  { %1637 = vst [vmem:[#allocation1 + $0x2] ss:$9 sm:$0xff] %v1549_v11  ;;  %v4651_v13 = vpack.i.b16 %v1583_v7, %v1613_v31 }
 0x276   :  { %1640 = vst [vmem:[#allocation1 + $0x3] ss:$9 sm:$0xff] %v1552_v62 }
 0x277   :  { %1643 = vst [vmem:[#allocation1 + $0x4] ss:$9 sm:$0xff] %v1555_v27 }
 0x278   :  { %1646 = vst [vmem:[#allocation1 + $0x5] ss:$9 sm:$0xff] %v1558_v28 }
 0x279   :  { %1649 = vst [vmem:[#allocation1 + $0x6] ss:$9 sm:$0xff] %v1561_v45 }
 0x27a   :  { %1652 = vst [vmem:[#allocation1 + $0x7] ss:$9 sm:$0xff] %v4644_v58 }
 0x281   :  { %v1653_v38 = vld [vmem:[#allocation1] sm:$0xff] }
 0x282   :  { %4656 = vmatmul.msk.bf16.vlgmr.msrb.gmra.mxu2 %vm263_vm4, %v1653_v38  ;;  %1655 = vst [vmem:[#allocation1] ss:$9 sm:$0xff] %v4645_v49 }
 0x283   :  { %1657 = vst [vmem:[#allocation1 + $0x1] ss:$9 sm:$0xff] %v4646_v53 }
 0x284   :  { %1659 = vst [vmem:[#allocation1 + $0x2] ss:$9 sm:$0xff] %v4647_v33 }
 0x285   :  { %1661 = vst [vmem:[#allocation1 + $0x3] ss:$9 sm:$0xff] %v4648_v29 }
 0x286   :  { %1663 = vst [vmem:[#allocation1 + $0x4] ss:$9 sm:$0xff] %v4649_v8 }
 0x287   :  { %1665 = vst [vmem:[#allocation1 + $0x5] ss:$9 sm:$0xff] %v4650_v12 }
 0x288   :  { %1667 = vst [vmem:[#allocation1 + $0x6] ss:$9 sm:$0xff] %v4651_v13 }
 0x289   :  { %1788 = vst [vmem:[#allocation1 + $0x20] sm:$0xff] %v6562_v4 }
 0x28f   :  { %v1668_v14 = vld [vmem:[#allocation1] sm:$0xff] }
 0x290   :  { %1787 = vst [vmem:[#allocation1] sm:$0xff] %v6563_v9  ;;  %v1799_v46 = vld [vmem:[#allocation1 + $0x20] ss:$4 sm:$0xff]  ;;  %v1802_v62 = vld [vmem:[#allocation1 + $0x21] ss:$4 sm:$0xff] }
 0x291   :  { %v1805_v27 = vld [vmem:[#allocation1 + $0x22] ss:$4 sm:$0xff]  ;;  %v1808_v28 = vld [vmem:[#allocation1 + $0x23] ss:$4 sm:$0xff]  ;;  %v1838_v20 = vunpack.i.h.s16 %v1799_v46  ;;  %v1840_v7 = vunpack.i.h.s16 %v1802_v62 }
 0x292   :  { %4657 = vmatmul.msk.bf16.gmra.mxu2 %vm263_vm4, %v1668_v14  ;;  %1813 = vst [vmem:[#allocation1 + $0x20] sm:$0xff] %v6564_v56  ;;  %v1842_v51 = vunpack.i.h.s16 %v1805_v27  ;;  %v1844_v59 = vunpack.i.h.s16 %v1808_v28 }
 0x293   :  { %v4663_v38 = vpack.i.b16 %v1802_v62, %v1838_v20  ;;  %v4664_v53 = vpack.i.b16 %v1805_v27, %v1840_v7 }
 0x294   :  { %v4665_v33 = vpack.i.b16 %v1808_v28, %v1842_v51 }
 0x297   :  { %v1790_v45 = vld [vmem:[#allocation1 + $0x1] ss:$4 sm:$0xff]  ;;  %v1793_v44 = vld [vmem:[#allocation1 + $0x2] ss:$4 sm:$0xff]  ;;  %v1796_v40 = vld [vmem:[#allocation1 + $0x3] ss:$4 sm:$0xff] }
 0x298   :  { %1810 = vst [vmem:[#allocation1] sm:$0xff] %v6565_v10  ;;  %v1832_v41 = vunpack.i.h.s16 %v1790_v45  ;;  %v1834_v43 = vunpack.i.h.s16 %v1793_v44  ;;  %v1836_v6 = vunpack.i.h.s16 %v1796_v40 }
 0x299   :  { %v1814_v11 = vld [vmem:[#allocation1 + $0x21] ss:$4 sm:$0xff]  ;;  %v1816_v61 = vld [vmem:[#allocation1 + $0x22] ss:$4 sm:$0xff]  ;;  %v1818_v26 = vld [vmem:[#allocation1 + $0x23] ss:$4 sm:$0xff] }
 0x29a   :  { %1821 = vst [vmem:[#allocation1 + $0x20] sm:$0xff] %v6566_v48  ;;  %v4660_v58 = vpack.i.b16 %v1793_v44, %v1832_v41  ;;  %v4661_v18 = vpack.i.b16 %v1796_v40, %v1834_v43  ;;  %v4662_v36 = vpack.i.b16 %v1799_v46, %v1836_v6  ;;  %v1847_v31 = vunpack.i.h.s16 %v1814_v11 }
 0x29f   :  { %v1811_v34 = vld [vmem:[#allocation1] ss:$4 sm:$0xff] }
 0x2a0   :  { %1820 = vst [vmem:[#allocation1] sm:$0xff] %v6567_v57  ;;  %v1846_v49 = vunpack.i.h.s16 %v1811_v34  ;;  %v4666_v29 = vpack.i.b16 %v1811_v34, %v1844_v59 }
 0x2a1   :  { %v1830_v30 = vld [vmem:[#allocation1 + $0x20] ss:$4 sm:$0xff] }
 0x2a2   :  { %v1869_v8 = vpack.i.b16 %v1847_v31, %v1846_v49 }
 0x2a7   :  { %v1822_v60 = vld [vmem:[#allocation1] ss:$4 sm:$0xff]  ;;  %v1824_v3 = vld [vmem:[#allocation1 + $0x1] ss:$4 sm:$0xff]  ;;  %v1826_v42 = vld [vmem:[#allocation1 + $0x2] ss:$4 sm:$0xff] }
 0x2a8   :  { %v1828_v1 = vld [vmem:[#allocation1 + $0x3] ss:$4 sm:$0xff] }
 0x2a9   :  { %1878 = vst [vmem:[#allocation1] ss:$9 sm:$0xff] %v4660_v58 }
 0x2aa   :  { %1881 = vst [vmem:[#allocation1 + $0x1] ss:$9 sm:$0xff] %v4661_v18 }
 0x2ab   :  { %1884 = vst [vmem:[#allocation1 + $0x2] ss:$9 sm:$0xff] %v4662_v36 }
 0x2ac   :  { %1887 = vst [vmem:[#allocation1 + $0x3] ss:$9 sm:$0xff] %v4663_v38 }
 0x2ad   :  { %1890 = vst [vmem:[#allocation1 + $0x4] ss:$9 sm:$0xff] %v4664_v53 }
 0x2ae   :  { %1893 = vst [vmem:[#allocation1 + $0x5] ss:$9 sm:$0xff] %v4665_v33 }
 0x2af   :  { %1896 = vst [vmem:[#allocation1 + $0x6] ss:$9 sm:$0xff] %v4666_v29  ;;  %v4923_v29 = vld [vmem:[%s6469_s1 + $0x38] sm:$0xff] }
 0x2b0   :  { %1899 = vst [vmem:[#allocation1 + $0x7] ss:$9 sm:$0xff] %v1869_v8  ;;  %2427 = vmatpush.bf16.msra.mxu1 %v4923_v29 }
 0x2b7   :  { %v1900_v12 = vld [vmem:[#allocation1] sm:$0xff] }
 0x2b8   :  { %4671 = vmatmul.msk.bf16.vlgmr.msrb.gmra.mxu3 %vm263_vm4, %v1900_v12  ;;  %1902 = vst [vmem:[#allocation1] ss:$9 sm:$0xff] %v1816_v61 }
 0x2b9   :  { %1904 = vst [vmem:[#allocation1 + $0x1] ss:$9 sm:$0xff] %v1818_v26 }
 0x2ba   :  { %1906 = vst [vmem:[#allocation1 + $0x2] ss:$9 sm:$0xff] %v1822_v60 }
 0x2bb   :  { %1908 = vst [vmem:[#allocation1 + $0x3] ss:$9 sm:$0xff] %v1824_v3 }
 0x2bc   :  { %1910 = vst [vmem:[#allocation1 + $0x4] ss:$9 sm:$0xff] %v1826_v42 }
 0x2bd   :  { %1912 = vst [vmem:[#allocation1 + $0x5] ss:$9 sm:$0xff] %v1828_v1 }
 0x2be   :  { %1914 = vst [vmem:[#allocation1 + $0x6] ss:$9 sm:$0xff] %v1830_v30 }
 0x2bf   :  { %2035 = vst [vmem:[#allocation1 + $0x20] sm:$0xff] %v6562_v4 }
 0x2c5   :  { %v1915_v13 = vld [vmem:[#allocation1] sm:$0xff] }
 0x2c6   :  { %2034 = vst [vmem:[#allocation1] sm:$0xff] %v6563_v9  ;;  %v2043_v14 = vld [vmem:[#allocation1 + $0x20] ss:$4 sm:$0xff]  ;;  %v2046_v46 = vld [vmem:[#allocation1 + $0x21] ss:$4 sm:$0xff] }
 0x2c7   :  { %v2049_v62 = vld [vmem:[#allocation1 + $0x22] ss:$4 sm:$0xff]  ;;  %v2052_v27 = vld [vmem:[#allocation1 + $0x23] ss:$4 sm:$0xff] }
 0x2c8   :  { %4672 = vmatmul.msk.bf16.gmra.mxu3 %vm263_vm4, %v1915_v13  ;;  %2060 = vst [vmem:[#allocation1 + $0x20] sm:$0xff] %v6564_v56 }
 0x2cd   :  { %v2037_v28 = vld [vmem:[#allocation1 + $0x2] ss:$4 sm:$0xff]  ;;  %v2040_v45 = vld [vmem:[#allocation1 + $0x3] ss:$4 sm:$0xff] }
 0x2ce   :  { %2054 = vst [vmem:[#allocation1] sm:$0xff] %v6565_v10 }
 0x2cf   :  { %v2061_v44 = vld [vmem:[#allocation1 + $0x22] ss:$4 sm:$0xff]  ;;  %v2063_v40 = vld [vmem:[#allocation1 + $0x23] ss:$4 sm:$0xff] }
 0x2d0   :  { %2066 = vst [vmem:[#allocation1 + $0x20] sm:$0xff] %v6566_v48  ;;  %v2095_v3 = vunpack.i.h.s16 %v2061_v44  ;;  %v2097_v7 = vunpack.i.h.s16 %v2063_v40 }
 0x2d2   :  { %v4676_v30 = vpack.i.b16 %v2063_v40, %v2095_v3 }
 0x2d5   :  { %v2055_v11 = vld [vmem:[#allocation1] ss:$4 sm:$0xff]  ;;  %v2058_v61 = vld [vmem:[#allocation1 + $0x1] ss:$4 sm:$0xff] }
 0x2d6   :  { %2065 = vst [vmem:[#allocation1] sm:$0xff] %v6567_v57  ;;  %v4675_v60 = vpack.i.b16 %v2061_v44, %v2058_v61 }
 0x2d7   :  { %v2075_v6 = vld [vmem:[#allocation1 + $0x20] ss:$4 sm:$0xff]  ;;  %v2077_v20 = vld [vmem:[#allocation1 + $0x21] ss:$4 sm:$0xff] }
 0x2d8   :  { %v2107_v49 = vunpack.i.h.s16 %v2075_v6 }
 0x2da   :  { %v4682_v33 = vpack.i.b16 %v2077_v20, %v2107_v49 }
 0x2dd   :  { %v2067_v26 = vld [vmem:[#allocation1] ss:$4 sm:$0xff]  ;;  %v2069_v34 = vld [vmem:[#allocation1 + $0x1] ss:$4 sm:$0xff]  ;;  %v2071_v41 = vld [vmem:[#allocation1 + $0x2] ss:$4 sm:$0xff] }
 0x2de   :  { %v2073_v43 = vld [vmem:[#allocation1 + $0x3] ss:$4 sm:$0xff]  ;;  %v2099_v42 = vunpack.i.h.s16 %v2067_v26  ;;  %v2101_v58 = vunpack.i.h.s16 %v2069_v34  ;;  %v2103_v1 = vunpack.i.h.s16 %v2071_v41  ;;  %v4677_v36 = vpack.i.b16 %v2067_v26, %v2097_v7 }
 0x2df   :  { %2125 = vst [vmem:[#allocation1] ss:$9 sm:$0xff] %v2037_v28  ;;  %v2105_v18 = vunpack.i.h.s16 %v2073_v43 }
 0x2e0   :  { %2128 = vst [vmem:[#allocation1 + $0x1] ss:$9 sm:$0xff] %v2040_v45  ;;  %v4678_v38 = vpack.i.b16 %v2069_v34, %v2099_v42  ;;  %v4679_v59 = vpack.i.b16 %v2071_v41, %v2101_v58  ;;  %v4680_v53 = vpack.i.b16 %v2073_v43, %v2103_v1 }
 0x2e1   :  { %2131 = vst [vmem:[#allocation1 + $0x2] ss:$9 sm:$0xff] %v2043_v14  ;;  %v4681_v31 = vpack.i.b16 %v2075_v6, %v2105_v18 }
 0x2e2   :  { %2134 = vst [vmem:[#allocation1 + $0x3] ss:$9 sm:$0xff] %v2046_v46 }
 0x2e3   :  { %2137 = vst [vmem:[#allocation1 + $0x4] ss:$9 sm:$0xff] %v2049_v62 }
 0x2e4   :  { %2140 = vst [vmem:[#allocation1 + $0x5] ss:$9 sm:$0xff] %v2052_v27 }
 0x2e5   :  { %2143 = vst [vmem:[#allocation1 + $0x6] ss:$9 sm:$0xff] %v2055_v11 }
 0x2e6   :  { %2146 = vst [vmem:[#allocation1 + $0x7] ss:$9 sm:$0xff] %v4675_v60 }
 0x2ed   :  { %v2147_v51 = vld [vmem:[#allocation1] sm:$0xff] }
 0x2ee   :  { %4687 = vmatmul.msk.bf16.vlgmr.msra.gmra.mxu0 %vm263_vm4, %v2147_v51  ;;  %2149 = vst [vmem:[#allocation1] ss:$9 sm:$0xff] %v4676_v30 }
 0x2ef   :  { %2151 = vst [vmem:[#allocation1 + $0x1] ss:$9 sm:$0xff] %v4677_v36 }
 0x2f0   :  { %2153 = vst [vmem:[#allocation1 + $0x2] ss:$9 sm:$0xff] %v4678_v38 }
 0x2f1   :  { %2155 = vst [vmem:[#allocation1 + $0x3] ss:$9 sm:$0xff] %v4679_v59  ;;  %v5708_v59 = vpop.f32.mrf.mxu0 }
 0x2f2   :  { %2157 = vst [vmem:[#allocation1 + $0x4] ss:$9 sm:$0xff] %v4680_v53  ;;  %v5710_v53 = vpop.f32.mrf.mxu1 }
 0x2f3   :  { %2159 = vst [vmem:[#allocation1 + $0x5] ss:$9 sm:$0xff] %v4681_v31 }
 0x2f4   :  { %2161 = vst [vmem:[#allocation1 + $0x6] ss:$9 sm:$0xff] %v4682_v33 }
 0x2f5   :  { %2282 = vst [vmem:[#allocation1 + $0x20] sm:$0xff] %v6562_v4 }
 0x2f9   :  { %v5712_v29 = vpop.f32.mrf.mxu0 }
 0x2fb   :  { %v2162_v8 = vld [vmem:[#allocation1] sm:$0xff] }
 0x2fc   :  { %2281 = vst [vmem:[#allocation1] sm:$0xff] %v6563_v9  ;;  %v2290_v12 = vld [vmem:[#allocation1 + $0x20] ss:$4 sm:$0xff]  ;;  %v2293_v13 = vld [vmem:[#allocation1 + $0x21] ss:$4 sm:$0xff] }
 0x2fd   :  { %v2296_v47 = vld [vmem:[#allocation1 + $0x22] ss:$4 sm:$0xff]  ;;  %v2299_v14 = vld [vmem:[#allocation1 + $0x23] ss:$4 sm:$0xff]  ;;  %v2330_v61 = vunpack.i.h.s16 %v2290_v12  ;;  %v2332_v26 = vunpack.i.h.s16 %v2293_v13 }
 0x2fe   :  { %4688 = vmatmul.msk.bf16.gmra.mxu0 %vm263_vm4, %v2162_v8  ;;  %2307 = vst [vmem:[#allocation1 + $0x20] sm:$0xff] %v6564_v56  ;;  %v2334_v6 = vunpack.i.h.s16 %v2296_v47  ;;  %v2336_v30 = vunpack.i.h.s16 %v2299_v14  ;;  %v5714_v8 = vpop.f32.mrf.mxu1 }
 0x2ff   :  { %v4693_v1 = vpack.i.b16 %v2293_v13, %v2330_v61  ;;  %v4694_v18 = vpack.i.b16 %v2296_v47, %v2332_v26 }
 0x300   :  { %v4695_v36 = vpack.i.b16 %v2299_v14, %v2334_v6 }
 0x301   :  { %v5717_v13 = vpop.f32.mrf.mxu0 }
 0x303   :  { %v2284_v46 = vld [vmem:[#allocation1 + $0x2] ss:$4 sm:$0xff]  ;;  %v2287_v62 = vld [vmem:[#allocation1 + $0x3] ss:$4 sm:$0xff] }
 0x304   :  { %2301 = vst [vmem:[#allocation1] sm:$0xff] %v6565_v10  ;;  %v2326_v40 = vunpack.i.h.s16 %v2284_v46  ;;  %v2328_v11 = vunpack.i.h.s16 %v2287_v62  ;;  %v4924_v46 = vld [vmem:[%s6469_s1 + $0x40] sm:$0xff] }
 0x305   :  { %v2308_v27 = vld [vmem:[#allocation1 + $0x22] ss:$4 sm:$0xff]  ;;  %v2310_v28 = vld [vmem:[#allocation1 + $0x23] ss:$4 sm:$0xff]  ;;  %2674 = vmatpush.bf16.msra.mxu2 %v4924_v46 }
 0x306   :  { %2313 = vst [vmem:[#allocation1 + $0x20] sm:$0xff] %v6566_v48  ;;  %v4691_v20 = vpack.i.b16 %v2287_v62, %v2326_v40  ;;  %v4692_v7 = vpack.i.b16 %v2290_v12, %v2328_v11  ;;  %v2341_v49 = vunpack.i.h.s16 %v2308_v27  ;;  %v5719_v47 = vpop.f32.mrf.mxu1 }
 0x30b   :  { %v2302_v45 = vld [vmem:[#allocation1] ss:$4 sm:$0xff]  ;;  %v2305_v44 = vld [vmem:[#allocation1 + $0x1] ss:$4 sm:$0xff] }
 0x30c   :  { %2312 = vst [vmem:[#allocation1] sm:$0xff] %v6567_v57  ;;  %v2338_v58 = vunpack.i.h.s16 %v2302_v45  ;;  %v2340_v51 = vunpack.i.h.s16 %v2305_v44  ;;  %v4696_v38 = vpack.i.b16 %v2302_v45, %v2336_v30 }
 0x30d   :  { %v2322_v3 = vld [vmem:[#allocation1 + $0x20] ss:$4 sm:$0xff]  ;;  %v2324_v42 = vld [vmem:[#allocation1 + $0x21] ss:$4 sm:$0xff] }
 0x30e   :  { %v4697_v31 = vpack.i.b16 %v2305_v44, %v2338_v58  ;;  %v2363_v33 = vpack.i.b16 %v2341_v49, %v2340_v51  ;;  %v1478_v45 = vpop.f32.mrf.mxu1 }
 0x313   :  { %v2314_v34 = vld [vmem:[#allocation1] ss:$4 sm:$0xff]  ;;  %v2316_v41 = vld [vmem:[#allocation1 + $0x1] ss:$4 sm:$0xff]  ;;  %v2318_v43 = vld [vmem:[#allocation1 + $0x2] ss:$4 sm:$0xff] }
 0x314   :  { %v2320_v60 = vld [vmem:[#allocation1 + $0x3] ss:$4 sm:$0xff] }
 0x315   :  { %2372 = vst [vmem:[#allocation1] ss:$9 sm:$0xff] %v4691_v20 }
 0x316   :  { %2375 = vst [vmem:[#allocation1 + $0x1] ss:$9 sm:$0xff] %v4692_v7 }
 0x317   :  { %2378 = vst [vmem:[#allocation1 + $0x2] ss:$9 sm:$0xff] %v4693_v1 }
 0x318   :  { %2381 = vst [vmem:[#allocation1 + $0x3] ss:$9 sm:$0xff] %v4694_v18 }
 0x319   :  { %2384 = vst [vmem:[#allocation1 + $0x4] ss:$9 sm:$0xff] %v4695_v36 }
 0x31a   :  { %2387 = vst [vmem:[#allocation1 + $0x5] ss:$9 sm:$0xff] %v4696_v38 }
 0x31b   :  { %2390 = vst [vmem:[#allocation1 + $0x6] ss:$9 sm:$0xff] %v4697_v31 }
 0x31c   :  { %2393 = vst [vmem:[#allocation1 + $0x7] ss:$9 sm:$0xff] %v2363_v33 }
 0x323   :  { %v2394_v12 = vld [vmem:[#allocation1] sm:$0xff] }
 0x324   :  { %4702 = vmatmul.msk.bf16.vlgmr.msra.gmra.mxu1 %vm263_vm4, %v2394_v12  ;;  %2396 = vst [vmem:[#allocation1] ss:$9 sm:$0xff] %v2310_v28  ;;  %v1423_v28 = vpop.f32.mrf.mxu0 }
 0x325   :  { %2398 = vst [vmem:[#allocation1 + $0x1] ss:$9 sm:$0xff] %v2314_v34  ;;  %v5726_v11 = vadd.f32 %v1478_v45, %v1423_v28 }
 0x326   :  { %2400 = vst [vmem:[#allocation1 + $0x2] ss:$9 sm:$0xff] %v2316_v41 }
 0x327   :  { %2402 = vst [vmem:[#allocation1 + $0x3] ss:$9 sm:$0xff] %v2318_v43 }
 0x328   :  { %2404 = vst [vmem:[#allocation1 + $0x4] ss:$9 sm:$0xff] %v2320_v60 }
 0x329   :  { %2406 = vst [vmem:[#allocation1 + $0x5] ss:$9 sm:$0xff] %v2322_v3 }
 0x32a   :  { %2408 = vst [vmem:[#allocation1 + $0x6] ss:$9 sm:$0xff] %v2324_v42 }
 0x32b   :  { %2529 = vst [vmem:[#allocation1 + $0x20] sm:$0xff] %v6562_v4 }
 0x331   :  { %v2409_v14 = vld [vmem:[#allocation1] sm:$0xff] }
 0x332   :  { %2528 = vst [vmem:[#allocation1] sm:$0xff] %v6563_v9  ;;  %v2534_v62 = vld [vmem:[#allocation1 + $0x20] ss:$4 sm:$0xff]  ;;  %v2537_v27 = vld [vmem:[#allocation1 + $0x21] ss:$4 sm:$0xff] }
 0x333   :  { %v2540_v44 = vld [vmem:[#allocation1 + $0x22] ss:$4 sm:$0xff]  ;;  %v2543_v40 = vld [vmem:[#allocation1 + $0x23] ss:$4 sm:$0xff] }
 0x334   :  { %4703 = vmatmul.msk.bf16.gmra.mxu1 %vm263_vm4, %v2409_v14  ;;  %2554 = vst [vmem:[#allocation1 + $0x20] sm:$0xff] %v6564_v56 }
 0x339   :  { %v2531_v61 = vld [vmem:[#allocation1 + $0x3] ss:$4 sm:$0xff] }
 0x33a   :  { %2545 = vst [vmem:[#allocation1] sm:$0xff] %v6565_v10 }
 0x33b   :  { %v2555_v26 = vld [vmem:[#allocation1 + $0x23] ss:$4 sm:$0xff] }
 0x33c   :  { %2558 = vst [vmem:[#allocation1 + $0x20] sm:$0xff] %v6566_v48  ;;  %v2589_v51 = vunpack.i.h.s16 %v2555_v26 }
 0x341   :  { %v2546_v34 = vld [vmem:[#allocation1] ss:$4 sm:$0xff]  ;;  %v2549_v41 = vld [vmem:[#allocation1 + $0x1] ss:$4 sm:$0xff]  ;;  %v2552_v43 = vld [vmem:[#allocation1 + $0x2] ss:$4 sm:$0xff] }
 0x342   :  { %2557 = vst [vmem:[#allocation1] sm:$0xff] %v6567_v57  ;;  %v4706_v1 = vpack.i.b16 %v2555_v26, %v2552_v43 }
 0x343   :  { %v2567_v6 = vld [vmem:[#allocation1 + $0x20] ss:$4 sm:$0xff]  ;;  %v2569_v7 = vld [vmem:[#allocation1 + $0x21] ss:$4 sm:$0xff]  ;;  %v2571_v58 = vld [vmem:[#allocation1 + $0x22] ss:$4 sm:$0xff] }
 0x344   :  { %v2599_v33 = vunpack.i.h.s16 %v2567_v6  ;;  %v2601_v14 = vunpack.i.h.s16 %v2569_v7 }
 0x346   :  { %v4712_v28 = vpack.i.b16 %v2569_v7, %v2599_v33  ;;  %v4713_v45 = vpack.i.b16 %v2571_v58, %v2601_v14 }
 0x349   :  { %v2559_v20 = vld [vmem:[#allocation1] ss:$4 sm:$0xff]  ;;  %v2561_v60 = vld [vmem:[#allocation1 + $0x1] ss:$4 sm:$0xff]  ;;  %v2563_v3 = vld [vmem:[#allocation1 + $0x2] ss:$4 sm:$0xff] }
 0x34a   :  { %v2565_v42 = vld [vmem:[#allocation1 + $0x3] ss:$4 sm:$0xff]  ;;  %v2591_v30 = vunpack.i.h.s16 %v2559_v20  ;;  %v2593_v18 = vunpack.i.h.s16 %v2561_v60  ;;  %v2595_v36 = vunpack.i.h.s16 %v2563_v3  ;;  %v4707_v38 = vpack.i.b16 %v2559_v20, %v2589_v51 }
 0x34b   :  { %2619 = vst [vmem:[#allocation1] ss:$9 sm:$0xff] %v2531_v61  ;;  %v2597_v49 = vunpack.i.h.s16 %v2565_v42 }
 0x34c   :  { %2622 = vst [vmem:[#allocation1 + $0x1] ss:$9 sm:$0xff] %v2534_v62  ;;  %v4708_v12 = vpack.i.b16 %v2561_v60, %v2591_v30  ;;  %v4709_v46 = vpack.i.b16 %v2563_v3, %v2593_v18  ;;  %v4710_v62 = vpack.i.b16 %v2565_v42, %v2595_v36 }
 0x34d   :  { %2625 = vst [vmem:[#allocation1 + $0x2] ss:$9 sm:$0xff] %v2537_v27  ;;  %v4711_v27 = vpack.i.b16 %v2567_v6, %v2597_v49  ;;  %v4925_v6 = vld [vmem:[%s6469_s1 + $0x48] sm:$0xff] }
 0x34e   :  { %2628 = vst [vmem:[#allocation1 + $0x3] ss:$9 sm:$0xff] %v2540_v44  ;;  %2921 = vmatpush.bf16.msra.mxu3 %v4925_v6  ;;  %v6571_v6 = vld [vmem:[#allocation13_spill] sm:$0xff] }
 0x34f   :  { %2631 = vst [vmem:[#allocation1 + $0x4] ss:$9 sm:$0xff] %v2543_v40 }
 0x350   :  { %2634 = vst [vmem:[#allocation1 + $0x5] ss:$9 sm:$0xff] %v2546_v34 }
 0x351   :  { %2637 = vst [vmem:[#allocation1 + $0x6] ss:$9 sm:$0xff] %v2549_v41 }
 0x352   :  { %2640 = vst [vmem:[#allocation1 + $0x7] ss:$9 sm:$0xff] %v4706_v1 }
 0x359   :  { %v2641_v31 = vld [vmem:[#allocation1] sm:$0xff] }
 0x35a   :  { %4718 = vmatmul.msk.bf16.vlgmr.msra.gmra.mxu2 %vm263_vm4, %v2641_v31  ;;  %2643 = vst [vmem:[#allocation1] ss:$9 sm:$0xff] %v4707_v38 }
 0x35b   :  { %2645 = vst [vmem:[#allocation1 + $0x1] ss:$9 sm:$0xff] %v4708_v12 }
 0x35c   :  { %2647 = vst [vmem:[#allocation1 + $0x2] ss:$9 sm:$0xff] %v4709_v46 }
 0x35d   :  { %2649 = vst [vmem:[#allocation1 + $0x3] ss:$9 sm:$0xff] %v4710_v62 }
 0x35e   :  { %2651 = vst [vmem:[#allocation1 + $0x4] ss:$9 sm:$0xff] %v4711_v27 }
 0x35f   :  { %2653 = vst [vmem:[#allocation1 + $0x5] ss:$9 sm:$0xff] %v4712_v28 }
 0x360   :  { %2655 = vst [vmem:[#allocation1 + $0x6] ss:$9 sm:$0xff] %v4713_v45 }
 0x361   :  { %2776 = vst [vmem:[#allocation1 + $0x20] sm:$0xff] %v6562_v4  ;;  %v4926_v4 = vld [vmem:[%s6469_s1 + $0x50] sm:$0xff] }
 0x362   :  { %3065 = vmatpush.bf16.msrb.mxu0 %v4926_v4 }
 0x367   :  { %v2656_v44 = vld [vmem:[#allocation1] sm:$0xff] }
 0x368   :  { %2775 = vst [vmem:[#allocation1] sm:$0xff] %v6563_v9  ;;  %v2781_v40 = vld [vmem:[#allocation1 + $0x20] ss:$4 sm:$0xff]  ;;  %v2784_v61 = vld [vmem:[#allocation1 + $0x21] ss:$4 sm:$0xff] }
 0x369   :  { %v2787_v26 = vld [vmem:[#allocation1 + $0x22] ss:$4 sm:$0xff]  ;;  %v2790_v34 = vld [vmem:[#allocation1 + $0x23] ss:$4 sm:$0xff]  ;;  %v2822_v3 = vunpack.i.h.s16 %v2781_v40  ;;  %v2824_v42 = vunpack.i.h.s16 %v2784_v61 }
 0x36a   :  { %4719 = vmatmul.msk.bf16.gmra.mxu2 %vm263_vm4, %v2656_v44  ;;  %2801 = vst [vmem:[#allocation1 + $0x20] sm:$0xff] %v6564_v56  ;;  %v4927_v9 = vld [vmem:[%s6469_s1 + $0x58] sm:$0xff]  ;;  %v2826_v7 = vunpack.i.h.s16 %v2787_v26  ;;  %v2828_v33 = vunpack.i.h.s16 %v2790_v34  ;;  %s4529_s1 = sshll.u32 %s6472_s4, 4  ;;  %s4530_s1 = int_to_ptr.hbm [resolvable:$true] %s4529_s1 }
 0x36b   :  { %3209 = vmatpush.bf16.msrb.mxu1 %v4927_v9  ;;  %v4723_v31 = vpack.i.b16 %v2784_v61, %v2822_v3  ;;  %v4724_v14 = vpack.i.b16 %v2787_v26, %v2824_v42  ;;  %v6568_v26 = vld [vmem:[#allocation14_spill] sm:$0xff]  ;;  %v1688_v3 = vpop.f32.mrf.mxu2 }
 0x36c   :  { %v4725_v46 = vpack.i.b16 %v2790_v34, %v2826_v7  ;;  %v4737_v34 = vpack.i.b16 %v5178_v5, %v6568_v26  ;;  %v6575_v5 = vld [vmem:[#allocation35_spill] sm:$0xff]  ;;  %v6579_v9 = vld [vmem:[#allocation18_spill] sm:$0xff]  ;;  %v1702_v7 = vrot.slane %v1688_v3, 1 }
 0x36f   :  { %v2778_v41 = vld [vmem:[#allocation1 + $0x3] ss:$4 sm:$0xff] }
 0x370   :  { %2792 = vst [vmem:[#allocation1] sm:$0xff] %v6565_v10  ;;  %v2820_v10 = vunpack.i.h.s16 %v2778_v41  ;;  %v6569_v41 = vld [vmem:[#allocation9_spill] sm:$0xff] }
 0x371   :  { %v2802_v43 = vld [vmem:[#allocation1 + $0x23] ss:$4 sm:$0xff] }
 0x372   :  { %2805 = vst [vmem:[#allocation1 + $0x20] sm:$0xff] %v6566_v48  ;;  %v4722_v51 = vpack.i.b16 %v2781_v40, %v2820_v10  ;;  %v2835_v27 = vunpack.i.h.s16 %v2802_v43  ;;  %v6570_v43 = vld [vmem:[#allocation12_spill] sm:$0xff] }
 0x373   :  { %v1690_v42 = vpop.f32.mrf.mxu2 }
 0x377   :  { %v2793_v56 = vld [vmem:[#allocation1] ss:$4 sm:$0xff]  ;;  %v2796_v20 = vld [vmem:[#allocation1 + $0x1] ss:$4 sm:$0xff]  ;;  %v2799_v60 = vld [vmem:[#allocation1 + $0x2] ss:$4 sm:$0xff] }
 0x378   :  { %2804 = vst [vmem:[#allocation1] sm:$0xff] %v6567_v57  ;;  %v2830_v38 = vunpack.i.h.s16 %v2793_v56  ;;  %v2832_v12 = vunpack.i.h.s16 %v2796_v20  ;;  %v2834_v57 = vunpack.i.h.s16 %v2799_v60  ;;  %v4726_v62 = vpack.i.b16 %v2793_v56, %v2828_v33  ;;  %v6580_v56 = vld [vmem:[#allocation25_spill] sm:$0xff] }
 0x379   :  { %v2814_v48 = vld [vmem:[#allocation1 + $0x20] ss:$4 sm:$0xff]  ;;  %v2816_v36 = vld [vmem:[#allocation1 + $0x21] ss:$4 sm:$0xff]  ;;  %v2818_v49 = vld [vmem:[#allocation1 + $0x22] ss:$4 sm:$0xff] }
 0x37a   :  { %v4727_v28 = vpack.i.b16 %v2796_v20, %v2830_v38  ;;  %v4728_v45 = vpack.i.b16 %v2799_v60, %v2832_v12  ;;  %v2857_v44 = vpack.i.b16 %v2835_v27, %v2834_v57  ;;  %v6584_v60 = vld [vmem:[#allocation23_spill] sm:$0xff]  ;;  %v1706_v38 = vrot.slane %v1688_v3, 5 }
 0x37b   :  { %v1708_v12 = vrot.slane %v1688_v3, 7 }
 0x37f   :  { %v2806_v58 = vld [vmem:[#allocation1] ss:$4 sm:$0xff]  ;;  %v2808_v1 = vld [vmem:[#allocation1 + $0x1] ss:$4 sm:$0xff]  ;;  %v2810_v30 = vld [vmem:[#allocation1 + $0x2] ss:$4 sm:$0xff] }
 0x380   :  { %v2812_v18 = vld [vmem:[#allocation1 + $0x3] ss:$4 sm:$0xff] }
 0x381   :  { %2866 = vst [vmem:[#allocation1] ss:$9 sm:$0xff] %v4722_v51 }
 0x382   :  { %2869 = vst [vmem:[#allocation1 + $0x1] ss:$9 sm:$0xff] %v4723_v31  ;;  %v1707_v31 = vrot.slane %v1688_v3, 6 }
 0x383   :  { %2872 = vst [vmem:[#allocation1 + $0x2] ss:$9 sm:$0xff] %v4724_v14  ;;  %v1474_v14 = vadd.f32 %v5714_v8, %v5712_v29  ;;  %v1709_v29 = vrot.slane %v1690_v42, 1  ;;  %v1477_v8 = vadd.f32 %v5719_v47, %v5717_v13 }
 0x384   :  { %2875 = vst [vmem:[#allocation1 + $0x3] ss:$9 sm:$0xff] %v4725_v46  ;;  %v5799_v46 = vpop.f32.mrf.mxu2 }
 0x385   :  { %2878 = vst [vmem:[#allocation1 + $0x4] ss:$9 sm:$0xff] %v4726_v62  ;;  %v1494_v26 = vrot.slane %v1474_v14, 3  ;;  %v1500_v13 = vrot.slane %v1477_v8, 2  ;;  %v1501_v47 = vrot.slane %v1477_v8, 3 }
 0x386   :  { %2881 = vst [vmem:[#allocation1 + $0x5] ss:$9 sm:$0xff] %v4727_v28 }
 0x387   :  { %2884 = vst [vmem:[#allocation1 + $0x6] ss:$9 sm:$0xff] %v4728_v45 }
 0x388   :  { %2887 = vst [vmem:[#allocation1 + $0x7] ss:$9 sm:$0xff] %v2857_v44 }
 0x38f   :  { %v2888_v40 = vld [vmem:[#allocation1] sm:$0xff] }
 0x390   :  { %2890 = vst [vmem:[#allocation1] ss:$9 sm:$0xff] %v2806_v58  ;;  %4733 = vmatmul.msk.bf16.vlgmr.msra.gmra.mxu3 %vm263_vm4, %v2888_v40  ;;  %v1703_v58 = vrot.slane %v1688_v3, 2  ;;  %v1492_v40 = vrot.slane %v1474_v14, 1 }
 0x391   :  { %2892 = vst [vmem:[#allocation1 + $0x1] ss:$9 sm:$0xff] %v2808_v1 }
 0x392   :  { %2894 = vst [vmem:[#allocation1 + $0x2] ss:$9 sm:$0xff] %v2810_v30 }
 0x393   :  { %2896 = vst [vmem:[#allocation1 + $0x3] ss:$9 sm:$0xff] %v2812_v18 }
 0x394   :  { %2898 = vst [vmem:[#allocation1 + $0x4] ss:$9 sm:$0xff] %v2814_v48  ;;  %v5789_v48 = vpop.f32.mrf.mxu3 }
 0x395   :  { %2900 = vst [vmem:[#allocation1 + $0x5] ss:$9 sm:$0xff] %v2816_v36  ;;  %v1704_v36 = vrot.slane %v1688_v3, 3 }
 0x396   :  { %2902 = vst [vmem:[#allocation1 + $0x6] ss:$9 sm:$0xff] %v2818_v49  ;;  %v1705_v49 = vrot.slane %v1688_v3, 4 }
 0x39d   :  { %v2903_v61 = vld [vmem:[#allocation1] sm:$0xff] }
 0x39e   :  { %3023 = vst [vmem:[#allocation1] ss:$9 sm:$0xff] %v5053_v15  ;;  %v6572_v15 = vld [vmem:[#allocation32_spill] sm:$0xff] }
 0x39f   :  { %3025 = vst [vmem:[#allocation1 + $0x1] ss:$9 sm:$0xff] %v5061_v19  ;;  %v6573_v19 = vld [vmem:[#allocation33_spill] sm:$0xff] }
 0x3a0   :  { %4734 = vmatmul.msk.bf16.gmra.mxu3 %vm263_vm4, %v2903_v61  ;;  %3027 = vst [vmem:[#allocation1 + $0x2] ss:$9 sm:$0xff] %v6554_v32  ;;  %v1493_v61 = vrot.slane %v1474_v14, 2 }
 0x3a1   :  { %3029 = vst [vmem:[#allocation1 + $0x3] ss:$9 sm:$0xff] %v5065_v21  ;;  %v6574_v21 = vld [vmem:[#allocation34_spill] sm:$0xff] }
 0x3a2   :  { %3031 = vst [vmem:[#allocation1 + $0x4] ss:$9 sm:$0xff] %v6569_v41  ;;  %v1496_v41 = vrot.slane %v1474_v14, 5 }
 0x3a3   :  { %3033 = vst [vmem:[#allocation1 + $0x5] ss:$9 sm:$0xff] %v6570_v43  ;;  %v1497_v43 = vrot.slane %v1474_v14, 6 }
 0x3a4   :  { %3035 = vst [vmem:[#allocation1 + $0x6] ss:$9 sm:$0xff] %v6571_v6  ;;  %v1498_v6 = vrot.slane %v1474_v14, 7 }
 0x3a5   :  { %3038 = vst [vmem:[#allocation1 + $0x7] ss:$9 sm:$0xff] %v4737_v34  ;;  %v1495_v34 = vrot.slane %v1474_v14, 4 }
 0x3ac   :  { %v3039_v4 = vld [vmem:[#allocation1] sm:$0xff] }
 0x3ad   :  { %4742 = vmatmul.msk.bf16.vlgmr.msrb.gmra.mxu0 %vm263_vm4, %v3039_v4  ;;  %3040 = vst [vmem:[#allocation1] ss:$9 sm:$0xff] %v6559_v52  ;;  %v6576_v52 = vld [vmem:[#allocation11_spill] sm:$0xff]  ;;  %v1710_v4 = vrot.slane %v1690_v42, 2 }
 0x3ae   :  { %3041 = vst [vmem:[#allocation1 + $0x1] ss:$9 sm:$0xff] %v6560_v63  ;;  %v6577_v63 = vld [vmem:[#allocation15_spill] sm:$0xff] }
 0x3af   :  { %3042 = vst [vmem:[#allocation1 + $0x2] ss:$9 sm:$0xff] %v6561_v0  ;;  %v6578_v0 = vld [vmem:[#allocation17_spill] sm:$0xff] }
 0x3b0   :  { %3043 = vst [vmem:[#allocation1 + $0x3] ss:$9 sm:$0xff] %v6572_v15  ;;  %v1711_v15 = vrot.slane %v1690_v42, 3 }
 0x3b1   :  { %3044 = vst [vmem:[#allocation1 + $0x4] ss:$9 sm:$0xff] %v6573_v19  ;;  %v5813_v19 = vpop.f32.mrf.mxu3 }
 0x3b2   :  { %3045 = vst [vmem:[#allocation1 + $0x5] ss:$9 sm:$0xff] %v6574_v21  ;;  %v1712_v21 = vrot.slane %v1690_v42, 4 }
 0x3b3   :  { %3046 = vst [vmem:[#allocation1 + $0x6] ss:$9 sm:$0xff] %v6575_v5  ;;  %v1713_v5 = vrot.slane %v1690_v42, 5 }
 0x3ba   :  { %v3047_v32 = vld [vmem:[#allocation1] sm:$0xff] }
 0x3bb   :  { %3167 = vst [vmem:[#allocation1] ss:$9 sm:$0xff] %v5092_v35  ;;  %v6581_v35 = vld [vmem:[#allocation20_spill] sm:$0xff] }
 0x3bc   :  { %3169 = vst [vmem:[#allocation1 + $0x1] ss:$9 sm:$0xff] %v5101_v37  ;;  %v6582_v37 = vld [vmem:[#allocation21_spill] sm:$0xff] }
 0x3bd   :  { %4743 = vmatmul.msk.bf16.gmra.mxu0 %vm263_vm4, %v3047_v32  ;;  %3171 = vst [vmem:[#allocation1 + $0x2] ss:$9 sm:$0xff] %v5107_v39  ;;  %v6583_v39 = vld [vmem:[#allocation22_spill] sm:$0xff]  ;;  %v1714_v32 = vrot.slane %v1690_v42, 6 }
 0x3be   :  { %3173 = vst [vmem:[#allocation1 + $0x3] ss:$9 sm:$0xff] %v6576_v52  ;;  %v1715_v52 = vrot.slane %v1690_v42, 7 }
 0x3bf   :  { %3175 = vst [vmem:[#allocation1 + $0x4] ss:$9 sm:$0xff] %v6577_v63  ;;  %v5815_v63 = vadd.f32 %v1690_v42, %v1474_v14  ;;  %v5826_v42 = vadd.f32 %v1710_v4, %v1493_v61  ;;  %v1508_v61 = vrot.slane %v5726_v11, 3 }
 0x3c0   :  { %3177 = vst [vmem:[#allocation1 + $0x5] ss:$9 sm:$0xff] %v6578_v0  ;;  %v5817_v0 = vadd.f32 %v1709_v29, %v1492_v40  ;;  %v1506_v40 = vrot.slane %v5726_v11, 1  ;;  %v1507_v29 = vrot.slane %v5726_v11, 2 }
 0x3c1   :  { %3179 = vst [vmem:[#allocation1 + $0x6] ss:$9 sm:$0xff] %v6579_v9  ;;  %v1499_v9 = vrot.slane %v1477_v8, 1 }
 0x3c2   :  { %3182 = vst [vmem:[#allocation1 + $0x7] ss:$9 sm:$0xff] %v6580_v56  ;;  %v1502_v56 = vrot.slane %v1477_v8, 4 }
 0x3c9   :  { %v3183_v20 = vld [vmem:[#allocation1] sm:$0xff] }
 0x3ca   :  { %4750 = vmatmul.msk.bf16.vlgmr.msrb.gmra.mxu1 %vm263_vm4, %v3183_v20  ;;  %3184 = vst [vmem:[#allocation1] ss:$9 sm:$0xff] %v5196_v16  ;;  %v1472_v16 = vadd.f32 %v5710_v53, %v5708_v59  ;;  %v1503_v20 = vrot.slane %v1477_v8, 5 }
 0x3cb   :  { %3185 = vst [vmem:[#allocation1 + $0x1] ss:$9 sm:$0xff] %v5198_v17 }
 0x3cc   :  { %3186 = vst [vmem:[#allocation1 + $0x2] ss:$9 sm:$0xff] %v5202_v22  ;;  %v1485_v17 = vrot.slane %v1472_v16, 1  ;;  %v1486_v22 = vrot.slane %v1472_v16, 2  ;;  %v1487_v1 = vrot.slane %v1472_v16, 3  ;;  %v1488_v30 = vrot.slane %v1472_v16, 4 }
 0x3cd   :  { %3187 = vst [vmem:[#allocation1 + $0x3] ss:$9 sm:$0xff] %v6581_v35  ;;  %v1489_v51 = vrot.slane %v1472_v16, 5  ;;  %v1490_v18 = vrot.slane %v1472_v16, 6  ;;  %v1491_v33 = vrot.slane %v1472_v16, 7  ;;  %v5793_v59 = vadd.f32 %v1688_v3, %v1472_v16  ;;  %v5824_v3 = vpop.f32.mrf.mxu0 }
 0x3ce   :  { %3188 = vst [vmem:[#allocation1 + $0x4] ss:$9 sm:$0xff] %v6582_v37  ;;  %v5795_v53 = vadd.f32 %v1702_v7, %v1485_v17  ;;  %v5797_v57 = vadd.f32 %v1703_v58, %v1486_v22  ;;  %v5801_v62 = vadd.f32 %v1704_v36, %v1487_v1  ;;  %v5803_v27 = vadd.f32 %v1705_v49, %v1488_v30 }
 0x3cf   :  { %3189 = vst [vmem:[#allocation1 + $0x5] ss:$9 sm:$0xff] %v6583_v39  ;;  %v5805_v28 = vadd.f32 %v1706_v38, %v1489_v51  ;;  %v5807_v45 = vadd.f32 %v1707_v31, %v1490_v18  ;;  %v5809_v44 = vadd.f32 %v1708_v12, %v1491_v33  ;;  %v1716_v35 = vrot.slane %v5799_v46, 1  ;;  %v1695_v51 = vpop.f32.mrf.mxu2 }
 0x3d0   :  { %3190 = vst [vmem:[#allocation1 + $0x6] ss:$9 sm:$0xff] %v6584_v60  ;;  %v1717_v37 = vrot.slane %v5799_v46, 2  ;;  %v1718_v39 = vrot.slane %v5799_v46, 3  ;;  %v1719_v60 = vrot.slane %v5799_v46, 4  ;;  %v5828_v16 = vadd.f32 %v1711_v15, %v1494_v26 }
 0x3d1   :  { %v5830_v17 = vadd.f32 %v1712_v21, %v1495_v34  ;;  %v5832_v22 = vadd.f32 %v1713_v5, %v1496_v41  ;;  %v5834_v7 = vadd.f32 %v1714_v32, %v1497_v43  ;;  %v5836_v58 = vadd.f32 %v1715_v52, %v1498_v6  ;;  %v5857_v43 = vpop.f32.mrf.mxu3 }
 0x3d2   :  { %v1504_v1 = vrot.slane %v1477_v8, 6  ;;  %v1505_v30 = vrot.slane %v1477_v8, 7  ;;  %v1721_v18 = vrot.slane %v5799_v46, 6  ;;  %v1722_v36 = vrot.slane %v5799_v46, 7 }
 0x3d3   :  { %v5841_v49 = vadd.f32 %v5799_v46, %v1477_v8  ;;  %v5843_v38 = vadd.f32 %v1716_v35, %v1499_v9  ;;  %v5845_v31 = vadd.f32 %v1717_v37, %v1500_v13  ;;  %v5847_v33 = vadd.f32 %v1718_v39, %v1501_v47 }
 0x3d4   :  { %v5849_v12 = vadd.f32 %v1719_v60, %v1502_v56  ;;  %v1723_v26 = vrot.slane %v1695_v51, 1  ;;  %v1724_v8 = vrot.slane %v1695_v51, 2  ;;  %v1725_v34 = vrot.slane %v1695_v51, 3 }
 0x3d5   :  { %v1726_v41 = vrot.slane %v1695_v51, 4  ;;  %v1510_v6 = vrot.slane %v5726_v11, 5  ;;  %v1727_v4 = vrot.slane %v1695_v51, 5  ;;  %v1949_v15 = vrot.slane %v5789_v48, 1 }
 0x3d6   :  { %v1950_v21 = vrot.slane %v5789_v48, 2  ;;  %v1776_v5 = vadd.f32 %v1721_v18, %v1504_v1  ;;  %v1777_v32 = vadd.f32 %v1722_v36, %v1505_v30  ;;  %v1778_v52 = vadd.f32 %v1695_v51, %v5726_v11 }
 0x3d7   :  { %v3191_v10 = vld [vmem:[#allocation1] sm:$0xff]  ;;  %v1951_v9 = vrot.slane %v5789_v48, 3  ;;  %v1779_v13 = vadd.f32 %v1723_v26, %v1506_v40  ;;  %v1952_v47 = vrot.slane %v5789_v48, 4  ;;  %v1953_v56 = vrot.slane %v5789_v48, 5 }
 0x3d8   :  { %v1780_v35 = vadd.f32 %v1724_v8, %v1507_v29  ;;  %v1781_v37 = vadd.f32 %v1725_v34, %v1508_v61  ;;  %v1955_v60 = vrot.slane %v5789_v48, 7  ;;  %v1783_v1 = vadd.f32 %v1727_v4, %v1510_v6  ;;  %v5886_v8 = vpop.f32.mrf.mxu1 }
 0x3d9   :  { %v2002_v30 = vadd.f32 %v1949_v15, %v5795_v53  ;;  %v2003_v51 = vadd.f32 %v1950_v21, %v5797_v57  ;;  %v2004_v18 = vadd.f32 %v1951_v9, %v5801_v62  ;;  %v1956_v36 = vrot.slane %v5813_v19, 1  ;;  %v1942_v15 = vpop.f32.mrf.mxu3 }
 0x3da   :  { %4751 = vmatmul.msk.bf16.gmra.mxu1 %vm263_vm4, %v3191_v10  ;;  %v1720_v10 = vrot.slane %v5799_v46, 5  ;;  %v1509_v46 = vrot.slane %v5726_v11, 4  ;;  %v2001_v11 = vadd.f32 %v5789_v48, %v5793_v59  ;;  %v1957_v40 = vrot.slane %v5813_v19, 2 }
 0x3db   :  { %v1958_v29 = vrot.slane %v5813_v19, 3  ;;  %v2005_v61 = vadd.f32 %v1952_v47, %v5803_v27  ;;  %v2006_v26 = vadd.f32 %v1953_v56, %v5805_v28  ;;  %v2008_v59 = vadd.f32 %v1955_v60, %v5809_v44 }
 0x3dc   :  { %v5851_v14 = vadd.f32 %v1720_v10, %v1503_v20  ;;  %v1954_v20 = vrot.slane %v5789_v48, 6  ;;  %v1782_v39 = vadd.f32 %v1726_v41, %v1509_v46  ;;  %v5868_v10 = vpop.f32.mrf.mxu0  ;;  %v1959_v48 = vrot.slane %v5813_v19, 4 }
 0x3dd   :  { %v1960_v53 = vrot.slane %v5813_v19, 5  ;;  %v1961_v57 = vrot.slane %v5813_v19, 6  ;;  %v1962_v62 = vrot.slane %v5813_v19, 7  ;;  %v2009_v34 = vadd.f32 %v5813_v19, %v5815_v63 }
 0x3de   :  { %v2007_v46 = vadd.f32 %v1954_v20, %v5807_v45  ;;  %v1963_v27 = vrot.slane %v5857_v43, 1  ;;  %v1964_v28 = vrot.slane %v5857_v43, 2  ;;  %v1965_v45 = vrot.slane %v5857_v43, 3 }
 0x3df   :  { %v2010_v41 = vadd.f32 %v1956_v36, %v5817_v0  ;;  %v2011_v44 = vadd.f32 %v1957_v40, %v5826_v42  ;;  %v2012_v6 = vadd.f32 %v1958_v29, %v5828_v16  ;;  %v1966_v4 = vrot.slane %v5857_v43, 4 }
 0x3e0   :  { %v2013_v21 = vadd.f32 %v1959_v48, %v5830_v17  ;;  %v1967_v9 = vrot.slane %v5857_v43, 5  ;;  %v1968_v19 = vrot.slane %v5857_v43, 6  ;;  %v1969_v63 = vrot.slane %v5857_v43, 7 }
 0x3e1   :  { %v2014_v47 = vadd.f32 %v1960_v53, %v5832_v22  ;;  %v2015_v56 = vadd.f32 %v1961_v57, %v5834_v7  ;;  %v2016_v0 = vadd.f32 %v1962_v62, %v5836_v58  ;;  %v2017_v42 = vadd.f32 %v5857_v43, %v5841_v49 }
 0x3e2   :  { %v2018_v16 = vadd.f32 %v1963_v27, %v5843_v38  ;;  %v5908_v20 = vadd.f32 %v1964_v28, %v5845_v31  ;;  %v5911_v17 = vadd.f32 %v1965_v45, %v5847_v33  ;;  %v1970_v60 = vrot.slane %v1942_v15, 1 }
 0x3e3   :  { %v2021_v36 = vadd.f32 %v1966_v4, %v5849_v12  ;;  %v1971_v40 = vrot.slane %v1942_v15, 2  ;;  %v1972_v22 = vrot.slane %v1942_v15, 3  ;;  %v1973_v29 = vrot.slane %v1942_v15, 4 }
 0x3e4   :  { %v5914_v7 = vpop.f32.mrf.mxu0  ;;  %v2022_v58 = vadd.f32 %v1967_v9, %v5851_v14  ;;  %v2023_v48 = vadd.f32 %v1968_v19, %v1776_v5  ;;  %v2024_v49 = vadd.f32 %v1969_v63, %v1777_v32  ;;  %v1974_v43 = vrot.slane %v1942_v15, 5  ;;  %v5924_v32 = vpop.f32.mrf.mxu1 }
 0x3e5   :  { %v2025_v38 = vadd.f32 %v1942_v15, %v1778_v52  ;;  %v2196_v31 = vrot.slane %v5824_v3, 1  ;;  %v2197_v53 = vrot.slane %v5824_v3, 2  ;;  %v2198_v33 = vrot.slane %v5824_v3, 3 }
 0x3e6   :  { %v2026_v57 = vadd.f32 %v1970_v60, %v1779_v13  ;;  %v2199_v12 = vrot.slane %v5824_v3, 4  ;;  %v2200_v62 = vrot.slane %v5824_v3, 5  ;;  %v2201_v27 = vrot.slane %v5824_v3, 6 }
 0x3e7   :  { %v2027_v28 = vadd.f32 %v1971_v40, %v1780_v35  ;;  %v2028_v45 = vadd.f32 %v1972_v22, %v1781_v37  ;;  %v2029_v14 = vadd.f32 %v1973_v29, %v1782_v39  ;;  %v2202_v5 = vrot.slane %v5824_v3, 7 }
 0x3e8   :  { %v2030_v52 = vadd.f32 %v1974_v43, %v1783_v1  ;;  %v2248_v4 = vadd.f32 %v5824_v3, %v2001_v11  ;;  %v2203_v15 = vrot.slane %v5868_v10, 1  ;;  %v2204_v13 = vrot.slane %v5868_v10, 2 }
 0x3e9   :  { %v2249_v9 = vadd.f32 %v2196_v31, %v2002_v30  ;;  %v2250_v19 = vadd.f32 %v2197_v53, %v2003_v51  ;;  %v2251_v63 = vadd.f32 %v2198_v33, %v2004_v18  ;;  %v2205_v60 = vrot.slane %v5868_v10, 3 }
 0x3ea   :  { %v2252_v23 = vadd.f32 %v2199_v12, %v2005_v61  ;;  %v5930_v35 = vadd.f32 %v2200_v62, %v2006_v26  ;;  %v5932_v37 = vadd.f32 %v2201_v27, %v2007_v46  ;;  %v2206_v39 = vrot.slane %v5868_v10, 4  ;;  %v5940_v61 = vpop.f32.mrf.mxu2 }
 0x3eb   :  { %v2255_v40 = vadd.f32 %v2202_v5, %v2008_v59  ;;  %v2207_v1 = vrot.slane %v5868_v10, 5  ;;  %v2208_v3 = vrot.slane %v5868_v10, 6  ;;  %v2209_v11 = vrot.slane %v5868_v10, 7 }
 0x3ec   :  { %v2256_v30 = vadd.f32 %v5868_v10, %v2009_v34  ;;  %v2257_v51 = vadd.f32 %v2203_v15, %v2010_v41  ;;  %v2258_v18 = vadd.f32 %v2204_v13, %v2011_v44  ;;  %v2210_v22 = vrot.slane %v5914_v7, 1  ;;  %v2189_v43 = vpop.f32.mrf.mxu0 }
 0x3ed   :  { %v2259_v26 = vadd.f32 %v2205_v60, %v2012_v6  ;;  %v2211_v46 = vrot.slane %v5914_v7, 2  ;;  %v2212_v29 = vrot.slane %v5914_v7, 3  ;;  %v2213_v59 = vrot.slane %v5914_v7, 4 }
 0x3ee   :  { %v2260_v31 = vadd.f32 %v2206_v39, %v2013_v21  ;;  %v2214_v53 = vrot.slane %v5914_v7, 5  ;;  %v2215_v33 = vrot.slane %v5914_v7, 6  ;;  %v2216_v10 = vrot.slane %v5914_v7, 7  ;;  %v5951_v39 = vpop.f32.mrf.mxu1 }
 0x3ef   :  { %v2261_v34 = vadd.f32 %v2207_v1, %v2014_v47  ;;  %v2262_v41 = vadd.f32 %v2208_v3, %v2015_v56  ;;  %v2263_v44 = vadd.f32 %v2209_v11, %v2016_v0  ;;  %v2264_v12 = vadd.f32 %v5914_v7, %v2017_v42 }
 0x3f0   :  { %v2265_v6 = vadd.f32 %v2210_v22, %v2018_v16  ;;  %v2217_v62 = vrot.slane %v2189_v43, 1  ;;  %v2218_v27 = vrot.slane %v2189_v43, 2  ;;  %v2219_v5 = vrot.slane %v2189_v43, 3 }
 0x3f1   :  { %v2266_v15 = vadd.f32 %v2211_v46, %v5908_v20  ;;  %v2267_v13 = vadd.f32 %v2212_v29, %v5911_v17  ;;  %v2268_v21 = vadd.f32 %v2213_v59, %v2021_v36  ;;  %v2220_v60 = vrot.slane %v2189_v43, 4 }
 0x3f2   :  { %v2269_v24 = vadd.f32 %v2214_v53, %v2022_v58  ;;  %v2270_v50 = vadd.f32 %v2215_v33, %v2023_v48  ;;  %v2271_v54 = vadd.f32 %v2216_v10, %v2024_v49  ;;  %v2221_v47 = vrot.slane %v2189_v43, 5  ;;  %v5965_v46 = vpop.f32.mrf.mxu2 }
 0x3f3   :  { %v5953_v56 = vadd.f32 %v2189_v43, %v2025_v38  ;;  %v2443_v0 = vrot.slane %v5886_v8, 1  ;;  %v2444_v42 = vrot.slane %v5886_v8, 2  ;;  %v2445_v16 = vrot.slane %v5886_v8, 3 }
 0x3f4   :  { %v2273_v7 = vadd.f32 %v2217_v62, %v2026_v57  ;;  %v2274_v20 = vadd.f32 %v2218_v27, %v2027_v28  ;;  %v2275_v1 = vadd.f32 %v2219_v5, %v2028_v45  ;;  %v2446_v17 = vrot.slane %v5886_v8, 4 }
 0x3f5   :  { %v2276_v36 = vadd.f32 %v2220_v60, %v2029_v14  ;;  %v2447_v3 = vrot.slane %v5886_v8, 5  ;;  %v2448_v58 = vrot.slane %v5886_v8, 6  ;;  %v2449_v48 = vrot.slane %v5886_v8, 7 }
 0x3f6   :  { %v2277_v49 = vadd.f32 %v2221_v47, %v2030_v52  ;;  %v2495_v38 = vadd.f32 %v5886_v8, %v2248_v4  ;;  %v2450_v11 = vrot.slane %v5924_v32, 1  ;;  %v2451_v22 = vrot.slane %v5924_v32, 2 }
 0x3f7   :  { %v2496_v57 = vadd.f32 %v2443_v0, %v2249_v9  ;;  %v2497_v28 = vadd.f32 %v2444_v42, %v2250_v19  ;;  %v2498_v45 = vadd.f32 %v2445_v16, %v2251_v63  ;;  %v2452_v14 = vrot.slane %v5924_v32, 3 }
 0x3f8   :  { %v2499_v29 = vadd.f32 %v2446_v17, %v2252_v23  ;;  %v2453_v59 = vrot.slane %v5924_v32, 4  ;;  %v2454_v43 = vrot.slane %v5924_v32, 5  ;;  %v2455_v52 = vrot.slane %v5924_v32, 6 }
 0x3f9   :  { %v2500_v8 = vadd.f32 %v2447_v3, %v5930_v35  ;;  %v2501_v4 = vadd.f32 %v2448_v58, %v5932_v37  ;;  %v2502_v53 = vadd.f32 %v2449_v48, %v2255_v40  ;;  %v2456_v33 = vrot.slane %v5924_v32, 7  ;;  %v2436_v40 = vpop.f32.mrf.mxu1 }
 0x3fa   :  { %v5975_v9 = vadd.f32 %v5924_v32, %v2256_v30  ;;  %v5977_v19 = vadd.f32 %v2450_v11, %v2257_v51  ;;  %v5979_v63 = vadd.f32 %v2451_v22, %v2258_v18  ;;  %v2457_v23 = vrot.slane %v5951_v39, 1  ;;  %v2681_v11 = vpop.f32.mrf.mxu2 }
 0x3fb   :  { %v5982_v10 = vadd.f32 %v2452_v14, %v2259_v26  ;;  %v2458_v62 = vrot.slane %v5951_v39, 2  ;;  %v2459_v35 = vrot.slane %v5951_v39, 3  ;;  %v2460_v37 = vrot.slane %v5951_v39, 4 }
 0x3fc   :  { %v2507_v27 = vadd.f32 %v2453_v59, %v2260_v31  ;;  %v2508_v5 = vadd.f32 %v2454_v43, %v2261_v34  ;;  %v2509_v60 = vadd.f32 %v2455_v52, %v2262_v41  ;;  %v2461_v32 = vrot.slane %v5951_v39, 5 }
 0x3fd   :  { %v2510_v30 = vadd.f32 %v2456_v33, %v2263_v44  ;;  %v2462_v51 = vrot.slane %v5951_v39, 6  ;;  %v2463_v18 = vrot.slane %v5951_v39, 7  ;;  %v2511_v26 = vadd.f32 %v5951_v39, %v2264_v12 }
 0x3fe   :  { %v2512_v47 = vadd.f32 %v2457_v23, %v2265_v6  ;;  %v2464_v0 = vrot.slane %v2436_v40, 1  ;;  %v2465_v42 = vrot.slane %v2436_v40, 2  ;;  %v2466_v16 = vrot.slane %v2436_v40, 3 }
 0x3ff   :  { %v2513_v17 = vadd.f32 %v2458_v62, %v2266_v15  ;;  %v2514_v3 = vadd.f32 %v2459_v35, %v2267_v13  ;;  %v2515_v58 = vadd.f32 %v2460_v37, %v2268_v21  ;;  %v2467_v48 = vrot.slane %v2436_v40, 4 }
 0x400   :  { %v2516_v31 = vadd.f32 %v2461_v32, %v2269_v24  ;;  %v2468_v34 = vrot.slane %v2436_v40, 5  ;;  %v2690_v41 = vrot.slane %v5940_v61, 1  ;;  %v2691_v44 = vrot.slane %v5940_v61, 2 }
 0x401   :  { %v2517_v22 = vadd.f32 %v2462_v51, %v2270_v50  ;;  %v2518_v14 = vadd.f32 %v2463_v18, %v2271_v54  ;;  %v2692_v59 = vrot.slane %v5940_v61, 3  ;;  %v2693_v12 = vrot.slane %v5940_v61, 4 }
 0x402   :  { %v2519_v6 = vadd.f32 %v2436_v40, %v5953_v56  ;;  %v5996_v39 = vadd.f32 %v2464_v0, %v2273_v7  ;;  %v5998_v15 = vadd.f32 %v2465_v42, %v2274_v20  ;;  %v6000_v13 = vadd.f32 %v2466_v16, %v2275_v1 }
 0x403   :  { %v6002_v24 = vadd.f32 %v2467_v48, %v2276_v36  ;;  %v2694_v21 = vrot.slane %v5940_v61, 5  ;;  %v2695_v43 = vrot.slane %v5940_v61, 6  ;;  %v2696_v50 = vrot.slane %v5940_v61, 7 }
 0x404   :  { %v6007_v54 = vadd.f32 %v2468_v34, %v2277_v49  ;;  %v2742_v52 = vadd.f32 %v5940_v61, %v2495_v38  ;;  %v2743_v33 = vadd.f32 %v2690_v41, %v2496_v57  ;;  %v2744_v56 = vadd.f32 %v2691_v44, %v2497_v28 }
 0x405   :  { %v2745_v7 = vadd.f32 %v2692_v59, %v2498_v45  ;;  %v2746_v23 = vadd.f32 %v2693_v12, %v2499_v29  ;;  %v2697_v20 = vrot.slane %v5965_v46, 1  ;;  %v2698_v1 = vrot.slane %v5965_v46, 2 }
 0x406   :  { %v2699_v36 = vrot.slane %v5965_v46, 3  ;;  %v2700_v62 = vrot.slane %v5965_v46, 4  ;;  %v2701_v35 = vrot.slane %v5965_v46, 5  ;;  %v2702_v37 = vrot.slane %v5965_v46, 6 }
 0x407   :  { %v2747_v40 = vadd.f32 %v2694_v21, %v2500_v8  ;;  %v2748_v32 = vadd.f32 %v2695_v43, %v2501_v4  ;;  %v2749_v61 = vadd.f32 %v2696_v50, %v2502_v53  ;;  %v2703_v38 = vrot.slane %v5965_v46, 7  ;;  %v6026_v53 = vpop.f32.mrf.mxu2 }
 0x408   :  { %v2704_v57 = vrot.slane %v2681_v11, 1  ;;  %v2705_v28 = vrot.slane %v2681_v11, 2  ;;  %v2706_v45 = vrot.slane %v2681_v11, 3  ;;  %v2707_v29 = vrot.slane %v2681_v11, 4 }
 0x409   :  { %v2750_v51 = vadd.f32 %v5965_v46, %v5975_v9  ;;  %v2751_v18 = vadd.f32 %v2697_v20, %v5977_v19  ;;  %v2752_v0 = vadd.f32 %v2698_v1, %v5979_v63  ;;  %v2708_v42 = vrot.slane %v2681_v11, 5 }
 0x40a   :  { %v2753_v16 = vadd.f32 %v2699_v36, %v5982_v10  ;;  %v2754_v48 = vadd.f32 %v2700_v62, %v2507_v27  ;;  %v6022_v8 = vadd.f32 %v2701_v35, %v2508_v5  ;;  %v6024_v4 = vadd.f32 %v2702_v37, %v2509_v60 }
 0x40b   :  { %v6028_v34 = vadd.f32 %v2703_v38, %v2510_v30  ;;  %v2709_v41 = vrot.slane %v2681_v11, 6  ;;  %v2710_v44 = vrot.slane %v2681_v11, 7  ;;  %v6030_v59 = vadd.f32 %v2681_v11, %v2511_v26 }
 0x40c   :  { %v6032_v46 = vadd.f32 %v2704_v57, %v2512_v47  ;;  %v6034_v9 = vadd.f32 %v2705_v28, %v2513_v17  ;;  %v6036_v19 = vadd.f32 %v2706_v45, %v2514_v3  ;;  %v6038_v63 = vadd.f32 %v2707_v29, %v2515_v58 }
 0x40d   :  { %v6040_v10 = vadd.f32 %v2708_v42, %v2516_v31  ;;  %v2711_v27 = vrot.slane %v6026_v53, 1  ;;  %v6043_v11 = vadd.f32 %v2709_v41, %v2517_v22  ;;  %v6045_v47 = vadd.f32 %v2710_v44, %v2518_v14 }
 0x40e   :  { %v6052_v50 = vadd.f32 %v6026_v53, %v2519_v6 }
 0x40f   :  { %v6057_v36 = vadd.f32 %v2711_v27, %v5996_v39 }
 0x413   :  { %v2923_v49 = vpop.f32.mrf.mxu3 }
 0x414   :  { %v2937_v5 = vrot.slane %v2923_v49, 1  ;;  %v2938_v60 = vrot.slane %v2923_v49, 2  ;;  %v2939_v30 = vrot.slane %v2923_v49, 3  ;;  %v2940_v12 = vrot.slane %v2923_v49, 4 }
 0x415   :  { %v2941_v21 = vrot.slane %v2923_v49, 5  ;;  %v2942_v43 = vrot.slane %v2923_v49, 6  ;;  %v2943_v20 = vrot.slane %v2923_v49, 7  ;;  %v2989_v22 = vadd.f32 %v2923_v49, %v2742_v52 }
 0x416   :  { %v2990_v14 = vadd.f32 %v2937_v5, %v2743_v33  ;;  %v2991_v62 = vadd.f32 %v2938_v60, %v2744_v56  ;;  %v2992_v35 = vadd.f32 %v2939_v30, %v2745_v7  ;;  %v2993_v37 = vadd.f32 %v2940_v12, %v2746_v23 }
 0x417   :  { %v2994_v38 = vadd.f32 %v2941_v21, %v2747_v40  ;;  %v2995_v57 = vadd.f32 %v2942_v43, %v2748_v32  ;;  %v2996_v42 = vadd.f32 %v2943_v20, %v2749_v61  ;;  %v6072_v32 = vld [vmem:[%s6471_s3 + $0x1] ss:$0 sm:$0xff] }
 0x418   :  { %v6085_v17 = vrot.slane %v6072_v32, 2 }
 0x41b   :  { %v6054_v1 = vpop.f32.mrf.mxu3 }
 0x41c   :  { %v2944_v28 = vrot.slane %v6054_v1, 1  ;;  %v2945_v45 = vrot.slane %v6054_v1, 2  ;;  %v2946_v6 = vrot.slane %v6054_v1, 3  ;;  %v2947_v29 = vrot.slane %v6054_v1, 4 }
 0x41d   :  { %v2948_v7 = vrot.slane %v6054_v1, 5  ;;  %v6067_v40 = vadd.f32 %v6054_v1, %v2750_v51 }
 0x41e   :  { %v6074_v61 = vadd.f32 %v2944_v28, %v2751_v18  ;;  %v6076_v5 = vadd.f32 %v2945_v45, %v2752_v0  ;;  %v6078_v60 = vadd.f32 %v2946_v6, %v2753_v16  ;;  %v6080_v30 = vadd.f32 %v2947_v29, %v2754_v48 }
 0x41f   :  { %v6088_v18 = vrot.slane %v6072_v32, 3  ;;  %v6091_v0 = vrot.slane %v6072_v32, 4  ;;  %v6094_v16 = vrot.slane %v6072_v32, 5 }
 0x42a   :  { %v3067_v26 = vpop.f32.mrf.mxu0 }
 0x42b   :  { %v3081_v41 = vrot.slane %v3067_v26, 1  ;;  %v3082_v44 = vrot.slane %v3067_v26, 2  ;;  %v3083_v39 = vrot.slane %v3067_v26, 3  ;;  %v3084_v27 = vrot.slane %v3067_v26, 4 }
 0x42c   :  { %v3085_v52 = vrot.slane %v3067_v26, 5  ;;  %v3086_v33 = vrot.slane %v3067_v26, 6  ;;  %v3087_v56 = vrot.slane %v3067_v26, 7  ;;  %v3133_v12 = vadd.f32 %v3067_v26, %v2989_v22 }
 0x42d   :  { %v3134_v21 = vadd.f32 %v3081_v41, %v2990_v14  ;;  %v3135_v43 = vadd.f32 %v3082_v44, %v2991_v62  ;;  %v3136_v20 = vadd.f32 %v3083_v39, %v2992_v35  ;;  %v3137_v51 = vadd.f32 %v3084_v27, %v2993_v37  ;;  %v4931_v35 = vld [vmem:[%s6470_s2 + $0x38] sm:$0xff]  ;;  %v4930_v41 = vld [vmem:[%s6470_s2 + $0x30] sm:$0xff] }
 0x42e   :  { %v3138_v58 = vadd.f32 %v3085_v52, %v2994_v38  ;;  %v3139_v3 = vadd.f32 %v3086_v33, %v2995_v57  ;;  %v3140_v49 = vadd.f32 %v3087_v56, %v2996_v42  ;;  %v6098_v22 = vrot.slane %v6072_v32, 6  ;;  %3586 = vmatpush.bf16.msrb.mxu2 %v4931_v35 }
 0x42f   :  { %v6102_v62 = vrot.slane %v6072_v32, 1 }
 0x432   :  { %v6082_v31 = vpop.f32.mrf.mxu0  ;;  %3587 = vmatpush.bf16.msrb.mxu2 %v4930_v41 }
 0x433   :  { %v3088_v48 = vrot.slane %v6082_v31, 1  ;;  %v3089_v2 = vrot.slane %v6082_v31, 2 }
 0x447   :  { %v3211_v26 = vpop.f32.mrf.mxu1 }
 0x448   :  { %v3225_v37 = vrot.slane %v3211_v26, 1  ;;  %v3226_v38 = vrot.slane %v3211_v26, 2  ;;  %v3227_v57 = vrot.slane %v3211_v26, 3  ;;  %v3228_v28 = vrot.slane %v3211_v26, 4 }
 0x449   :  { %v3229_v45 = vrot.slane %v3211_v26, 5  ;;  %v3230_v6 = vrot.slane %v3211_v26, 6  ;;  %v3231_v29 = vrot.slane %v3211_v26, 7  ;;  %v3277_v42 = vadd.f32 %v3211_v26, %v3133_v12 }
 0x44a   :  { %v3278_v44 = vadd.f32 %v3225_v37, %v3134_v21  ;;  %v3279_v39 = vadd.f32 %v3226_v38, %v3135_v43  ;;  %v3280_v27 = vadd.f32 %v3227_v57, %v3136_v20  ;;  %v3281_v52 = vadd.f32 %v3228_v28, %v3137_v51 }
 0x44b   :  { %v3282_v33 = vadd.f32 %v3229_v45, %v3138_v58  ;;  %v3283_v56 = vadd.f32 %v3230_v6, %v3139_v3  ;;  %v3284_v23 = vadd.f32 %v3231_v29, %v3140_v49  ;;  %v3323_v14 = vadd.f32 %v6072_v32, %v3277_v42 }
 0x44c   :  { %v3325_v55 = vadd.f32 %v6085_v17, %v3279_v39  ;;  %v3326_v12 = vadd.f32 %v6088_v18, %v3280_v27  ;;  %v3327_v26 = vadd.f32 %v6091_v0, %v3281_v52  ;;  %v6585_v43 = vrot.slane %v6072_v32, 7 }
 0x44d   :  { %v3328_v35 = vadd.f32 %v6094_v16, %v3282_v33  ;;  %v3329_v21 = vadd.f32 %v6098_v22, %v3283_v56  ;;  %v3353_v58 = vmax.f32 %v3323_v14, 0.0  ;;  %v3324_v37 = vadd.f32 %v6102_v62, %v3278_v44  ;;  %v6131_v44 = vpop.f32.mrf.mxu3 }
 0x44e   :  { %v3330_v20 = vadd.f32 %v6585_v43, %v3284_v23  ;;  %v3355_v3 = vmax.f32 %v3325_v55, 0.0  ;;  %v3356_v49 = vmax.f32 %v3326_v12, 0.0  ;;  %v3357_v51 = vmax.f32 %v3327_v26, 0.0 }
 0x44f   :  { %v3002_v38 = vadd.f32 %v2948_v7, %v6022_v8  ;;  %v3090_v57 = vrot.slane %v6082_v31, 3  ;;  %v3091_v28 = vrot.slane %v6082_v31, 4  ;;  %v3358_v45 = vmax.f32 %v3328_v35, 0.0  ;;  %3413 = vst [vmem:[#allocation1] ss:$9 sm:$0xff] %v3353_v58  ;;  %v6123_v6 = vpop.f32.mrf.mxu1 }
 0x450   :  { %v3092_v29 = vrot.slane %v6082_v31, 5  ;;  %v3359_v23 = vmax.f32 %v3329_v21, 0.0  ;;  %3417 = vst [vmem:[#allocation1 + $0x2] ss:$9 sm:$0xff] %v3355_v3  ;;  %v3232_v55 = vrot.slane %v6123_v6, 1  ;;  %v3233_v14 = vrot.slane %v6123_v6, 2 }
 0x451   :  { %v3093_v42 = vrot.slane %v6082_v31, 6  ;;  %v3142_v8 = vadd.f32 %v3088_v48, %v6074_v61  ;;  %v3360_v7 = vmax.f32 %v3330_v20, 0.0  ;;  %3419 = vst [vmem:[#allocation1 + $0x3] ss:$9 sm:$0xff] %v3356_v49  ;;  %v3234_v41 = vrot.slane %v6123_v6, 3 }
 0x452   :  { %v3141_v39 = vadd.f32 %v6082_v31, %v6067_v40  ;;  %v3143_v27 = vadd.f32 %v3089_v2, %v6076_v5  ;;  %3421 = vst [vmem:[#allocation1 + $0x4] ss:$9 sm:$0xff] %v3357_v51  ;;  %v3235_v52 = vrot.slane %v6123_v6, 4  ;;  %v3354_v33 = vmax.f32 %v3324_v37, 0.0 }
 0x453   :  { %v6586_v56 = vrot.slane %v6054_v1, 6  ;;  %v3144_v61 = vadd.f32 %v3090_v57, %v6078_v60  ;;  %3423 = vst [vmem:[#allocation1 + $0x5] ss:$9 sm:$0xff] %v3358_v45  ;;  %v3236_v48 = vrot.slane %v6123_v6, 5  ;;  %v3286_v26 = vadd.f32 %v3232_v55, %v3142_v8 }
 0x454   :  { %v3145_v35 = vadd.f32 %v3091_v28, %v6080_v30  ;;  %3425 = vst [vmem:[#allocation1 + $0x6] ss:$9 sm:$0xff] %v3359_v23  ;;  %v3237_v40 = vrot.slane %v6123_v6, 6  ;;  %v3285_v2 = vadd.f32 %v6123_v6, %v3141_v39  ;;  %v3287_v5 = vadd.f32 %v3233_v14, %v3143_v27 }
 0x455   :  { %v3003_v12 = vadd.f32 %v6586_v56, %v6024_v4  ;;  %v6587_v21 = vrot.slane %v6026_v53, 2  ;;  %v2951_v4 = vrot.slane %v6131_v44, 1  ;;  %v3146_v60 = vadd.f32 %v3092_v29, %v3002_v38  ;;  %3427 = vst [vmem:[#allocation1 + $0x7] ss:$9 sm:$0xff] %v3360_v7 }
 0x456   :  { %v3288_v20 = vadd.f32 %v3234_v41, %v3144_v61  ;;  %v2952_v58 = vrot.slane %v6131_v44, 2  ;;  %v2953_v30 = vrot.slane %v6131_v44, 3  ;;  %v3289_v49 = vadd.f32 %v3235_v52, %v3145_v35  ;;  %3415 = vst [vmem:[#allocation1 + $0x1] ss:$9 sm:$0xff] %v3354_v33 }
 0x457   :  { %v6148_v43 = vadd.f32 %v6587_v21, %v5998_v15  ;;  %v3147_v3 = vadd.f32 %v3093_v42, %v3003_v12  ;;  %v6588_v51 = vrot.slane %v6054_v1, 7  ;;  %v2954_v57 = vrot.slane %v6131_v44, 4  ;;  %v6175_v56 = vpop.f32.mrf.mxu1 }
 0x458   :  { %v3290_v15 = vadd.f32 %v3236_v48, %v3146_v60  ;;  %v3332_v28 = vadd.f32 %v6102_v62, %v3286_v26  ;;  %v2955_v38 = vrot.slane %v6131_v44, 5  ;;  %v3331_v29 = vadd.f32 %v6072_v32, %v3285_v2 }
 0x459   :  { %v3004_v37 = vadd.f32 %v6588_v51, %v6028_v34  ;;  %v3291_v45 = vadd.f32 %v3237_v40, %v3147_v3  ;;  %v3333_v23 = vadd.f32 %v6085_v17, %v3287_v5  ;;  %v2956_v55 = vrot.slane %v6131_v44, 6  ;;  %v6165_v34 = vpop.f32.mrf.mxu0 }
 0x45a   :  { %v2957_v14 = vrot.slane %v6131_v44, 7  ;;  %v3005_v1 = vadd.f32 %v6131_v44, %v6030_v59  ;;  %v3334_v42 = vadd.f32 %v6088_v18, %v3288_v20  ;;  %v3006_v8 = vadd.f32 %v2951_v4, %v6032_v46 }
 0x45b   :  { %v3007_v7 = vadd.f32 %v2952_v58, %v6034_v9  ;;  %v3008_v41 = vadd.f32 %v2953_v30, %v6036_v19  ;;  %v3335_v39 = vadd.f32 %v6091_v0, %v3289_v49  ;;  %v3009_v27 = vadd.f32 %v2954_v57, %v6038_v63 }
 0x45c   :  { %v3094_v52 = vrot.slane %v6082_v31, 7  ;;  %v3336_v33 = vadd.f32 %v6094_v16, %v3290_v15  ;;  %v3362_v59 = vmax.f32 %v3332_v28, 0.0  ;;  %v3095_v12 = vrot.slane %v6165_v34, 1 }
 0x45d   :  { %v3337_v61 = vadd.f32 %v6098_v22, %v3291_v45  ;;  %v3361_v46 = vmax.f32 %v3331_v29, 0.0  ;;  %v3363_v48 = vmax.f32 %v3333_v23, 0.0  ;;  %v3010_v9 = vadd.f32 %v2955_v38, %v6040_v10  ;;  %v6182_v35 = vld [vmem:[#allocation1] sm:$0xff] }
 0x45e   :  { %v3011_v19 = vadd.f32 %v2956_v55, %v6043_v11  ;;  %v3096_v26 = vrot.slane %v6165_v34, 2  ;;  %v3364_v63 = vmax.f32 %v3334_v42, 0.0  ;;  %v3097_v31 = vrot.slane %v6165_v34, 3  ;;  %3430 = vst [vmem:[#allocation1 + $0x1] ss:$9 sm:$0xff] %v3362_v59 }
 0x45f   :  { %v3238_v40 = vrot.slane %v6123_v6, 7  ;;  %v3365_v2 = vmax.f32 %v3335_v39, 0.0  ;;  %v3239_v5 = vrot.slane %v6175_v56, 1  ;;  %3429 = vst [vmem:[#allocation1] ss:$9 sm:$0xff] %v3361_v46  ;;  %v3148_v21 = vadd.f32 %v3094_v52, %v3004_v37  ;;  %v6194_v37 = vpop.f32.mrf.mxu3 }
 0x460   :  { %v3098_v4 = vrot.slane %v6165_v34, 4  ;;  %v3366_v60 = vmax.f32 %v3336_v33, 0.0  ;;  %v3240_v10 = vrot.slane %v6175_v56, 2  ;;  %v3099_v11 = vrot.slane %v6165_v34, 5  ;;  %3431 = vst [vmem:[#allocation1 + $0x2] ss:$9 sm:$0xff] %v3363_v48 }
 0x461   :  { %v3150_v20 = vadd.f32 %v3095_v12, %v3006_v8  ;;  %v3367_v58 = vmax.f32 %v3337_v61, 0.0  ;;  %v3241_v30 = vrot.slane %v6175_v56, 3  ;;  %v3100_v6 = vrot.slane %v6165_v34, 6  ;;  %3432 = vst [vmem:[#allocation1 + $0x3] ss:$9 sm:$0xff] %v3364_v63 }
 0x462   :  { %v3149_v3 = vadd.f32 %v6165_v34, %v3005_v1  ;;  %v3151_v49 = vadd.f32 %v3096_v26, %v3007_v7  ;;  %v3242_v51 = vrot.slane %v6175_v56, 4  ;;  %v3152_v57 = vadd.f32 %v3097_v31, %v3008_v41  ;;  %3433 = vst [vmem:[#allocation1 + $0x4] ss:$9 sm:$0xff] %v3365_v2 }
 0x463   :  { %v3292_v15 = vadd.f32 %v3238_v40, %v3148_v21  ;;  %v3243_v28 = vrot.slane %v6175_v56, 5  ;;  %v3294_v38 = vadd.f32 %v3239_v5, %v3150_v20  ;;  %v3153_v45 = vadd.f32 %v3098_v4, %v3009_v27  ;;  %3434 = vst [vmem:[#allocation1 + $0x5] ss:$9 sm:$0xff] %v3366_v60 }
 0x464   :  { %v3244_v29 = vrot.slane %v6175_v56, 6  ;;  %v3293_v23 = vadd.f32 %v6175_v56, %v3149_v3  ;;  %v3295_v55 = vadd.f32 %v3240_v10, %v3151_v49  ;;  %v6589_v1 = vrot.slane %v6026_v53, 3  ;;  %3435 = vst [vmem:[#allocation1 + $0x6] ss:$9 sm:$0xff] %v3367_v58  ;;  %v3218_v10 = vpop.f32.mrf.mxu1 }
 0x465   :  { %v6590_v8 = vrot.slane %v6026_v53, 4  ;;  %v3154_v41 = vadd.f32 %v3099_v11, %v3010_v9  ;;  %v3296_v39 = vadd.f32 %v3241_v30, %v3152_v57  ;;  %v2958_v52 = vrot.slane %v6194_v37, 1 }
 0x466   :  { %v2769_v42 = vadd.f32 %v6589_v1, %v6000_v13  ;;  %v2959_v27 = vrot.slane %v6194_v37, 2  ;;  %v3155_v33 = vadd.f32 %v3100_v6, %v3011_v19  ;;  %v3297_v59 = vadd.f32 %v3242_v51, %v3153_v45 }
 0x467   :  { %v2770_v7 = vadd.f32 %v6590_v8, %v6002_v24  ;;  %v6591_v12 = vrot.slane %v6026_v53, 5  ;;  %v3338_v46 = vadd.f32 %v6072_v32, %v3292_v15  ;;  %v3298_v13 = vadd.f32 %v3243_v28, %v3154_v41  ;;  %v3074_v53 = vpop.f32.mrf.mxu0 }
 0x468   :  { %v3340_v48 = vadd.f32 %v6085_v17, %v3294_v38  ;;  %v3012_v24 = vadd.f32 %v2957_v14, %v6045_v47  ;;  %v3299_v9 = vadd.f32 %v3244_v29, %v3155_v33  ;;  %v3339_v26 = vadd.f32 %v6102_v62, %v3293_v23 }
 0x469   :  { %v2771_v61 = vadd.f32 %v6591_v12, %v6007_v54  ;;  %v3341_v63 = vadd.f32 %v6088_v18, %v3295_v55  ;;  %v2960_v19 = vrot.slane %v6194_v37, 3  ;;  %v2961_v31 = vrot.slane %v6194_v37, 4 }
 0x46a   :  { %v2962_v54 = vrot.slane %v6194_v37, 5  ;;  %v3342_v40 = vadd.f32 %v6091_v0, %v3296_v39  ;;  %v3013_v2 = vadd.f32 %v6194_v37, %v6052_v50  ;;  %v3014_v44 = vadd.f32 %v2958_v52, %v6057_v36 }
 0x46b   :  { %v3015_v47 = vadd.f32 %v2959_v27, %v6148_v43  ;;  %v3343_v14 = vadd.f32 %v6094_v16, %v3297_v59  ;;  %v3101_v5 = vrot.slane %v6165_v34, 7  ;;  %v3368_v21 = vmax.f32 %v3338_v46, 0.0  ;;  %v6230_v50 = vld [vmem:[#allocation1] sm:$0xff] }
 0x46c   :  { %v3344_v4 = vadd.f32 %v6098_v22, %v3298_v13  ;;  %v3370_v60 = vmax.f32 %v3340_v48, 0.0  ;;  %v3102_v11 = vrot.slane %v3074_v53, 1  ;;  %v6592_v20 = vrot.slane %v6072_v32, 7 }
 0x46d   :  { %v3369_v30 = vmax.f32 %v3339_v26, 0.0  ;;  %v3371_v6 = vmax.f32 %v3341_v63, 0.0  ;;  %v3016_v36 = vadd.f32 %v2960_v19, %v2769_v42  ;;  %v3017_v3 = vadd.f32 %v2961_v31, %v2770_v7  ;;  %3437 = vst [vmem:[#allocation1] ss:$9 sm:$0xff] %v3368_v21 }
 0x46e   :  { %v3345_v58 = vadd.f32 %v6592_v20, %v3299_v9  ;;  %v3103_v43 = vrot.slane %v3074_v53, 2  ;;  %v3372_v49 = vmax.f32 %v3342_v40, 0.0  ;;  %v3104_v51 = vrot.slane %v3074_v53, 3  ;;  %3439 = vst [vmem:[#allocation1 + $0x2] ss:$9 sm:$0xff] %v3370_v60 }
 0x46f   :  { %v3245_v34 = vrot.slane %v6175_v56, 7  ;;  %v3373_v37 = vmax.f32 %v3343_v14, 0.0  ;;  %v3246_v57 = vrot.slane %v3218_v10, 1  ;;  %3438 = vst [vmem:[#allocation1 + $0x1] ss:$9 sm:$0xff] %v3369_v30  ;;  %v3156_v15 = vadd.f32 %v3101_v5, %v3012_v24 }
 0x470   :  { %v3105_v28 = vrot.slane %v3074_v53, 4  ;;  %v3374_v38 = vmax.f32 %v3344_v4, 0.0  ;;  %v3247_v45 = vrot.slane %v3218_v10, 2  ;;  %v3106_v29 = vrot.slane %v3074_v53, 5  ;;  %3440 = vst [vmem:[#allocation1 + $0x3] ss:$9 sm:$0xff] %v3371_v6 }
 0x471   :  { %v3158_v23 = vadd.f32 %v3102_v11, %v3014_v44  ;;  %v3375_v55 = vmax.f32 %v3345_v58, 0.0  ;;  %v3248_v1 = vrot.slane %v3218_v10, 3  ;;  %v3018_v42 = vadd.f32 %v2962_v54, %v2771_v61  ;;  %3441 = vst [vmem:[#allocation1 + $0x4] ss:$9 sm:$0xff] %v3372_v49 }
 0x472   :  { %v3157_v8 = vadd.f32 %v3074_v53, %v3013_v2  ;;  %v3159_v7 = vadd.f32 %v3103_v43, %v3015_v47  ;;  %v3249_v41 = vrot.slane %v3218_v10, 4  ;;  %v3160_v39 = vadd.f32 %v3104_v51, %v3016_v36  ;;  %3442 = vst [vmem:[#allocation1 + $0x5] ss:$9 sm:$0xff] %v3373_v37 }
 0x473   :  { %v3300_v56 = vadd.f32 %v3245_v34, %v3156_v15  ;;  %v3250_v52 = vrot.slane %v3218_v10, 5  ;;  %v3302_v27 = vadd.f32 %v3246_v57, %v3158_v23  ;;  %v3161_v33 = vadd.f32 %v3105_v28, %v3017_v3  ;;  %3443 = vst [vmem:[#allocation1 + $0x6] ss:$9 sm:$0xff] %v3374_v38 }
 0x474   :  { %v3301_v59 = vadd.f32 %v3218_v10, %v3157_v8  ;;  %v3303_v12 = vadd.f32 %v3247_v45, %v3159_v7  ;;  %v3162_v46 = vadd.f32 %v3106_v29, %v3018_v42  ;;  %v3304_v13 = vadd.f32 %v3248_v1, %v3160_v39  ;;  %3444 = vst [vmem:[#allocation1 + $0x7] ss:$9 sm:$0xff] %v3375_v55 }
 0x475   :  { %v3305_v48 = vadd.f32 %v3249_v41, %v3161_v33  ;;  %v3346_v24 = vadd.f32 %v6072_v32, %v3300_v56  ;;  %v3348_v9 = vadd.f32 %v6085_v17, %v3302_v27  ;;  %v6237_v26 = vpack.c.bf16 %v6182_v35, %v6182_v35  ;;  %v4929_v35 = vld [vmem:[%s6470_s2 + $0x28] sm:$0xff]  ;;  %v4932_v33 = vld [vmem:[%s6470_s2 + $0x40] sm:$0xff] }
 0x476   :  { %v3306_v61 = vadd.f32 %v3250_v52, %v3162_v46  ;;  %v3347_v63 = vadd.f32 %v6102_v62, %v3301_v59  ;;  %v3349_v19 = vadd.f32 %v6088_v18, %v3303_v12  ;;  %v3350_v31 = vadd.f32 %v6091_v0, %v3304_v13  ;;  %3626 = vmatpush.bf16.msrb.mxu3 %v4929_v35  ;;  %v4933_v27 = vld [vmem:[%s6470_s2 + $0x48] sm:$0xff]  ;;  %v4935_v12 = vld [vmem:[%s6470_s2 + $0x58] sm:$0xff]  ;;  %v4934_v13 = vld [vmem:[%s6470_s2 + $0x50] sm:$0xff] }
 0x477   :  { %v3351_v54 = vadd.f32 %v6094_v16, %v3305_v48  ;;  %v3376_v53 = vmax.f32 %v3346_v24, 0.0  ;;  %v3378_v2 = vmax.f32 %v3348_v9, 0.0  ;;  %v3474_v32 = vrot.slane %v6237_v26, 3  ;;  %v4928_v16 = vld [vmem:[%s6470_s2 + $0x20] sm:$0xff]  ;;  %3695 = vmatpush.bf16.msra.mxu2 %v4933_v27 }
 0x478   :  { %v3352_v40 = vadd.f32 %v6098_v22, %v3306_v61  ;;  %v3377_v44 = vmax.f32 %v3347_v63, 0.0  ;;  %v3379_v17 = vmax.f32 %v3349_v19, 0.0  ;;  %v3380_v62 = vmax.f32 %v3350_v31, 0.0 }
 0x479   :  { %v3381_v0 = vmax.f32 %v3351_v54, 0.0  ;;  %v3479_v5 = vsel %vm55_vm1, %v6237_v26, %v3474_v32  ;;  %v3482_v21 = vsel %vm59_vm2, %v6237_v26, %v3474_v32  ;;  %v3485_v4 = vsel %vm63_vm3, %v6237_v26, %v3474_v32 }
 0x47a   :  { %v3382_v22 = vmax.f32 %v3352_v40, 0.0  ;;  %v3481_v11 = vrot.slane %v3479_v5, 1  ;;  %3627 = vmatpush.bf16.msrb.mxu3 %v4928_v16  ;;  %v3484_v58 = vrot.slane %v3482_v21, 2  ;;  %v3478_v6 = vsel %vm50_vm0, %v6237_v26, %v3474_v32 }
 0x47b   :  { %v3445_v47 = vld [vmem:[#allocation1] sm:$0xff]  ;;  %v3487_v36 = vrot.slane %v3485_v4, 3  ;;  %v3500_v34 = vshrl.u32 %v3478_v6, 16  ;;  %3696 = vmatpush.bf16.msra.mxu2 %v4932_v33  ;;  %v6300_v31 = vpack.c.bf16 %v6230_v50, %v6230_v50 }
 0x47c   :  { %3446 = vst [vmem:[#allocation1] ss:$9 sm:$0xff] %v3376_v53  ;;  %v6248_v18 = vpack.c.bf16 %v3445_v47, %v3445_v47  ;;  %v3505_v51 = vshll.u32 %v3481_v11, 16  ;;  %v3508_v37 = vshrl.u32 %v3481_v11, 16  ;;  %v3513_v57 = vshll.u32 %v3484_v58, 16  ;;  %v4936_v50 = vld [vmem:[%s6470_s2 + $0x60] sm:$0xff] }
 0x47d   :  { %3447 = vst [vmem:[#allocation1 + $0x1] ss:$9 sm:$0xff] %v3377_v44  ;;  %v3516_v28 = vshrl.u32 %v3484_v58, 16  ;;  %v3521_v38 = vshll.u32 %v3487_v36, 16 }
 0x47e   :  { %3448 = vst [vmem:[#allocation1 + $0x2] ss:$9 sm:$0xff] %v3378_v2  ;;  %v3475_v14 = vrot.slane %v6248_v18, 3  ;;  %v3507_v8 = vsel %vm5411_vm8, %v3500_v34, %v3505_v51  ;;  %v3515_v7 = vsel %vm5411_vm8, %v3508_v37, %v3513_v57  ;;  %3822 = vmatpush.bf16.msra.mxu3 %v4935_v12  ;;  %v4937_v2 = vld [vmem:[%s6470_s2 + $0x68] sm:$0xff]  ;;  %v4939_v57 = vld [vmem:[%s6470_s2 + $0x78] sm:$0xff] }
 0x47f   :  { %3449 = vst [vmem:[#allocation1 + $0x3] ss:$9 sm:$0xff] %v3379_v17  ;;  %v3523_v39 = vsel %vm5411_vm8, %v3516_v28, %v3521_v38  ;;  %3896 = vmatpush.bf16.msra.mxu0 %v4937_v2  ;;  %4021 = vmatpush.bf16.msra.mxu1 %v4939_v57  ;;  %v4938_v38 = vld [vmem:[%s6470_s2 + $0x70] sm:$0xff] }
 0x480   :  { %3450 = vst [vmem:[#allocation1 + $0x4] ss:$9 sm:$0xff] %v3380_v62  ;;  %v3491_v60 = vsel %vm55_vm1, %v6248_v18, %v3475_v14  ;;  %v3494_v10 = vsel %vm59_vm2, %v6248_v18, %v3475_v14  ;;  %v3497_v20 = vsel %vm63_vm3, %v6248_v18, %v3475_v14  ;;  %v3490_v49 = vsel %vm50_vm0, %v6248_v18, %v3475_v14 }
 0x481   :  { %3451 = vst [vmem:[#allocation1 + $0x5] ss:$9 sm:$0xff] %v3381_v0  ;;  %v3493_v30 = vrot.slane %v3491_v60, 1  ;;  %v3496_v3 = vrot.slane %v3494_v10, 2  ;;  %v3499_v43 = vrot.slane %v3497_v20, 3  ;;  %v3524_v23 = vshrl.u32 %v3490_v49, 16 }
 0x482   :  { %3452 = vst [vmem:[#allocation1 + $0x6] ss:$9 sm:$0xff] %v3382_v22  ;;  %3823 = vmatpush.bf16.msra.mxu3 %v4934_v13 }
 0x483   :  { %v3529_v15 = vshll.u32 %v3493_v30, 16  ;;  %v3532_v45 = vshrl.u32 %v3493_v30, 16  ;;  %v3537_v29 = vshll.u32 %v3496_v3, 16  ;;  %v3540_v55 = vshrl.u32 %v3496_v3, 16  ;;  %3897 = vmatpush.bf16.msra.mxu0 %v4936_v50  ;;  %4022 = vmatpush.bf16.msra.mxu1 %v4938_v38 }
 0x484   :  { %v3545_v1 = vshll.u32 %v3499_v43, 16 }
 0x485   :  { %v3531_v41 = vsel %vm5411_vm8, %v3524_v23, %v3529_v15  ;;  %v3539_v56 = vsel %vm5411_vm8, %v3532_v45, %v3537_v29 }
 0x486   :  { %v3547_v52 = vsel %vm5411_vm8, %v3540_v55, %v3545_v1 }
 0x489   :  { %v3453_v42 = vld [vmem:[#allocation1] sm:$0xff] }
 0x48a   :  { %3549 = vst [vmem:[#allocation1] ss:$9 sm:$0xff] %v3507_v8  ;;  %v6303_v54 = vpack.c.bf16 %v3453_v42, %v3453_v42  ;;  %v4941_v8 = vld [vmem:[%s6470_s2 + $0x88] sm:$0xff] }
 0x48b   :  { %3552 = vst [vmem:[#allocation1 + $0x1] ss:$9 sm:$0xff] %v3515_v7 }
 0x48c   :  { %3555 = vst [vmem:[#allocation1 + $0x2] ss:$9 sm:$0xff] %v3523_v39  ;;  %v4940_v39 = vld [vmem:[%s6470_s2 + $0x80] sm:$0xff] }
 0x48d   :  { %3558 = vst [vmem:[#allocation1 + $0x3] ss:$9 sm:$0xff] %v3531_v41 }
 0x48e   :  { %3561 = vst [vmem:[#allocation1 + $0x4] ss:$9 sm:$0xff] %v3539_v56 }
 0x48f   :  { %3564 = vst [vmem:[#allocation1 + $0x5] ss:$9 sm:$0xff] %v3547_v52 }
 0x496   :  { %v3565_v59 = vld [vmem:[#allocation1] sm:$0xff] }
 0x497   :  { %4774 = vmatmul.msk.bf16.vlgmr.msrb.gmra.mxu2 %vm1068_vm9, %v3565_v59  ;;  %3594 = vst [vmem:[#allocation1] ss:$9 sm:$0xff] %v3478_v6 }
 0x498   :  { %3596 = vst [vmem:[#allocation1 + $0x1] ss:$9 sm:$0xff] %v3481_v11  ;;  %4095 = vmatpush.bf16.msrb.mxu2 %v4941_v8 }
 0x499   :  { %3598 = vst [vmem:[#allocation1 + $0x2] ss:$9 sm:$0xff] %v3484_v58 }
 0x49a   :  { %3600 = vst [vmem:[#allocation1 + $0x3] ss:$9 sm:$0xff] %v3490_v49 }
 0x49b   :  { %3602 = vst [vmem:[#allocation1 + $0x4] ss:$9 sm:$0xff] %v3493_v30 }
 0x49c   :  { %3604 = vst [vmem:[#allocation1 + $0x5] ss:$9 sm:$0xff] %v3496_v3  ;;  %4096 = vmatpush.bf16.msrb.mxu2 %v4940_v39 }
 0x49d   :  { %3656 = vst [vmem:[#allocation1 + $0x20] sm:$0xff] %v6248_v18 }
 0x4a3   :  { %v3605_v46 = vld [vmem:[#allocation1] sm:$0xff] }
 0x4a4   :  { %4783 = vmatmul.msk.bf16.vlgmr.msrb.gmra.mxu3 %vm1068_vm9, %v3605_v46  ;;  %3649 = vst [vmem:[#allocation1] sm:$0xff] %v6237_v26  ;;  %v3658_v48 = vld [vmem:[#allocation1 + $0x21] ss:$4 sm:$0xff]  ;;  %v3660_v24 = vld [vmem:[#allocation1 + $0x22] ss:$4 sm:$0xff] }
 0x4a5   :  { %v3662_v61 = vld [vmem:[#allocation1 + $0x23] ss:$4 sm:$0xff] }
 0x4ab   :  { %v3651_v9 = vld [vmem:[#allocation1 + $0x1] ss:$4 sm:$0xff]  ;;  %v3653_v63 = vld [vmem:[#allocation1 + $0x2] ss:$4 sm:$0xff]  ;;  %v3655_v19 = vld [vmem:[#allocation1 + $0x3] ss:$4 sm:$0xff] }
 0x4ac   :  { %3663 = vst [vmem:[#allocation1] ss:$9 sm:$0xff] %v3651_v9 }
 0x4ad   :  { %3665 = vst [vmem:[#allocation1 + $0x1] ss:$9 sm:$0xff] %v3653_v63 }
 0x4ae   :  { %3667 = vst [vmem:[#allocation1 + $0x2] ss:$9 sm:$0xff] %v3655_v19 }
 0x4af   :  { %3669 = vst [vmem:[#allocation1 + $0x3] ss:$9 sm:$0xff] %v3658_v48 }
 0x4b0   :  { %3671 = vst [vmem:[#allocation1 + $0x4] ss:$9 sm:$0xff] %v3660_v24 }
 0x4b1   :  { %3673 = vst [vmem:[#allocation1 + $0x5] ss:$9 sm:$0xff] %v3662_v61 }
 0x4b2   :  { %3726 = vst [vmem:[#allocation1 + $0x20] sm:$0xff] %v6300_v31 }
 0x4b8   :  { %v3674_v53 = vld [vmem:[#allocation1] sm:$0xff] }
 0x4b9   :  { %4796 = vmatmul.msk.bf16.vlgmr.msra.gmra.mxu2 %vm1068_vm9, %v3674_v53  ;;  %3724 = vst [vmem:[#allocation1] sm:$0xff] %v6237_v26  ;;  %v3734_v40 = vld [vmem:[#allocation1 + $0x20] ss:$4 sm:$0xff] }
 0x4ba   :  { %3737 = vst [vmem:[#allocation1 + $0x20] sm:$0xff] %v6303_v54  ;;  %v3760_v14 = vshll.u32 %v3734_v40, 16 }
 0x4c0   :  { %v3728_v32 = vld [vmem:[#allocation1 + $0x1] ss:$4 sm:$0xff]  ;;  %v3730_v44 = vld [vmem:[#allocation1 + $0x2] ss:$4 sm:$0xff]  ;;  %v3732_v17 = vld [vmem:[#allocation1 + $0x3] ss:$4 sm:$0xff] }
 0x4c1   :  { %3735 = vst [vmem:[#allocation1] sm:$0xff] %v6248_v18  ;;  %v3742_v47 = vshrl.u32 %v3728_v32, 16  ;;  %v3746_v35 = vshll.u32 %v3730_v44, 16  ;;  %v3749_v62 = vshrl.u32 %v3730_v44, 16  ;;  %v3753_v0 = vshll.u32 %v3732_v17, 16 }
 0x4c2   :  { %v3756_v16 = vshrl.u32 %v3732_v17, 16  ;;  %v3741_v22 = vld [vmem:[#allocation1 + $0x20] ss:$4 sm:$0xff] }
 0x4c3   :  { %v3748_v60 = vsel %vm5411_vm8, %v3742_v47, %v3746_v35  ;;  %v3755_v10 = vsel %vm5411_vm8, %v3749_v62, %v3753_v0  ;;  %v3781_v3 = vshll.u32 %v3741_v22, 16 }
 0x4c4   :  { %v3762_v6 = vsel %vm5411_vm8, %v3756_v16, %v3760_v14 }
 0x4c8   :  { %v3738_v5 = vld [vmem:[#allocation1 + $0x1] ss:$4 sm:$0xff]  ;;  %v3739_v21 = vld [vmem:[#allocation1 + $0x2] ss:$4 sm:$0xff]  ;;  %v3740_v4 = vld [vmem:[#allocation1 + $0x3] ss:$4 sm:$0xff] }
 0x4c9   :  { %v3763_v11 = vshrl.u32 %v3738_v5, 16  ;;  %v3767_v20 = vshll.u32 %v3739_v21, 16  ;;  %v3770_v58 = vshrl.u32 %v3739_v21, 16  ;;  %v3774_v30 = vshll.u32 %v3740_v4, 16  ;;  %3785 = vst [vmem:[#allocation1] ss:$9 sm:$0xff] %v3748_v60 }
 0x4ca   :  { %v3777_v36 = vshrl.u32 %v3740_v4, 16  ;;  %3788 = vst [vmem:[#allocation1 + $0x1] ss:$9 sm:$0xff] %v3755_v10  ;;  %v4943_v21 = vld [vmem:[%s6470_s2 + $0x98] sm:$0xff]  ;;  %v4945_v4 = vld [vmem:[%s6470_s2 + $0xa8] sm:$0xff]  ;;  %v4942_v60 = vld [vmem:[%s6470_s2 + $0x90] sm:$0xff] }
 0x4cb   :  { %v3769_v43 = vsel %vm5411_vm8, %v3763_v11, %v3767_v20  ;;  %v3776_v49 = vsel %vm5411_vm8, %v3770_v58, %v3774_v30  ;;  %3791 = vst [vmem:[#allocation1 + $0x2] ss:$9 sm:$0xff] %v3762_v6  ;;  %4220 = vmatpush.bf16.msrb.mxu3 %v4943_v21  ;;  %4305 = vmatpush.bf16.msrb.mxu0 %v4945_v4  ;;  %v4947_v30 = vld [vmem:[%s6470_s2 + $0xb8] sm:$0xff]  ;;  %v4944_v6 = vld [vmem:[%s6470_s2 + $0xa0] sm:$0xff] }
 0x4cc   :  { %v3783_v51 = vsel %vm5411_vm8, %v3777_v36, %v3781_v3  ;;  %3794 = vst [vmem:[#allocation1 + $0x3] ss:$9 sm:$0xff] %v3769_v43  ;;  %4422 = vmatpush.bf16.msrb.mxu1 %v4947_v30 }
 0x4cd   :  { %3797 = vst [vmem:[#allocation1 + $0x4] ss:$9 sm:$0xff] %v3776_v49 }
 0x4ce   :  { %3800 = vst [vmem:[#allocation1 + $0x5] ss:$9 sm:$0xff] %v3783_v51 }
 0x4cf   :  { %3852 = vst [vmem:[#allocation1 + $0x20] sm:$0xff] %v6300_v31  ;;  %4221 = vmatpush.bf16.msrb.mxu3 %v4942_v60  ;;  %4306 = vmatpush.bf16.msrb.mxu0 %v4944_v6 }
 0x4d5   :  { %v3801_v34 = vld [vmem:[#allocation1] sm:$0xff] }
 0x4d6   :  { %4815 = vmatmul.msk.bf16.vlgmr.msra.gmra.mxu3 %vm1068_vm9, %v3801_v34  ;;  %3851 = vst [vmem:[#allocation1] sm:$0xff] %v6237_v26  ;;  %v3858_v37 = vld [vmem:[#allocation1 + $0x20] ss:$4 sm:$0xff] }
 0x4d7   :  { %3860 = vst [vmem:[#allocation1 + $0x20] sm:$0xff] %v6303_v54 }
 0x4dd   :  { %v3854_v15 = vld [vmem:[#allocation1 + $0x2] ss:$4 sm:$0xff]  ;;  %v3856_v28 = vld [vmem:[#allocation1 + $0x3] ss:$4 sm:$0xff] }
 0x4de   :  { %3859 = vst [vmem:[#allocation1] sm:$0xff] %v6248_v18  ;;  %v3863_v45 = vld [vmem:[#allocation1 + $0x20] ss:$4 sm:$0xff] }
 0x4e5   :  { %v3861_v29 = vld [vmem:[#allocation1 + $0x2] ss:$4 sm:$0xff]  ;;  %v3862_v23 = vld [vmem:[#allocation1 + $0x3] ss:$4 sm:$0xff] }
 0x4e6   :  { %3864 = vst [vmem:[#allocation1] ss:$9 sm:$0xff] %v3854_v15 }
 0x4e7   :  { %3866 = vst [vmem:[#allocation1 + $0x1] ss:$9 sm:$0xff] %v3856_v28 }
 0x4e8   :  { %3868 = vst [vmem:[#allocation1 + $0x2] ss:$9 sm:$0xff] %v3858_v37 }
 0x4e9   :  { %3870 = vst [vmem:[#allocation1 + $0x3] ss:$9 sm:$0xff] %v3861_v29 }
 0x4ea   :  { %3872 = vst [vmem:[#allocation1 + $0x4] ss:$9 sm:$0xff] %v3862_v23 }
 0x4eb   :  { %3874 = vst [vmem:[#allocation1 + $0x5] ss:$9 sm:$0xff] %v3863_v45 }
 0x4ec   :  { %3926 = vst [vmem:[#allocation1 + $0x20] sm:$0xff] %v6300_v31 }
 0x4f2   :  { %v3875_v55 = vld [vmem:[#allocation1] sm:$0xff] }
 0x4f3   :  { %4828 = vmatmul.msk.bf16.vlgmr.msra.gmra.mxu0 %vm1068_vm9, %v3875_v55  ;;  %3925 = vst [vmem:[#allocation1] sm:$0xff] %v6237_v26  ;;  %v3932_v1 = vld [vmem:[#allocation1 + $0x20] ss:$4 sm:$0xff]  ;;  %v3934_v42 = vld [vmem:[#allocation1 + $0x21] ss:$4 sm:$0xff] }
 0x4f4   :  { %3936 = vst [vmem:[#allocation1 + $0x20] sm:$0xff] %v6303_v54  ;;  %v3955_v12 = vshrl.u32 %v3932_v1, 16  ;;  %v3959_v46 = vshll.u32 %v3934_v42, 16  ;;  %v3952_v13 = vshll.u32 %v3932_v1, 16 }
 0x4f6   :  { %v3961_v32 = vsel %vm5411_vm8, %v3955_v12, %v3959_v46 }
 0x4fa   :  { %v3928_v7 = vld [vmem:[#allocation1 + $0x2] ss:$4 sm:$0xff]  ;;  %v3930_v41 = vld [vmem:[#allocation1 + $0x3] ss:$4 sm:$0xff] }
 0x4fb   :  { %3935 = vst [vmem:[#allocation1] sm:$0xff] %v6248_v18  ;;  %v3939_v56 = vld [vmem:[#allocation1 + $0x20] ss:$4 sm:$0xff]  ;;  %v3941_v52 = vshrl.u32 %v3928_v7, 16  ;;  %v3945_v27 = vshll.u32 %v3930_v41, 16  ;;  %v3948_v59 = vshrl.u32 %v3930_v41, 16 }
 0x4fc   :  { %v3940_v33 = vld [vmem:[#allocation1 + $0x21] ss:$4 sm:$0xff]  ;;  %v3973_v48 = vshll.u32 %v3939_v56, 16  ;;  %v3976_v63 = vshrl.u32 %v3939_v56, 16 }
 0x4fd   :  { %v3947_v9 = vsel %vm5411_vm8, %v3941_v52, %v3945_v27  ;;  %v3980_v19 = vshll.u32 %v3940_v33, 16  ;;  %v3954_v53 = vsel %vm5411_vm8, %v3948_v59, %v3952_v13  ;;  %v4251_v52 = vrot.slane %v6300_v31, 3 }
 0x4fe   :  { %v4252_v27 = vrot.slane %v6303_v54, 3 }
 0x4ff   :  { %v3982_v47 = vsel %vm5411_vm8, %v3976_v63, %v3980_v19  ;;  %v4255_v33 = vsel %vm55_vm1, %v6300_v31, %v4251_v52  ;;  %v4258_v59 = vsel %vm59_vm2, %v6300_v31, %v4251_v52  ;;  %v4254_v46 = vsel %vm50_vm0, %v6300_v31, %v4251_v52 }
 0x500   :  { %v4263_v12 = vsel %vm55_vm1, %v6303_v54, %v4252_v27  ;;  %v4257_v13 = vrot.slane %v4255_v33, 1 }
 0x501   :  { %v4265_v63 = vrot.slane %v4263_v12, 1 }
 0x502   :  { %v3937_v24 = vld [vmem:[#allocation1 + $0x2] ss:$4 sm:$0xff]  ;;  %v3938_v61 = vld [vmem:[#allocation1 + $0x3] ss:$4 sm:$0xff] }
 0x503   :  { %v3962_v40 = vshrl.u32 %v3937_v24, 16  ;;  %v3966_v2 = vshll.u32 %v3938_v61, 16  ;;  %v3969_v50 = vshrl.u32 %v3938_v61, 16  ;;  %3984 = vst [vmem:[#allocation1] ss:$9 sm:$0xff] %v3947_v9  ;;  %v4266_v24 = vsel %vm59_vm2, %v6303_v54, %v4252_v27 }
 0x504   :  { %3987 = vst [vmem:[#allocation1 + $0x1] ss:$9 sm:$0xff] %v3954_v53  ;;  %v4260_v61 = vrot.slane %v4258_v59, 2  ;;  %v4262_v9 = vsel %vm50_vm0, %v6303_v54, %v4252_v27  ;;  %v4268_v19 = vrot.slane %v4266_v24, 2  ;;  %v4334_v53 = vsel %vm63_vm3, %v6300_v31, %v4251_v52 }
 0x505   :  { %v3968_v44 = vsel %vm5411_vm8, %v3962_v40, %v3966_v2  ;;  %v3975_v17 = vsel %vm5411_vm8, %v3969_v50, %v3973_v48  ;;  %3990 = vst [vmem:[#allocation1 + $0x2] ss:$9 sm:$0xff] %v3961_v32  ;;  %v4337_v40 = vsel %vm63_vm3, %v6303_v54, %v4252_v27  ;;  %v4336_v2 = vrot.slane %v4334_v53, 3 }
 0x506   :  { %3993 = vst [vmem:[#allocation1 + $0x3] ss:$9 sm:$0xff] %v3968_v44  ;;  %v4344_v50 = vshll.u32 %v4257_v13, 16  ;;  %v4339_v32 = vrot.slane %v4337_v40, 3  ;;  %v4347_v44 = vshrl.u32 %v4257_v13, 16  ;;  %v4376_v21 = vshrl.u32 %v4268_v19, 16 }
 0x507   :  { %3996 = vst [vmem:[#allocation1 + $0x4] ss:$9 sm:$0xff] %v3975_v17  ;;  %v4351_v17 = vshll.u32 %v4260_v61, 16  ;;  %vm1329_vm0 = vcmask 128000   ;;  %vm1359_vm2 = vcmask 123904   ;;  %vm4520_vm3 = vcmask 9216  }
 0x508   :  { %3999 = vst [vmem:[#allocation1 + $0x5] ss:$9 sm:$0xff] %v3982_v47  ;;  %v4340_v47 = vshrl.u32 %v4254_v46, 16  ;;  %v4381_v4 = vshll.u32 %v4339_v32, 16 }
 0x509   :  { %4051 = vst [vmem:[#allocation1 + $0x20] sm:$0xff] %v6300_v31 }
 0x50f   :  { %v4000_v35 = vld [vmem:[#allocation1] sm:$0xff] }
 0x510   :  { %4847 = vmatmul.msk.bf16.vlgmr.msra.gmra.mxu1 %vm1068_vm9, %v4000_v35  ;;  %4050 = vst [vmem:[#allocation1] sm:$0xff] %v6237_v26  ;;  %v4055_v62 = vld [vmem:[#allocation1 + $0x20] ss:$4 sm:$0xff]  ;;  %v4057_v0 = vld [vmem:[#allocation1 + $0x21] ss:$4 sm:$0xff]  ;;  %v4354_v35 = vshrl.u32 %v4260_v61, 16 }
 0x511   :  { %4059 = vst [vmem:[#allocation1 + $0x20] sm:$0xff] %v6303_v54 }
 0x517   :  { %v4053_v16 = vld [vmem:[#allocation1 + $0x3] ss:$4 sm:$0xff] }
 0x518   :  { %4058 = vst [vmem:[#allocation1] sm:$0xff] %v6248_v18  ;;  %v4061_v22 = vld [vmem:[#allocation1 + $0x20] ss:$4 sm:$0xff]  ;;  %v4062_v14 = vld [vmem:[#allocation1 + $0x21] ss:$4 sm:$0xff] }
 0x51a   :  { %v3589_v30 = vpop.f32.mrf.mxu2 }
 0x51f   :  { %v4060_v5 = vld [vmem:[#allocation1 + $0x3] ss:$4 sm:$0xff] }
 0x520   :  { %4063 = vst [vmem:[#allocation1] ss:$9 sm:$0xff] %v4053_v16  ;;  %v4369_v16 = vshrl.u32 %v4265_v63, 16 }
 0x521   :  { %4065 = vst [vmem:[#allocation1 + $0x1] ss:$9 sm:$0xff] %v4055_v62  ;;  %v4359_v62 = vshll.u32 %v4336_v2, 16 }
 0x522   :  { %4067 = vst [vmem:[#allocation1 + $0x2] ss:$9 sm:$0xff] %v4057_v0  ;;  %v4366_v0 = vshll.u32 %v4265_v63, 16 }
 0x523   :  { %4069 = vst [vmem:[#allocation1 + $0x3] ss:$9 sm:$0xff] %v4060_v5  ;;  %v4362_v5 = vshrl.u32 %v4262_v9, 16  ;;  %v4361_v60 = vsel %vm5411_vm8, %v4354_v35, %v4359_v62 }
 0x524   :  { %4071 = vst [vmem:[#allocation1 + $0x4] ss:$9 sm:$0xff] %v4061_v22  ;;  %v4373_v22 = vshll.u32 %v4268_v19, 16 }
 0x525   :  { %4073 = vst [vmem:[#allocation1 + $0x5] ss:$9 sm:$0xff] %v4062_v14 }
 0x526   :  { %4125 = vst [vmem:[#allocation1 + $0x20] sm:$0xff] %v6300_v31  ;;  %v4346_v31 = vsel %vm5411_vm8, %v4340_v47, %v4344_v50 }
 0x527   :  { %v3629_v6 = vpop.f32.mrf.mxu3 }
 0x52c   :  { %v4074_v10 = vld [vmem:[#allocation1] sm:$0xff] }
 0x52d   :  { %4860 = vmatmul.msk.bf16.vlgmr.msrb.gmra.mxu2 %vm1068_vm9, %v4074_v10  ;;  %4124 = vst [vmem:[#allocation1] sm:$0xff] %v6237_v26  ;;  %v4129_v11 = vld [vmem:[#allocation1 + $0x20] ss:$4 sm:$0xff]  ;;  %v4131_v20 = vld [vmem:[#allocation1 + $0x21] ss:$4 sm:$0xff]  ;;  %v4368_v10 = vsel %vm5411_vm8, %v4362_v5, %v4366_v0 }
 0x52e   :  { %v4133_v58 = vld [vmem:[#allocation1 + $0x22] ss:$4 sm:$0xff]  ;;  %v4147_v26 = vshrl.u32 %v4129_v11, 16  ;;  %v4151_v43 = vshll.u32 %v4131_v20, 16  ;;  %v4144_v37 = vshll.u32 %v4129_v11, 16  ;;  %v4154_v57 = vshrl.u32 %v4131_v20, 16 }
 0x52f   :  { %4135 = vst [vmem:[#allocation1 + $0x20] sm:$0xff] %v6303_v54  ;;  %v4158_v15 = vshll.u32 %v4133_v58, 16  ;;  %v4353_v54 = vsel %vm5411_vm8, %v4347_v44, %v4351_v17  ;;  %v4375_v11 = vsel %vm5411_vm8, %v4369_v16, %v4373_v22  ;;  %v4383_v20 = vsel %vm5411_vm8, %v4376_v21, %v4381_v4 }
 0x530   :  { %v4153_v45 = vsel %vm5411_vm8, %v4147_v26, %v4151_v43 }
 0x531   :  { %v4160_v7 = vsel %vm5411_vm8, %v4154_v57, %v4158_v15 }
 0x534   :  { %v4127_v36 = vld [vmem:[#allocation1 + $0x3] ss:$4 sm:$0xff] }
 0x535   :  { %4134 = vst [vmem:[#allocation1] sm:$0xff] %v6248_v18  ;;  %v4140_v3 = vshrl.u32 %v4127_v36, 16  ;;  %v4946_v18 = vld [vmem:[%s6470_s2 + $0xb0] sm:$0xff]  ;;  %v3591_v36 = vpop.f32.mrf.mxu2 }
 0x536   :  { %v4137_v49 = vld [vmem:[#allocation1 + $0x20] ss:$4 sm:$0xff]  ;;  %v4138_v51 = vld [vmem:[#allocation1 + $0x21] ss:$4 sm:$0xff]  ;;  %v4139_v34 = vld [vmem:[#allocation1 + $0x22] ss:$4 sm:$0xff]  ;;  %4423 = vmatpush.bf16.msrb.mxu1 %v4946_v18 }
 0x537   :  { %v4146_v38 = vsel %vm5411_vm8, %v4140_v3, %v4144_v37  ;;  %v4168_v29 = vshrl.u32 %v4137_v49, 16  ;;  %v4172_v23 = vshll.u32 %v4138_v51, 16  ;;  %v4165_v1 = vshll.u32 %v4137_v49, 16  ;;  %v3631_v3 = vpop.f32.mrf.mxu3 }
 0x538   :  { %v4175_v42 = vshrl.u32 %v4138_v51, 16  ;;  %v4179_v8 = vshll.u32 %v4139_v34, 16  ;;  %v3630_v34 = vadd.f32 %v3629_v6, %v3589_v30  ;;  %v3632_v57 = vadd.f32 %v3631_v3, %v3591_v36 }
 0x539   :  { %v4174_v39 = vsel %vm5411_vm8, %v4168_v29, %v4172_v23 }
 0x53a   :  { %v4181_v56 = vsel %vm5411_vm8, %v4175_v42, %v4179_v8  ;;  %v3637_v23 = vrot.slane %v3630_v34, 4  ;;  %v3638_v18 = vrot.slane %v3630_v34, 6  ;;  %v3639_v8 = vrot.slane %v3632_v57, 2 }
 0x53c   :  { %v4136_v28 = vld [vmem:[#allocation1 + $0x3] ss:$4 sm:$0xff] }
 0x53d   :  { %v4161_v55 = vshrl.u32 %v4136_v28, 16  ;;  %4183 = vst [vmem:[#allocation1] ss:$9 sm:$0xff] %v4146_v38  ;;  %v3698_v26 = vpop.f32.mrf.mxu2 }
 0x53e   :  { %4186 = vst [vmem:[#allocation1 + $0x1] ss:$9 sm:$0xff] %v4153_v45  ;;  %v3705_v15 = vrot.slane %v3698_v26, 2  ;;  %v3706_v28 = vrot.slane %v3698_v26, 4  ;;  %v3707_v25 = vrot.slane %v3698_v26, 6  ;;  %v3636_v45 = vrot.slane %v3630_v34, 2 }
 0x53f   :  { %v4167_v41 = vsel %vm5411_vm8, %v4161_v55, %v4165_v1  ;;  %4189 = vst [vmem:[#allocation1 + $0x2] ss:$9 sm:$0xff] %v4160_v7  ;;  %v3713_v7 = vadd.f32 %v3698_v26, %v3630_v34 }
 0x540   :  { %4192 = vst [vmem:[#allocation1 + $0x3] ss:$9 sm:$0xff] %v4167_v41  ;;  %v3714_v41 = vadd.f32 %v3705_v15, %v3636_v45  ;;  %v3716_v52 = vadd.f32 %v3707_v25, %v3638_v18 }
 0x541   :  { %4195 = vst [vmem:[#allocation1 + $0x4] ss:$9 sm:$0xff] %v4174_v39 }
 0x542   :  { %4198 = vst [vmem:[#allocation1 + $0x5] ss:$9 sm:$0xff] %v4181_v56  ;;  %v3715_v56 = vadd.f32 %v3706_v28, %v3637_v23 }
 0x545   :  { %v3700_v51 = vpop.f32.mrf.mxu2 }
 0x546   :  { %v3708_v29 = vrot.slane %v3700_v51, 2  ;;  %v3717_v12 = vadd.f32 %v3700_v51, %v3632_v57  ;;  %v4953_v57 = vld [vmem:[%s6471_s3 + $0x3] ss:$0 sm:$0xff] }
 0x549   :  { %v4199_v48 = vld [vmem:[#allocation1] sm:$0xff] }
 0x54a   :  { %4879 = vmatmul.msk.bf16.vlgmr.msrb.gmra.mxu3 %vm1068_vm9, %v4199_v48  ;;  %4269 = vst [vmem:[#allocation1] ss:$9 sm:$0xff] %v4254_v46  ;;  %v3718_v46 = vadd.f32 %v3708_v29, %v3639_v8 }
 0x54b   :  { %4272 = vst [vmem:[#allocation1 + $0x1] ss:$9 sm:$0xff] %v4257_v13 }
 0x54c   :  { %4275 = vst [vmem:[#allocation1 + $0x2] ss:$9 sm:$0xff] %v4260_v61 }
 0x54d   :  { %4277 = vst [vmem:[#allocation1 + $0x3] ss:$9 sm:$0xff] %v4262_v9 }
 0x54e   :  { %4280 = vst [vmem:[#allocation1 + $0x4] ss:$9 sm:$0xff] %v4265_v63 }
 0x54f   :  { %4283 = vst [vmem:[#allocation1 + $0x5] ss:$9 sm:$0xff] %v4268_v19 }
 0x556   :  { %v4284_v14 = vld [vmem:[#allocation1] sm:$0xff] }
 0x557   :  { %4892 = vmatmul.msk.bf16.vlgmr.msrb.gmra.mxu0 %vm1068_vm9, %v4284_v14  ;;  %4385 = vst [vmem:[#allocation1] ss:$9 sm:$0xff] %v4346_v31 }
 0x558   :  { %4388 = vst [vmem:[#allocation1 + $0x1] ss:$9 sm:$0xff] %v4353_v54 }
 0x559   :  { %4391 = vst [vmem:[#allocation1 + $0x2] ss:$9 sm:$0xff] %v4361_v60  ;;  %v3825_v43 = vpop.f32.mrf.mxu3 }
 0x55a   :  { %4394 = vst [vmem:[#allocation1 + $0x3] ss:$9 sm:$0xff] %v4368_v10  ;;  %v3832_v55 = vrot.slane %v3825_v43, 2  ;;  %v3833_v1 = vrot.slane %v3825_v43, 4  ;;  %v3834_v39 = vrot.slane %v3825_v43, 6  ;;  %v3840_v13 = vadd.f32 %v3825_v43, %v3713_v7 }
 0x55b   :  { %4397 = vst [vmem:[#allocation1 + $0x4] ss:$9 sm:$0xff] %v4375_v11 }
 0x55c   :  { %4400 = vst [vmem:[#allocation1 + $0x5] ss:$9 sm:$0xff] %v4383_v20  ;;  %v3841_v24 = vadd.f32 %v3832_v55, %v3714_v41  ;;  %v3842_v61 = vadd.f32 %v3833_v1, %v3715_v56  ;;  %v3843_v53 = vadd.f32 %v3834_v39, %v3716_v52  ;;  %v4448_v1 = vrot.slane %v4953_v57, 2 }
 0x561   :  { %v3827_v37 = vpop.f32.mrf.mxu3 }
 0x562   :  { %v3835_v40 = vrot.slane %v3827_v37, 2  ;;  %v3844_v54 = vadd.f32 %v3827_v37, %v3717_v12 }
 0x563   :  { %v4401_v58 = vld [vmem:[#allocation1] sm:$0xff] }
 0x564   :  { %4911 = vmatmul.msk.bf16.vlgmr.msrb.gmra.mxu1 %vm1068_vm9, %v4401_v58  ;;  %v3845_v11 = vadd.f32 %v3835_v40, %v3718_v46 }
 0x570   :  { %v3899_v49 = vpop.f32.mrf.mxu0 }
 0x571   :  { %v3906_v27 = vrot.slane %v3899_v49, 2  ;;  %v3907_v33 = vrot.slane %v3899_v49, 4  ;;  %v3908_v48 = vrot.slane %v3899_v49, 6  ;;  %v3914_v2 = vadd.f32 %v3899_v49, %v3840_v13 }
 0x573   :  { %v3915_v32 = vadd.f32 %v3906_v27, %v3841_v24  ;;  %v3916_v44 = vadd.f32 %v3907_v33, %v3842_v61  ;;  %v3917_v35 = vadd.f32 %v3908_v48, %v3843_v53  ;;  %v6593_v48 = vld [vmem:[#allocation40_spill] sm:$0xff] }
 0x574   :  { %v1339_v24 = vsel %vm263_vm4, %v6593_v48, 0.0 }
 0x578   :  { %v3901_v42 = vpop.f32.mrf.mxu0 }
 0x579   :  { %v3909_v62 = vrot.slane %v3901_v42, 2  ;;  %v3918_v6 = vadd.f32 %v3901_v42, %v3844_v54  ;;  %v4449_v42 = vrot.slane %v4953_v57, 4 }
 0x57b   :  { %v3919_v26 = vadd.f32 %v3909_v62, %v3845_v11  ;;  %v6595_v62 = vld [vmem:[#allocation41_spill] sm:$0xff] }
 0x58d   :  { %v4024_v38 = vpop.f32.mrf.mxu1 }
 0x58e   :  { %v4031_v9 = vrot.slane %v4024_v38, 2  ;;  %v4032_v63 = vrot.slane %v4024_v38, 4  ;;  %v4033_v50 = vrot.slane %v4024_v38, 6  ;;  %v4039_v0 = vadd.f32 %v4024_v38, %v3914_v2  ;;  %v6594_v2 = vld [vmem:[#allocation39_spill] sm:$0xff] }
 0x590   :  { %v4040_v22 = vadd.f32 %v4031_v9, %v3915_v32  ;;  %v4041_v31 = vadd.f32 %v4032_v63, %v3916_v44  ;;  %v4042_v60 = vadd.f32 %v4033_v50, %v3917_v35  ;;  %v1338_v50 = vsel %vm263_vm4, %v6594_v2, 0.0  ;;  %v4955_v2 = vld [vmem:[%s6471_s3 + $0x4] ss:$0 sm:$0xff] }
 0x591   :  { %v1340_v35 = vadd.f32 %v1339_v24, %v1338_v50 }
 0x595   :  { %v4026_v14 = vpop.f32.mrf.mxu1 }
 0x596   :  { %v4034_v36 = vrot.slane %v4026_v14, 2  ;;  %v4043_v38 = vadd.f32 %v4026_v14, %v3918_v6 }
 0x598   :  { %v4044_v29 = vadd.f32 %v4034_v36, %v3919_v26  ;;  %v6598_v26 = vld [vmem:[#allocation38_spill] sm:$0xff] }
 0x5b0   :  { %v4098_v59 = vpop.f32.mrf.mxu2 }
 0x5b1   :  { %v4105_v17 = vrot.slane %v4098_v59, 2  ;;  %v4106_v47 = vrot.slane %v4098_v59, 4  ;;  %v4107_v16 = vrot.slane %v4098_v59, 6  ;;  %v4113_v20 = vadd.f32 %v4098_v59, %v4039_v0 }
 0x5b2   :  { %v1341_v0 = vsel %vm1329_vm0, %v6595_v62, 0.0 }
 0x5b3   :  { %v4114_v58 = vadd.f32 %v4105_v17, %v4040_v22  ;;  %v4115_v30 = vadd.f32 %v4106_v47, %v4041_v31  ;;  %v4116_v3 = vadd.f32 %v4107_v16, %v4042_v60  ;;  %v1342_v60 = vadd.f32 %v1341_v0, %v1340_v35 }
 0x5b8   :  { %v4100_v43 = vpop.f32.mrf.mxu2 }
 0x5b9   :  { %v4108_v23 = vrot.slane %v4100_v43, 2  ;;  %v4117_v18 = vadd.f32 %v4100_v43, %v4043_v38  ;;  %v1330_v43 = vsel %vm1329_vm0, %v6598_v26, 0.0 }
 0x5bb   :  { %v4118_v46 = vadd.f32 %v4108_v23, %v4044_v29 }
 0x5cd   :  { %v4223_v19 = vpop.f32.mrf.mxu3 }
 0x5ce   :  { %v4230_v5 = vrot.slane %v4223_v19, 2  ;;  %v4231_v21 = vrot.slane %v4223_v19, 4  ;;  %v4232_v10 = vrot.slane %v4223_v19, 6  ;;  %v4238_v49 = vadd.f32 %v4223_v19, %v4113_v20  ;;  %v6596_v20 = vld [vmem:[#allocation37_spill] sm:$0xff] }
 0x5d0   :  { %v4239_v51 = vadd.f32 %v4230_v5, %v4114_v58  ;;  %v4240_v34 = vadd.f32 %v4231_v21, %v4115_v30  ;;  %v4241_v15 = vadd.f32 %v4232_v10, %v4116_v3  ;;  %v1327_v58 = vsel %vm263_vm4, %v6596_v20, 0.0  ;;  %v6597_v30 = vld [vmem:[#allocation36_spill] sm:$0xff] }
 0x5d1   :  { %v1326_v6 = vsel %vm263_vm4, %v6597_v30, 0.0 }
 0x5d4   :  { %v4308_v4 = vpop.f32.mrf.mxu0 }
 0x5d5   :  { %v4315_v37 = vrot.slane %v4308_v4, 2  ;;  %v4316_v28 = vrot.slane %v4308_v4, 4  ;;  %v4317_v25 = vrot.slane %v4308_v4, 6  ;;  %v4225_v45 = vpop.f32.mrf.mxu3  ;;  %v4323_v55 = vadd.f32 %v4308_v4, %v4238_v49 }
 0x5d6   :  { %v4233_v39 = vrot.slane %v4225_v45, 2  ;;  %v4242_v13 = vadd.f32 %v4225_v45, %v4117_v18  ;;  %v1343_v49 = vrot.slane %v1342_v60, 4 }
 0x5d7   :  { %v4324_v8 = vadd.f32 %v4315_v37, %v4239_v51  ;;  %v4325_v7 = vadd.f32 %v4316_v28, %v4240_v34  ;;  %v4326_v41 = vadd.f32 %v4317_v25, %v4241_v15  ;;  %v1328_v51 = vadd.f32 %v1327_v58, %v1326_v6 }
 0x5d8   :  { %v4243_v53 = vadd.f32 %v4233_v39, %v4118_v46  ;;  %v1344_v15 = vadd.f32 %v1343_v49, %v1342_v60 }
 0x5da   :  { %v1345_v45 = vrot.slane %v1344_v15, 2 }
 0x5dc   :  { %v4310_v52 = vpop.f32.mrf.mxu0 }
 0x5dd   :  { %v4318_v40 = vrot.slane %v4310_v52, 2  ;;  %v4327_v16 = vadd.f32 %v4310_v52, %v4242_v13 }
 0x5df   :  { %v4328_v21 = vadd.f32 %v4318_v40, %v4243_v53 }
 0x5e1   :  { %v4425_v56 = vpop.f32.mrf.mxu1 }
 0x5e2   :  { %v4432_v27 = vrot.slane %v4425_v56, 2  ;;  %v4433_v33 = vrot.slane %v4425_v56, 4  ;;  %v4434_v59 = vrot.slane %v4425_v56, 6  ;;  %v4440_v12 = vadd.f32 %v4425_v56, %v4323_v55 }
 0x5e4   :  { %v4441_v61 = vadd.f32 %v4432_v27, %v4324_v8  ;;  %v4442_v9 = vadd.f32 %v4433_v33, %v4325_v7  ;;  %v4443_v63 = vadd.f32 %v4434_v59, %v4326_v41  ;;  %v4452_v19 = vadd.f32 %v4953_v57, %v4440_v12 }
 0x5e6   :  { %v4455_v32 = vadd.f32 %v4953_v57, %v4443_v63  ;;  %v4458_v44 = vmax.f32 %v4452_v19, 0.0  ;;  %v4453_v17 = vadd.f32 %v4448_v1, %v4441_v61  ;;  %v4454_v47 = vadd.f32 %v4449_v42, %v4442_v9  ;;  %v4954_v19 = vld [vmem:[%s6471_s3 + $0x5] ss:$0 sm:$0xff] }
 0x5e7   :  { %v1331_v57 = vadd.f32 %v1330_v43, %v1328_v51 }
 0x5e8   :  { %v4461_v22 = vmax.f32 %v4455_v32, 0.0  ;;  %4470 = vst [vmem:[#allocation1] ss:$4 sm:$0xff] %v4458_v44  ;;  %v4459_v31 = vmax.f32 %v4453_v17, 0.0  ;;  %v4460_v14 = vmax.f32 %v4454_v47, 0.0 }
 0x5e9   :  { %v4427_v5 = vpop.f32.mrf.mxu1  ;;  %v1332_v38 = vrot.slane %v1331_v57, 4 }
 0x5ea   :  { %4477 = vst [vmem:[#allocation1 + $0x20] ss:$4 sm:$0xff] %v4461_v22  ;;  %v4435_v4 = vrot.slane %v4427_v5, 2  ;;  %v4444_v54 = vadd.f32 %v4427_v5, %v4327_v16 }
 0x5eb   :  { %4472 = vst [vmem:[#allocation1 + $0x1] ss:$4 sm:$0xff] %v4459_v31  ;;  %v1333_v55 = vadd.f32 %v1332_v38, %v1331_v57  ;;  %v4956_v31 = vld [vmem:[%s6471_s3 + $0x7] ss:$0 sm:$0xff] }
 0x5ec   :  { %v4445_v10 = vadd.f32 %v4435_v4, %v4328_v21  ;;  %v4456_v11 = vadd.f32 %v4448_v1, %v4444_v54  ;;  %4474 = vst [vmem:[#allocation1 + $0x2] ss:$4 sm:$0xff] %v4460_v14  ;;  %v4957_v21 = vld [vmem:[%s6471_s3 + $0x6] ss:$0 sm:$0xff] }
 0x5ed   :  { %v1334_v39 = vrot.slane %v1333_v55, 2 }
 0x5ee   :  { %v4457_v36 = vadd.f32 %v4449_v42, %v4445_v10  ;;  %v4462_v3 = vmax.f32 %v4456_v11, 0.0  ;;  %v1346_v42 = vadd.f32 %v1345_v45, %v1344_v15 }
 0x5ef   :  { %v1335_v59 = vadd.f32 %v1334_v39, %v1333_v55 }
 0x5f0   :  { %v4463_v34 = vmax.f32 %v4457_v36, 0.0  ;;  %4479 = vst [vmem:[#allocation1 + $0x21] ss:$4 sm:$0xff] %v4462_v3  ;;  %v1347_v56 = vrot.slane %v1346_v42, 1 }
 0x5f1   :  { %v1336_v24 = vrot.slane %v1335_v59, 1 }
 0x5f2   :  { %4481 = vst [vmem:[#allocation1 + $0x22] ss:$4 sm:$0xff] %v4463_v34  ;;  %v1348_v12 = vadd.f32 %v1347_v56, %v1346_v42 }
 0x5f3   :  { %v4475_v37 = vld.sshfl [vmem:[#allocation1] sm:$0xff pattern:$0x73625140]  ;;  %v1337_v40 = vadd.f32 %v1336_v24, %v1335_v59 }
 0x5f4   :  { %v4485_v28 = vsel %vm1329_vm0, %v4475_v37, 0.0  ;;  %v1350_v61 = vmul.f32 0.045454547, %v1348_v12 }
 0x5f5   :  { %v4486_v25 = vrot.slane %v4485_v28, 4  ;;  %v1349_v47 = vmul.f32 0.045454547, %v1337_v40 }
 0x5f6   :  { %v1353_v44 = vmul.f32 %v4955_v2, %v1350_v61 }
 0x5f7   :  { %v4487_v29 = vadd.f32 %v4486_v25, %v4485_v28  ;;  %v1352_v0 = vmul.f32 %v4955_v2, %v1349_v47 }
 0x5f8   :  { %v1356_v62 = vrot.slane %v1353_v44, 7 }
 0x5f9   :  { %v4482_v23 = vld.sshfl [vmem:[#allocation1 + $0x20] sm:$0xff pattern:$0x73625140]  ;;  %v4488_v18 = vrot.slane %v4487_v29, 2 }
 0x5fa   :  { %v4492_v1 = vsel %vm1329_vm0, %v4482_v23, 0.0  ;;  %v1357_v16 = vsel %vm55_vm1, %v1356_v62, %v1352_v0 }
 0x5fb   :  { %v4489_v8 = vadd.f32 %v4488_v18, %v4487_v29  ;;  %v4493_v7 = vrot.slane %v4492_v1, 4  ;;  %v1360_v22 = vsel %vm1359_vm2, %v1357_v16, 0.0 }
 0x5fd   :  { %v4494_v41 = vadd.f32 %v4493_v7, %v4492_v1  ;;  %v4490_v52 = vrot.slane %v4489_v8, 1 }
 0x5ff   :  { %v4495_v27 = vrot.slane %v4494_v41, 2  ;;  %v4491_v46 = vadd.f32 %v4490_v52, %v4489_v8 }
 0x601   :  { %v4496_v33 = vadd.f32 %v4495_v27, %v4494_v41  ;;  %v4499_v9 = vmul.f32 0.16666667, %v4491_v46 }
 0x603   :  { %v4497_v13 = vrot.slane %v4496_v33, 1  ;;  %v4502_v50 = vmul.f32 %v4954_v19, %v4499_v9 }
 0x605   :  { %v4498_v48 = vadd.f32 %v4497_v13, %v4496_v33 }
 0x607   :  { %v4500_v63 = vmul.f32 0.16666667, %v4498_v48 }
 0x609   :  { %v4503_v53 = vmul.f32 %v4954_v19, %v4500_v63 }
 0x60b   :  { %v4506_v32 = vrot.slane %v4503_v53, 7 }
 0x60d   :  { %v4507_v17 = vsel %vm55_vm1, %v4506_v32, %v4502_v50  ;;  %vm4518_vm1 = vcmask 7168  }
 0x60e   :  { %v4509_v35 = vsel %vm1359_vm2, %v4507_v17, 0.0 }
 0x60f   :  { %4510 = vadd.xlane.f32.xlu0 %v4509_v35 }
 0x617   :  { %1361 = vadd.xlane.f32.xlu0 %v1360_v22 }
 0x682   :  { %v4511_v14 = vpop.xlane.xlu0 %4510 }
 0x683   :  { %v4513_v5 = vadd.f32 %v4956_v31, %v4511_v14 }
 0x685   :  { %4515 = vrot.lane.b32.xlu1 %v4513_v5, %s4984_s29 }
 0x68a   :  { %v1362_v4 = vpop.xlane.xlu0 %1361 }
 0x68b   :  { %v1364_v54 = vadd.f32 %v4957_v21, %v1362_v4 }
 0x6f7   :  { %v4516_v60 = vpop.permute.xlu1 %4515 }
 0x6f8   :  { %v4519_v10 = vsel %vm4518_vm1, %v1364_v54, %v4516_v60 }
 0x6f9   :  { %4521 = vst.msk [vmem:[#allocation2] sm:$0x3] %vm4520_vm3, %v4519_v10 }
 0x6fa   :  { %4532 = dma.vmem_to_hbm [thread:$0]  %s4528_s6, 32, %s4530_s1, [#allocation3]  }
 0x6fb   :  { %4982 = dma.done.wait [#allocation3], 32  }
 0x6fc   :  { %4983 = vsyncadd [#allocation3], 4294967264 }
 0x6fd   :  { %4537 = vsyncpa [#allocation3], 1 }

</bundles_post_ra>
